<compile_context>
chip_gen: v7x
topology: tpu7x:2x2x1
jax: 0.10.0
libtpu: 0.0.40
codegen_flags: <defaults>
</compile_context>

<pallas_src>
import functools
import math

import jax
import jax.numpy as jnp
from jax.experimental import pallas as pl
from jax.experimental.pallas import tpu as pltpu


# ----------------------------------------------------------------------------
# In-kernel helpers
# ----------------------------------------------------------------------------
def _gelu(x):
    # TODO(synk): PyTorch nn.GELU default is the exact erf GELU; the tanh
    # approximation is used here (Mosaic-friendly, ~1e-3 deviation).
    return 0.5 * x * (1.0 + jnp.tanh(0.7978845608028654 * (x + 0.044715 * x * x * x)))


def _ln_rows(x, gamma, beta, eps):
    """LayerNorm over the last dim.  x: [N, C] f32, gamma/beta: [1, C] f32."""
    mean = jnp.mean(x, axis=-1, keepdims=True)
    xc = x - mean
    var = jnp.mean(xc * xc, axis=-1, keepdims=True)
    return xc * jax.lax.rsqrt(var + eps) * gamma + beta


def _mm(a, b):
    """bf16 MXU matmul with f32 accumulation (casts are no-ops if already bf16)."""
    return jnp.dot(a.astype(jnp.bfloat16), b.astype(jnp.bfloat16),
                   preferred_element_type=jnp.float32)


def _attn_head(q_bf, k_bf, v_bf, scale):
    """Single softmax-attention head.  q_bf: [Nq, Dh] bf16, k_bf/v_bf: [Nk, Dh] bf16."""
    s = jax.lax.dot_general(q_bf, k_bf, (((1,), (1,)), ((), ())),
                            preferred_element_type=jnp.float32) * scale
    p = jnp.exp(s - jnp.max(s, axis=-1, keepdims=True))
    p = p * pl.reciprocal(jnp.sum(p, axis=-1, keepdims=True), approx=True)
    return jnp.dot(p.astype(jnp.bfloat16), v_bf, preferred_element_type=jnp.float32)


# ----------------------------------------------------------------------------
# Host-side helpers
# ----------------------------------------------------------------------------
def _nbytes(a):
    return math.prod(a.shape) * a.dtype.itemsize


def _vmem_limit(step_bytes):
    """Scoped-VMEM limit: double-buffered blocks + intermediates, safe clamp."""
    est = 3 * int(step_bytes) + (8 << 20)
    return int(min(max(est, 32 << 20), 64 << 20))


# ----------------------------------------------------------------------------
# Kernel A: group layer (LightGroupAttnBlock, value_is_key=True) + MLPMixer.
#   q = LN_q(group_token) (no q-proj), kn = LN_k(x), k = kn @ Wk + bk, v = kn
#   gt = multi-head softmax attention (no out-proj, no residual)
#   then `depth` mixer layers fully fused (patch mixer contracts over G so C
#   stays on the lane axis -- no transposes; residuals in-kernel).
# ----------------------------------------------------------------------------
def _make_group_mixer_kernel(num_heads, depth, scale, eps):
    def kernel(gt_ref, x_ref, qg, qb, kg, kb, wk, bk, *rest):
        o_ref = rest[-1]
        mix = rest[:-1]                                    # depth * 12 refs
        C = x_ref.shape[2]
        Dh = C // num_heads
        gt0 = gt_ref[0].astype(jnp.float32)                # [G, C]
        xx = x_ref[0].astype(jnp.float32)                  # [L, C]

        # ---- LightGroupAttnBlock ----
        q_bf = _ln_rows(gt0, qg[...], qb[...], eps).astype(jnp.bfloat16)
        kn = _ln_rows(xx, kg[...], kb[...], eps)           # [L, C] f32
        kn_bf = kn.astype(jnp.bfloat16)                    # cast once (keys + values)
        kp_bf = (_mm(kn_bf, wk[...]) + bk[...]).astype(jnp.bfloat16)
        # TODO(synk): for Dh < 128 a batched dot_general over a heads axis would
        # avoid the sub-128 lane slices; kept as a static loop for robustness.
        heads = []
        for h in range(num_heads):
            sl = slice(h * Dh, (h + 1) * Dh)
            heads.append(_attn_head(q_bf[:, sl], kp_bf[:, sl], kn_bf[:, sl], scale))
        gt = jnp.concatenate(heads, axis=-1)               # [G, C] f32

        # ---- MLPMixer layers, unrolled in-kernel (no HBM round trips) ----
        for d in range(depth):
            (n1g, n1b, w1t, b1, w2t, b2,
             n2g, n2b, wc1, bc1, wc2, bc2) = mix[12 * d:12 * (d + 1)]
            # patch mixer: contraction over G, C stays on lanes (no transpose)
            xn = _ln_rows(gt, n1g[...], n1b[...], eps)     # [G, C]
            hm = _gelu(_mm(w1t[...], xn) + b1[...])        # [pm, C]
            gt = gt + _mm(w2t[...], hm) + b2[...]          # fused residual
            # channel mixer
            xn2 = _ln_rows(gt, n2g[...], n2b[...], eps)
            h2 = _gelu(_mm(xn2, wc1[...]) + bc1[...])      # [G, cm]
            gt = gt + _mm(h2, wc2[...]) + bc2[...]         # fused residual

        o_ref[0] = gt.astype(o_ref.dtype)
    return kernel


def group_and_mix(x, params, num_heads, eps=1e-5):
    """Fused LightGroupAttnBlock + MLPMixer.  x: [B, L, C] -> gt: [B, G, C]."""
    B, L, C = x.shape
    gt0 = params["group_token"]                            # [1, G, C]
    G = gt0.shape[1]
    mixer = params["mixer"]
    depth = len(mixer)
    scale = float((C // num_heads) ** -0.5)
    bf = lambda t: t.astype(jnp.bfloat16)
    vec = lambda t: t.reshape(1, -1)
    cc = lambda b: (0, 0)

    inputs = [gt0, x,
              vec(params["gl_norm_query"][0]), vec(params["gl_norm_query"][1]),
              vec(params["gl_norm_key"][0]), vec(params["gl_norm_key"][1]),
              bf(params["gl_k_w"]), vec(params["gl_k_b"])]
    in_specs = [pl.BlockSpec((1, G, C), lambda b: (0, 0, 0)),   # group token (bcast)
                pl.BlockSpec((1, L, C), lambda b: (b, 0, 0)),   # image tokens
                pl.BlockSpec((1, C), cc), pl.BlockSpec((1, C), cc),
                pl.BlockSpec((1, C), cc), pl.BlockSpec((1, C), cc),
                pl.BlockSpec((C, C), cc), pl.BlockSpec((1, C), cc)]
    for lyr in mixer:
        pm = lyr["pm_w1t"].shape[0]
        cm = lyr["cm_w1"].shape[1]
        inputs += [vec(lyr["norm1"][0]), vec(lyr["norm1"][1]),
                   bf(lyr["pm_w1t"]), lyr["pm_b1"].reshape(pm, 1),
                   bf(lyr["pm_w2t"]), lyr["pm_b2"].reshape(G, 1),
                   vec(lyr["norm2"][0]), vec(lyr["norm2"][1]),
                   bf(lyr["cm_w1"]), vec(lyr["cm_b1"]),
                   bf(lyr["cm_w2"]), vec(lyr["cm_b2"])]
        in_specs += [pl.BlockSpec((1, C), cc), pl.BlockSpec((1, C), cc),
                     pl.BlockSpec((pm, G), cc), pl.BlockSpec((pm, 1), cc),
                     pl.BlockSpec((G, pm), cc), pl.BlockSpec((G, 1), cc),
                     pl.BlockSpec((1, C), cc), pl.BlockSpec((1, C), cc),
                     pl.BlockSpec((C, cm), cc), pl.BlockSpec((1, cm), cc),
                     pl.BlockSpec((cm, C), cc), pl.BlockSpec((1, C), cc)]

    step_bytes = (sum(_nbytes(a) for a in inputs) - _nbytes(x)
                  + _nbytes(x) // B + G * C * 4)
    return pl.pallas_call(
        _make_group_mixer_kernel(num_heads, depth, scale, eps),
        out_shape=jax.ShapeDtypeStruct((B, G, C), x.dtype),
        grid=(B,),
        in_specs=in_specs,
        out_specs=pl.BlockSpec((1, G, C), lambda b: (b, 0, 0)),
        compiler_params=pltpu.CompilerParams(
            dimension_semantics=("parallel",),
            vmem_limit_bytes=_vmem_limit(step_bytes)),
    )(*inputs)


# ----------------------------------------------------------------------------
# Kernel B: un-group layer (FullAttnCatBlock, value_is_key=True) fused with the
# depthwise 3x3 conv + eval-mode BatchNorm + ReLU epilogue.
#   q = q_proj(LN_q(x)), k = k_proj(LN_k(gt)), v = v_proj(LN_k(gt))
#   O   = concat_h(softmax(q_h k_h^T / sqrt(Dh)) v_h)
#   x2  = x @ Wpx + O @ (Wattn_proj @ Wcat_att) + b_fold      (folded cat-proj)
#   x3  = x2 + FFN(LN2(x2))
#   out = ReLU(BN(dwconv3x3(x3 as [H, W, C])))                (BN folded, eval)
# ----------------------------------------------------------------------------
def _make_ungroup_dwconv_kernel(num_heads, scale, eps, H, W):
    def kernel(x_ref, gt_ref, qg, qb, kg, kb, wq, bq, wk, bk, wv, bv,
               wpx, wfold, bfold, n2g, n2b, wf1, bf1, wf2, bf2,
               wdw, bdw, o_ref):
        C = x_ref.shape[2]
        Dh = C // num_heads
        x = x_ref[0].astype(jnp.float32)                   # [L, C]
        gt = gt_ref[0].astype(jnp.float32)                 # [G, C]

        # ---- FullAttnCatBlock (value_is_key) ----
        qn = _ln_rows(x, qg[...], qb[...], eps)
        kn_bf = _ln_rows(gt, kg[...], kb[...], eps).astype(jnp.bfloat16)
        qp_bf = (_mm(qn, wq[...]) + bq[...]).astype(jnp.bfloat16)    # [L, C]
        kp_bf = (_mm(kn_bf, wk[...]) + bk[...]).astype(jnp.bfloat16)  # [G, C]
        vp_bf = (_mm(kn_bf, wv[...]) + bv[...]).astype(jnp.bfloat16)  # [G, C]
        heads = []
        for h in range(num_heads):
            sl = slice(h * Dh, (h + 1) * Dh)
            heads.append(_attn_head(qp_bf[:, sl], kp_bf[:, sl], vp_bf[:, sl], scale))
        att = jnp.concatenate(heads, axis=-1)              # [L, C] f32 (pre out-proj)

        # concat-free cat-projection, attention out-proj folded in host-side:
        #   proj(cat(x, O @ Wap + bap)) == x @ Wpx + O @ (Wap @ Wpatt) + b_fold
        x2 = _mm(x, wpx[...]) + _mm(att, wfold[...]) + bfold[...]     # [L, C]

        # FFN with fused residual
        x2n = _ln_rows(x2, n2g[...], n2b[...], eps)
        hft = _gelu(_mm(x2n, wf1[...]) + bf1[...])         # [L, F]
        out = x2 + _mm(hft, wf2[...]) + bf2[...]           # [L, C]

        # ---- depthwise 3x3 conv + BatchNorm(eval, folded) + ReLU epilogue ----
        img = out.reshape(H, W, C)
        zr = jnp.zeros((1, W, C), jnp.float32)
        zc = jnp.zeros((H + 2, 1, C), jnp.float32)
        xp = jnp.concatenate([zc, jnp.concatenate([zr, img, zr], axis=0), zc],
                             axis=1)                       # [H+2, W+2, C]
        w = wdw[...].astype(jnp.float32)                   # [3, 3, C], BN-scaled
        acc = None
        for di in range(3):
            for dj in range(3):
                term = xp[di:di + H, dj:dj + W, :] * w[di, dj, :]
                acc = term if acc is None else acc + term
        o_ref[0] = jnp.maximum(acc + bdw[...], 0.0).astype(o_ref.dtype)
    return kernel


def ungroup_and_dwconv(x, gt, params, num_heads, hw_shape, eps=1e-5, bn_eps=1e-5):
    """Fused FullAttnCatBlock + dwconv/BN/ReLU.  Returns [B, H, W, C]."""
    B, L, C = x.shape
    H, W = hw_shape
    G = gt.shape[1]
    F = params["ug_ffn_w1"].shape[1]
    scale = float((C // num_heads) ** -0.5)
    bf = lambda t: t.astype(jnp.bfloat16)
    vec = lambda t: t.reshape(1, -1)
    cc = lambda b: (0, 0)
    ccc = lambda b: (0, 0, 0)

    # fold the attention out-projection into the [x, att]-cat projection
    w_fold = params["ug_attnproj_w"] @ params["ug_proj_w_att"]
    b_fold = params["ug_attnproj_b"] @ params["ug_proj_w_att"] + params["ug_proj_b"]
    # fold eval-mode BatchNorm into the depthwise conv
    # TODO(synk): BatchNorm2d is eval-mode only (running statistics).
    bn_s = params["bn_gamma"] * jax.lax.rsqrt(params["bn_var"] + bn_eps)
    w_dw = params["dw_w"] * bn_s[None, None, :]
    b_dw = (params["bn_beta"] - params["bn_mean"] * bn_s).reshape(1, 1, C)

    inputs = [x, gt,
              vec(params["ug_norm_query"][0]), vec(params["ug_norm_query"][1]),
              vec(params["ug_norm_key"][0]), vec(params["ug_norm_key"][1]),
              bf(params["ug_q_w"]), vec(params["ug_q_b"]),
              bf(params["ug_k_w"]), vec(params["ug_k_b"]),
              bf(params["ug_v_w"]), vec(params["ug_v_b"]),
              bf(params["ug_proj_w_x"]), bf(w_fold), vec(b_fold),
              vec(params["ug_norm2"][0]), vec(params["ug_norm2"][1]),
              bf(params["ug_ffn_w1"]), vec(params["ug_ffn_b1"]),
              bf(params["ug_ffn_w2"]), vec(params["ug_ffn_b2"]),
              w_dw, b_dw]
    in_specs = [
        pl.BlockSpec((1, L, C), lambda b: (b, 0, 0)),        # x
        pl.BlockSpec((1, G, C), lambda b: (b, 0, 0)),        # gt
        pl.BlockSpec((1, C), cc), pl.BlockSpec((1, C), cc),  # LN query
        pl.BlockSpec((1, C), cc), pl.BlockSpec((1, C), cc),  # LN key
        pl.BlockSpec((C, C), cc), pl.BlockSpec((1, C), cc),  # q proj
        pl.BlockSpec((C, C), cc), pl.BlockSpec((1, C), cc),  # k proj
        pl.BlockSpec((C, C), cc), pl.BlockSpec((1, C), cc),  # v proj
        pl.BlockSpec((C, C), cc),                            # cat-proj (x rows)
        pl.BlockSpec((C, C), cc), pl.BlockSpec((1, C), cc),  # folded out+cat proj
        pl.BlockSpec((1, C), cc), pl.BlockSpec((1, C), cc),  # LN2
        pl.BlockSpec((C, F), cc), pl.BlockSpec((1, F), cc),  # FFN fc1
        pl.BlockSpec((F, C), cc), pl.BlockSpec((1, C), cc),  # FFN fc2
        pl.BlockSpec((3, 3, C), ccc),                        # dwconv weight (BN folded)
        pl.BlockSpec((1, 1, C), ccc),                        # dwconv bias (BN folded)
    ]

    step_bytes = (sum(_nbytes(a) for a in inputs) - _nbytes(x) - _nbytes(gt)
                  + (L * C + G * C + H * W * C + L * F) * 4)
    # TODO(synk): at production GPViT shapes (L ~ 3136) tile L into image row
    # bands (grid=(B, n_bands)) with a 1-row halo recompute for the conv so the
    # resident working set fits v7x's 64 MiB VMEM; at this L the per-batch
    # plane is tiny and the per-batch grid already feeds both v7x TensorCores.
    return pl.pallas_call(
        _make_ungroup_dwconv_kernel(num_heads, scale, eps, H, W),
        out_shape=jax.ShapeDtypeStruct((B, H, W, C), x.dtype),
        grid=(B,),
        in_specs=in_specs,
        out_specs=pl.BlockSpec((1, H, W, C), lambda b: (b, 0, 0, 0)),
        compiler_params=pltpu.CompilerParams(
            dimension_semantics=("parallel",),
            vmem_limit_bytes=_vmem_limit(step_bytes)),
    )(*inputs)


# ----------------------------------------------------------------------------
# GPBlock forward
# ----------------------------------------------------------------------------
def gpblock_forward(params, x, hw_shape, num_group_heads, num_ungroup_heads):
    B, L, C = x.shape
    H, W = hw_shape
    assert L == H * W
    gt = group_and_mix(x, params, num_group_heads)                    # [B, G, C]
    y = ungroup_and_dwconv(x, gt, params, num_ungroup_heads, (H, W))  # [B, H, W, C]
    return y.reshape(B, L, C)


# ----------------------------------------------------------------------------
# Deterministic synthetic parameter initialization
# ----------------------------------------------------------------------------
def init_params(key, C, G, depth, ffn_ratio=4.0, patch_expansion=0.5,
                channel_expansion=4.0):
    keys = iter(jax.random.split(key, 256))

    def nrm(shape, std=0.02):
        return (std * jax.random.normal(next(keys), shape)).astype(jnp.float32)

    def ln_p():
        return (1.0 + nrm((C,)), nrm((C,)))

    def lin(k_in, k_out):
        return nrm((k_in, k_out)), nrm((k_out,))

    ffn_dim = int(C * ffn_ratio)
    pm_dim = int(patch_expansion * C)
    cm_dim = int(channel_expansion * C)

    p = {}
    p["group_token"] = nrm((1, G, C))
    # group layer
    p["gl_norm_query"] = ln_p()
    p["gl_norm_key"] = ln_p()
    p["gl_k_w"], p["gl_k_b"] = lin(C, C)
    # mixer
    mixer = []
    for _ in range(depth):
        lyr = {}
        lyr["norm1"] = ln_p()
        lyr["pm_w1t"], lyr["pm_b1"] = nrm((pm_dim, G)), nrm((pm_dim,))   # torch [pm, G]
        lyr["pm_w2t"], lyr["pm_b2"] = nrm((G, pm_dim)), nrm((G,))        # torch [G, pm]
        lyr["norm2"] = ln_p()
        lyr["cm_w1"], lyr["cm_b1"] = lin(C, cm_dim)
        lyr["cm_w2"], lyr["cm_b2"] = lin(cm_dim, C)
        mixer.append(lyr)
    p["mixer"] = mixer
    # un-group layer
    p["ug_norm_query"] = ln_p()
    p["ug_norm_key"] = ln_p()
    p["ug_q_w"], p["ug_q_b"] = lin(C, C)
    p["ug_k_w"], p["ug_k_b"] = lin(C, C)
    p["ug_v_w"], p["ug_v_b"] = lin(C, C)
    p["ug_attnproj_w"], p["ug_attnproj_b"] = lin(C, C)
    p["ug_proj_w_x"] = nrm((C, C))      # rows 0:C   of the [2C, C] cat-proj
    p["ug_proj_w_att"] = nrm((C, C))    # rows C:2C  of the [2C, C] cat-proj
    p["ug_proj_b"] = nrm((C,))
    p["ug_norm2"] = ln_p()
    p["ug_ffn_w1"], p["ug_ffn_b1"] = lin(C, ffn_dim)
    p["ug_ffn_w2"], p["ug_ffn_b2"] = lin(ffn_dim, C)
    # depthwise conv + BN (eval mode stats); dw_w[kh,kw,c] == torch weight[c,0,kh,kw]
    p["dw_w"] = nrm((3, 3, C), std=0.1)
    p["bn_gamma"] = 1.0 + nrm((C,))
    p["bn_beta"] = nrm((C,))
    p["bn_mean"] = jnp.zeros((C,), jnp.float32)
    p["bn_var"] = jnp.ones((C,), jnp.float32)
    return p


# ----------------------------------------------------------------------------
if __name__ == "__main__":
    # Small but representative shapes:
    #   embed_dims=32, H=W=8 (L=64), 16 group tokens, 2 group / 2 ungroup heads,
    #   mixer depth=2, ffn_ratio=4.  All dropout / drop-path probabilities are 0.
    B, C, H, W = 2, 32, 8, 8
    G, DEPTH = 16, 2
    NUM_GROUP_HEADS, NUM_UNGROUP_HEADS = 2, 2
    L = H * W

    key = jax.random.PRNGKey(0)
    kx, kp = jax.random.split(key)
    x = jax.random.normal(kx, (B, L, C), dtype=jnp.float32)
    params = init_params(kp, C, G, DEPTH)

    fwd = jax.jit(functools.partial(
        gpblock_forward, hw_shape=(H, W),
        num_group_heads=NUM_GROUP_HEADS, num_ungroup_heads=NUM_UNGROUP_HEADS))
    out = fwd(params, x)
    out = jax.block_until_ready(out)

    assert out.shape == (B, L, C), out.shape
    assert bool(jnp.all(jnp.isfinite(out)))
    print("KERNEL_OK")
</pallas_src>

<mosaic_0001>
module attributes {stable_mosaic.version = 11 : i64} {
  func.func @kernel(%arg0: i32, %arg1: memref<1x16x32xf32, #tpu.memory_space<vmem>>, %arg2: memref<1x64x32xf32, #tpu.memory_space<vmem>>, %arg3: memref<1x32xf32, #tpu.memory_space<vmem>>, %arg4: memref<1x32xf32, #tpu.memory_space<vmem>>, %arg5: memref<1x32xf32, #tpu.memory_space<vmem>>, %arg6: memref<1x32xf32, #tpu.memory_space<vmem>>, %arg7: memref<32x32xbf16, #tpu.memory_space<vmem>>, %arg8: memref<1x32xf32, #tpu.memory_space<vmem>>, %arg9: memref<1x32xf32, #tpu.memory_space<vmem>>, %arg10: memref<1x32xf32, #tpu.memory_space<vmem>>, %arg11: memref<16x16xbf16, #tpu.memory_space<vmem>>, %arg12: memref<16x1xf32, #tpu.memory_space<vmem>>, %arg13: memref<16x16xbf16, #tpu.memory_space<vmem>>, %arg14: memref<16x1xf32, #tpu.memory_space<vmem>>, %arg15: memref<1x32xf32, #tpu.memory_space<vmem>>, %arg16: memref<1x32xf32, #tpu.memory_space<vmem>>, %arg17: memref<32x128xbf16, #tpu.memory_space<vmem>>, %arg18: memref<1x128xf32, #tpu.memory_space<vmem>>, %arg19: memref<128x32xbf16, #tpu.memory_space<vmem>>, %arg20: memref<1x32xf32, #tpu.memory_space<vmem>>, %arg21: memref<1x32xf32, #tpu.memory_space<vmem>>, %arg22: memref<1x32xf32, #tpu.memory_space<vmem>>, %arg23: memref<16x16xbf16, #tpu.memory_space<vmem>>, %arg24: memref<16x1xf32, #tpu.memory_space<vmem>>, %arg25: memref<16x16xbf16, #tpu.memory_space<vmem>>, %arg26: memref<16x1xf32, #tpu.memory_space<vmem>>, %arg27: memref<1x32xf32, #tpu.memory_space<vmem>>, %arg28: memref<1x32xf32, #tpu.memory_space<vmem>>, %arg29: memref<32x128xbf16, #tpu.memory_space<vmem>>, %arg30: memref<1x128xf32, #tpu.memory_space<vmem>>, %arg31: memref<128x32xbf16, #tpu.memory_space<vmem>>, %arg32: memref<1x32xf32, #tpu.memory_space<vmem>>, %arg33: memref<1x16x32xf32, #tpu.memory_space<vmem>>) attributes {dimension_semantics = [#tpu.dimension_semantics<parallel>], iteration_bounds = array<i64: 2>, scalar_prefetch = 0 : i64, scratch_operands = 0 : i64, tpu.core_type = #tpu.core_type<tc>, window_params = [{pipeline_mode = #tpu.pipeline_mode<synchronous>, transform_indices = @transform_0, window_bounds = array<i64: 1, 16, 32>}, {transform_indices = @transform_1, window_bounds = array<i64: 1, 64, 32>}, {pipeline_mode = #tpu.pipeline_mode<synchronous>, transform_indices = @transform_2, window_bounds = array<i64: 1, 32>}, {pipeline_mode = #tpu.pipeline_mode<synchronous>, transform_indices = @transform_3, window_bounds = array<i64: 1, 32>}, {pipeline_mode = #tpu.pipeline_mode<synchronous>, transform_indices = @transform_4, window_bounds = array<i64: 1, 32>}, {pipeline_mode = #tpu.pipeline_mode<synchronous>, transform_indices = @transform_5, window_bounds = array<i64: 1, 32>}, {pipeline_mode = #tpu.pipeline_mode<synchronous>, transform_indices = @transform_6, window_bounds = array<i64: 32, 32>}, {pipeline_mode = #tpu.pipeline_mode<synchronous>, transform_indices = @transform_7, window_bounds = array<i64: 1, 32>}, {pipeline_mode = #tpu.pipeline_mode<synchronous>, transform_indices = @transform_8, window_bounds = array<i64: 1, 32>}, {pipeline_mode = #tpu.pipeline_mode<synchronous>, transform_indices = @transform_9, window_bounds = array<i64: 1, 32>}, {pipeline_mode = #tpu.pipeline_mode<synchronous>, transform_indices = @transform_10, window_bounds = array<i64: 16, 16>}, {pipeline_mode = #tpu.pipeline_mode<synchronous>, transform_indices = @transform_11, window_bounds = array<i64: 16, 1>}, {pipeline_mode = #tpu.pipeline_mode<synchronous>, transform_indices = @transform_12, window_bounds = array<i64: 16, 16>}, {pipeline_mode = #tpu.pipeline_mode<synchronous>, transform_indices = @transform_13, window_bounds = array<i64: 16, 1>}, {pipeline_mode = #tpu.pipeline_mode<synchronous>, transform_indices = @transform_14, window_bounds = array<i64: 1, 32>}, {pipeline_mode = #tpu.pipeline_mode<synchronous>, transform_indices = @transform_15, window_bounds = array<i64: 1, 32>}, {pipeline_mode = #tpu.pipeline_mode<synchronous>, transform_indices = @transform_16, window_bounds = array<i64: 32, 128>}, {pipeline_mode = #tpu.pipeline_mode<synchronous>, transform_indices = @transform_17, window_bounds = array<i64: 1, 128>}, {pipeline_mode = #tpu.pipeline_mode<synchronous>, transform_indices = @transform_18, window_bounds = array<i64: 128, 32>}, {pipeline_mode = #tpu.pipeline_mode<synchronous>, transform_indices = @transform_19, window_bounds = array<i64: 1, 32>}, {pipeline_mode = #tpu.pipeline_mode<synchronous>, transform_indices = @transform_20, window_bounds = array<i64: 1, 32>}, {pipeline_mode = #tpu.pipeline_mode<synchronous>, transform_indices = @transform_21, window_bounds = array<i64: 1, 32>}, {pipeline_mode = #tpu.pipeline_mode<synchronous>, transform_indices = @transform_22, window_bounds = array<i64: 16, 16>}, {pipeline_mode = #tpu.pipeline_mode<synchronous>, transform_indices = @transform_23, window_bounds = array<i64: 16, 1>}, {pipeline_mode = #tpu.pipeline_mode<synchronous>, transform_indices = @transform_24, window_bounds = array<i64: 16, 16>}, {pipeline_mode = #tpu.pipeline_mode<synchronous>, transform_indices = @transform_25, window_bounds = array<i64: 16, 1>}, {pipeline_mode = #tpu.pipeline_mode<synchronous>, transform_indices = @transform_26, window_bounds = array<i64: 1, 32>}, {pipeline_mode = #tpu.pipeline_mode<synchronous>, transform_indices = @transform_27, window_bounds = array<i64: 1, 32>}, {pipeline_mode = #tpu.pipeline_mode<synchronous>, transform_indices = @transform_28, window_bounds = array<i64: 32, 128>}, {pipeline_mode = #tpu.pipeline_mode<synchronous>, transform_indices = @transform_29, window_bounds = array<i64: 1, 128>}, {pipeline_mode = #tpu.pipeline_mode<synchronous>, transform_indices = @transform_30, window_bounds = array<i64: 128, 32>}, {pipeline_mode = #tpu.pipeline_mode<synchronous>, transform_indices = @transform_31, window_bounds = array<i64: 1, 32>}, {transform_indices = @transform_32, window_bounds = array<i64: 1, 16, 32>}]} {
    %c0 = arith.constant 0 : index
    %c0_0 = arith.constant 0 : index
    %c0_1 = arith.constant 0 : index
    %0 = vector.load %arg1[%c0, %c0_0, %c0_1] : memref<1x16x32xf32, #tpu.memory_space<vmem>>, vector<1x16x32xf32>
    %1 = vector.shape_cast %0 : vector<1x16x32xf32> to vector<16x32xf32>
    %c0_2 = arith.constant 0 : index
    %c0_3 = arith.constant 0 : index
    %c0_4 = arith.constant 0 : index
    %2 = vector.load %arg2[%c0_2, %c0_3, %c0_4] : memref<1x64x32xf32, #tpu.memory_space<vmem>>, vector<1x64x32xf32>
    %3 = vector.shape_cast %2 : vector<1x64x32xf32> to vector<64x32xf32>
    %c0_5 = arith.constant 0 : index
    %c0_6 = arith.constant 0 : index
    %4 = vector.load %arg3[%c0_5, %c0_6] : memref<1x32xf32, #tpu.memory_space<vmem>>, vector<1x32xf32>
    %c0_7 = arith.constant 0 : index
    %c0_8 = arith.constant 0 : index
    %5 = vector.load %arg4[%c0_7, %c0_8] : memref<1x32xf32, #tpu.memory_space<vmem>>, vector<1x32xf32>
    %cst = arith.constant dense<0.000000e+00> : vector<16xf32>
    %6 = vector.multi_reduction <add>, %1, %cst [1] : vector<16x32xf32> to vector<16xf32>
    %7 = vector.shape_cast %6 : vector<16xf32> to vector<16x1xf32>
    %cst_9 = arith.constant 3.200000e+01 : f32
    %8 = vector.broadcast %cst_9 : f32 to vector<16x1xf32>
    %9 = arith.divf %7, %8 : vector<16x1xf32>
    %10 = vector.broadcast %9 : vector<16x1xf32> to vector<16x32xf32>
    %11 = arith.subf %1, %10 : vector<16x32xf32>
    %12 = arith.mulf %11, %11 : vector<16x32xf32>
    %cst_10 = arith.constant dense<0.000000e+00> : vector<16xf32>
    %13 = vector.multi_reduction <add>, %12, %cst_10 [1] : vector<16x32xf32> to vector<16xf32>
    %14 = vector.shape_cast %13 : vector<16xf32> to vector<16x1xf32>
    %cst_11 = arith.constant 3.200000e+01 : f32
    %15 = vector.broadcast %cst_11 : f32 to vector<16x1xf32>
    %16 = arith.divf %14, %15 : vector<16x1xf32>
    %cst_12 = arith.constant 9.99999974E-6 : f32
    %17 = vector.broadcast %cst_12 : f32 to vector<16x1xf32>
    %18 = arith.addf %16, %17 : vector<16x1xf32>
    %19 = math.rsqrt %18 : vector<16x1xf32>
    %20 = vector.broadcast %19 : vector<16x1xf32> to vector<16x32xf32>
    %21 = arith.mulf %11, %20 : vector<16x32xf32>
    %22 = vector.broadcast %4 : vector<1x32xf32> to vector<16x32xf32>
    %23 = arith.mulf %21, %22 : vector<16x32xf32>
    %24 = vector.broadcast %5 : vector<1x32xf32> to vector<16x32xf32>
    %25 = arith.addf %23, %24 : vector<16x32xf32>
    %26 = arith.truncf %25 : vector<16x32xf32> to vector<16x32xbf16>
    %c0_13 = arith.constant 0 : index
    %c0_14 = arith.constant 0 : index
    %27 = vector.load %arg5[%c0_13, %c0_14] : memref<1x32xf32, #tpu.memory_space<vmem>>, vector<1x32xf32>
    %c0_15 = arith.constant 0 : index
    %c0_16 = arith.constant 0 : index
    %28 = vector.load %arg6[%c0_15, %c0_16] : memref<1x32xf32, #tpu.memory_space<vmem>>, vector<1x32xf32>
    %cst_17 = arith.constant dense<0.000000e+00> : vector<64xf32>
    %29 = vector.multi_reduction <add>, %3, %cst_17 [1] : vector<64x32xf32> to vector<64xf32>
    %30 = vector.shape_cast %29 : vector<64xf32> to vector<64x1xf32>
    %cst_18 = arith.constant 3.200000e+01 : f32
    %31 = vector.broadcast %cst_18 : f32 to vector<64x1xf32>
    %32 = arith.divf %30, %31 : vector<64x1xf32>
    %33 = vector.broadcast %32 : vector<64x1xf32> to vector<64x32xf32>
    %34 = arith.subf %3, %33 : vector<64x32xf32>
    %35 = arith.mulf %34, %34 : vector<64x32xf32>
    %cst_19 = arith.constant dense<0.000000e+00> : vector<64xf32>
    %36 = vector.multi_reduction <add>, %35, %cst_19 [1] : vector<64x32xf32> to vector<64xf32>
    %37 = vector.shape_cast %36 : vector<64xf32> to vector<64x1xf32>
    %cst_20 = arith.constant 3.200000e+01 : f32
    %38 = vector.broadcast %cst_20 : f32 to vector<64x1xf32>
    %39 = arith.divf %37, %38 : vector<64x1xf32>
    %cst_21 = arith.constant 9.99999974E-6 : f32
    %40 = vector.broadcast %cst_21 : f32 to vector<64x1xf32>
    %41 = arith.addf %39, %40 : vector<64x1xf32>
    %42 = math.rsqrt %41 : vector<64x1xf32>
    %43 = vector.broadcast %42 : vector<64x1xf32> to vector<64x32xf32>
    %44 = arith.mulf %34, %43 : vector<64x32xf32>
    %45 = vector.broadcast %27 : vector<1x32xf32> to vector<64x32xf32>
    %46 = arith.mulf %44, %45 : vector<64x32xf32>
    %47 = vector.broadcast %28 : vector<1x32xf32> to vector<64x32xf32>
    %48 = arith.addf %46, %47 : vector<64x32xf32>
    %49 = arith.truncf %48 : vector<64x32xf32> to vector<64x32xbf16>
    %c0_22 = arith.constant 0 : index
    %c0_23 = arith.constant 0 : index
    %50 = vector.load %arg7[%c0_22, %c0_23] : memref<32x32xbf16, #tpu.memory_space<vmem>>, vector<32x32xbf16>
    %cst_24 = arith.constant dense<0.000000e+00> : vector<64x32xf32>
    %51 = tpu.matmul %49, %50, %cst_24 {dimension_numbers = #tpu.dot_dimension_numbers<[1], [0], [0], [1], [0, 0, 1, 1], [], []>} : vector<64x32xbf16>, vector<32x32xbf16>, vector<64x32xf32> -> vector<64x32xf32>
    %c0_25 = arith.constant 0 : index
    %c0_26 = arith.constant 0 : index
    %52 = vector.load %arg8[%c0_25, %c0_26] : memref<1x32xf32, #tpu.memory_space<vmem>>, vector<1x32xf32>
    %53 = vector.broadcast %52 : vector<1x32xf32> to vector<64x32xf32>
    %54 = arith.addf %51, %53 : vector<64x32xf32>
    %55 = arith.truncf %54 : vector<64x32xf32> to vector<64x32xbf16>
    %56 = vector.extract_strided_slice %26 {offsets = [0, 0], sizes = [16, 16], strides = [1, 1]} : vector<16x32xbf16> to vector<16x16xbf16>
    %57 = vector.extract_strided_slice %55 {offsets = [0, 0], sizes = [64, 16], strides = [1, 1]} : vector<64x32xbf16> to vector<64x16xbf16>
    %58 = vector.extract_strided_slice %49 {offsets = [0, 0], sizes = [64, 16], strides = [1, 1]} : vector<64x32xbf16> to vector<64x16xbf16>
    %cst_27 = arith.constant dense<0.000000e+00> : vector<16x64xf32>
    %59 = tpu.matmul %56, %57, %cst_27 {dimension_numbers = #tpu.dot_dimension_numbers<[1], [1], [0], [0], [0, 0, 1, 0], [], []>} : vector<16x16xbf16>, vector<64x16xbf16>, vector<16x64xf32> -> vector<16x64xf32>
    %cst_28 = arith.constant 2.500000e-01 : f32
    %60 = vector.broadcast %cst_28 : f32 to vector<16x64xf32>
    %61 = arith.mulf %59, %60 : vector<16x64xf32>
    %cst_29 = arith.constant dense<0xFF800000> : vector<16xf32>
    %62 = vector.multi_reduction <maximumf>, %61, %cst_29 [1] : vector<16x64xf32> to vector<16xf32>
    %63 = vector.shape_cast %62 : vector<16xf32> to vector<16x1xf32>
    %64 = vector.broadcast %63 : vector<16x1xf32> to vector<16x64xf32>
    %65 = arith.subf %61, %64 : vector<16x64xf32>
    %66 = math.exp %65 : vector<16x64xf32>
    %cst_30 = arith.constant dense<0.000000e+00> : vector<16xf32>
    %67 = vector.multi_reduction <add>, %66, %cst_30 [1] : vector<16x64xf32> to vector<16xf32>
    %68 = vector.shape_cast %67 : vector<16xf32> to vector<16x1xf32>
    %69 = tpu.reciprocal %68 {approx = true} : vector<16x1xf32> -> vector<16x1xf32>
    %70 = vector.broadcast %69 : vector<16x1xf32> to vector<16x64xf32>
    %71 = arith.mulf %66, %70 : vector<16x64xf32>
    %72 = arith.truncf %71 : vector<16x64xf32> to vector<16x64xbf16>
    %cst_31 = arith.constant dense<0.000000e+00> : vector<16x16xf32>
    %73 = tpu.matmul %72, %58, %cst_31 {dimension_numbers = #tpu.dot_dimension_numbers<[1], [0], [0], [1], [0, 0, 1, 1], [], []>} : vector<16x64xbf16>, vector<64x16xbf16>, vector<16x16xf32> -> vector<16x16xf32>
    %74 = vector.extract_strided_slice %26 {offsets = [0, 16], sizes = [16, 16], strides = [1, 1]} : vector<16x32xbf16> to vector<16x16xbf16>
    %75 = vector.extract_strided_slice %55 {offsets = [0, 16], sizes = [64, 16], strides = [1, 1]} : vector<64x32xbf16> to vector<64x16xbf16>
    %76 = vector.extract_strided_slice %49 {offsets = [0, 16], sizes = [64, 16], strides = [1, 1]} : vector<64x32xbf16> to vector<64x16xbf16>
    %cst_32 = arith.constant dense<0.000000e+00> : vector<16x64xf32>
    %77 = tpu.matmul %74, %75, %cst_32 {dimension_numbers = #tpu.dot_dimension_numbers<[1], [1], [0], [0], [0, 0, 1, 0], [], []>} : vector<16x16xbf16>, vector<64x16xbf16>, vector<16x64xf32> -> vector<16x64xf32>
    %cst_33 = arith.constant 2.500000e-01 : f32
    %78 = vector.broadcast %cst_33 : f32 to vector<16x64xf32>
    %79 = arith.mulf %77, %78 : vector<16x64xf32>
    %cst_34 = arith.constant dense<0xFF800000> : vector<16xf32>
    %80 = vector.multi_reduction <maximumf>, %79, %cst_34 [1] : vector<16x64xf32> to vector<16xf32>
    %81 = vector.shape_cast %80 : vector<16xf32> to vector<16x1xf32>
    %82 = vector.broadcast %81 : vector<16x1xf32> to vector<16x64xf32>
    %83 = arith.subf %79, %82 : vector<16x64xf32>
    %84 = math.exp %83 : vector<16x64xf32>
    %cst_35 = arith.constant dense<0.000000e+00> : vector<16xf32>
    %85 = vector.multi_reduction <add>, %84, %cst_35 [1] : vector<16x64xf32> to vector<16xf32>
    %86 = vector.shape_cast %85 : vector<16xf32> to vector<16x1xf32>
    %87 = tpu.reciprocal %86 {approx = true} : vector<16x1xf32> -> vector<16x1xf32>
    %88 = vector.broadcast %87 : vector<16x1xf32> to vector<16x64xf32>
    %89 = arith.mulf %84, %88 : vector<16x64xf32>
    %90 = arith.truncf %89 : vector<16x64xf32> to vector<16x64xbf16>
    %cst_36 = arith.constant dense<0.000000e+00> : vector<16x16xf32>
    %91 = tpu.matmul %90, %76, %cst_36 {dimension_numbers = #tpu.dot_dimension_numbers<[1], [0], [0], [1], [0, 0, 1, 1], [], []>} : vector<16x64xbf16>, vector<64x16xbf16>, vector<16x16xf32> -> vector<16x16xf32>
    %92 = tpu.concatenate %73, %91 in 1 : vector<16x16xf32>, vector<16x16xf32> -> vector<16x32xf32>
    %c0_37 = arith.constant 0 : index
    %c0_38 = arith.constant 0 : index
    %93 = vector.load %arg9[%c0_37, %c0_38] : memref<1x32xf32, #tpu.memory_space<vmem>>, vector<1x32xf32>
    %c0_39 = arith.constant 0 : index
    %c0_40 = arith.constant 0 : index
    %94 = vector.load %arg10[%c0_39, %c0_40] : memref<1x32xf32, #tpu.memory_space<vmem>>, vector<1x32xf32>
    %cst_41 = arith.constant dense<0.000000e+00> : vector<16xf32>
    %95 = vector.multi_reduction <add>, %92, %cst_41 [1] : vector<16x32xf32> to vector<16xf32>
    %96 = vector.shape_cast %95 : vector<16xf32> to vector<16x1xf32>
    %cst_42 = arith.constant 3.200000e+01 : f32
    %97 = vector.broadcast %cst_42 : f32 to vector<16x1xf32>
    %98 = arith.divf %96, %97 : vector<16x1xf32>
    %99 = vector.broadcast %98 : vector<16x1xf32> to vector<16x32xf32>
    %100 = arith.subf %92, %99 : vector<16x32xf32>
    %101 = arith.mulf %100, %100 : vector<16x32xf32>
    %cst_43 = arith.constant dense<0.000000e+00> : vector<16xf32>
    %102 = vector.multi_reduction <add>, %101, %cst_43 [1] : vector<16x32xf32> to vector<16xf32>
    %103 = vector.shape_cast %102 : vector<16xf32> to vector<16x1xf32>
    %cst_44 = arith.constant 3.200000e+01 : f32
    %104 = vector.broadcast %cst_44 : f32 to vector<16x1xf32>
    %105 = arith.divf %103, %104 : vector<16x1xf32>
    %cst_45 = arith.constant 9.99999974E-6 : f32
    %106 = vector.broadcast %cst_45 : f32 to vector<16x1xf32>
    %107 = arith.addf %105, %106 : vector<16x1xf32>
    %108 = math.rsqrt %107 : vector<16x1xf32>
    %109 = vector.broadcast %108 : vector<16x1xf32> to vector<16x32xf32>
    %110 = arith.mulf %100, %109 : vector<16x32xf32>
    %111 = vector.broadcast %93 : vector<1x32xf32> to vector<16x32xf32>
    %112 = arith.mulf %110, %111 : vector<16x32xf32>
    %113 = vector.broadcast %94 : vector<1x32xf32> to vector<16x32xf32>
    %114 = arith.addf %112, %113 : vector<16x32xf32>
    %c0_46 = arith.constant 0 : index
    %c0_47 = arith.constant 0 : index
    %115 = vector.load %arg11[%c0_46, %c0_47] : memref<16x16xbf16, #tpu.memory_space<vmem>>, vector<16x16xbf16>
    %116 = arith.truncf %114 : vector<16x32xf32> to vector<16x32xbf16>
    %cst_48 = arith.constant dense<0.000000e+00> : vector<16x32xf32>
    %117 = tpu.matmul %115, %116, %cst_48 {dimension_numbers = #tpu.dot_dimension_numbers<[1], [0], [0], [1], [0, 0, 1, 1], [], []>} : vector<16x16xbf16>, vector<16x32xbf16>, vector<16x32xf32> -> vector<16x32xf32>
    %c0_49 = arith.constant 0 : index
    %c0_50 = arith.constant 0 : index
    %118 = vector.load %arg12[%c0_49, %c0_50] : memref<16x1xf32, #tpu.memory_space<vmem>>, vector<16x1xf32>
    %119 = vector.broadcast %118 : vector<16x1xf32> to vector<16x32xf32>
    %120 = arith.addf %117, %119 : vector<16x32xf32>
    %cst_51 = arith.constant 5.000000e-01 : f32
    %121 = vector.broadcast %cst_51 : f32 to vector<16x32xf32>
    %122 = arith.mulf %121, %120 : vector<16x32xf32>
    %cst_52 = arith.constant 4.471500e-02 : f32
    %123 = vector.broadcast %cst_52 : f32 to vector<16x32xf32>
    %124 = arith.mulf %123, %120 : vector<16x32xf32>
    %125 = arith.mulf %124, %120 : vector<16x32xf32>
    %126 = arith.mulf %125, %120 : vector<16x32xf32>
    %127 = arith.addf %120, %126 : vector<16x32xf32>
    %cst_53 = arith.constant 0.797884583 : f32
    %128 = vector.broadcast %cst_53 : f32 to vector<16x32xf32>
    %129 = arith.mulf %128, %127 : vector<16x32xf32>
    %130 = math.tanh %129 : vector<16x32xf32>
    %cst_54 = arith.constant 1.000000e+00 : f32
    %131 = vector.broadcast %cst_54 : f32 to vector<16x32xf32>
    %132 = arith.addf %131, %130 : vector<16x32xf32>
    %133 = arith.mulf %122, %132 : vector<16x32xf32>
    %c0_55 = arith.constant 0 : index
    %c0_56 = arith.constant 0 : index
    %134 = vector.load %arg13[%c0_55, %c0_56] : memref<16x16xbf16, #tpu.memory_space<vmem>>, vector<16x16xbf16>
    %135 = arith.truncf %133 : vector<16x32xf32> to vector<16x32xbf16>
    %cst_57 = arith.constant dense<0.000000e+00> : vector<16x32xf32>
    %136 = tpu.matmul %134, %135, %cst_57 {dimension_numbers = #tpu.dot_dimension_numbers<[1], [0], [0], [1], [0, 0, 1, 1], [], []>} : vector<16x16xbf16>, vector<16x32xbf16>, vector<16x32xf32> -> vector<16x32xf32>
    %137 = arith.addf %92, %136 : vector<16x32xf32>
    %c0_58 = arith.constant 0 : index
    %c0_59 = arith.constant 0 : index
    %138 = vector.load %arg14[%c0_58, %c0_59] : memref<16x1xf32, #tpu.memory_space<vmem>>, vector<16x1xf32>
    %139 = vector.broadcast %138 : vector<16x1xf32> to vector<16x32xf32>
    %140 = arith.addf %137, %139 : vector<16x32xf32>
    %c0_60 = arith.constant 0 : index
    %c0_61 = arith.constant 0 : index
    %141 = vector.load %arg15[%c0_60, %c0_61] : memref<1x32xf32, #tpu.memory_space<vmem>>, vector<1x32xf32>
    %c0_62 = arith.constant 0 : index
    %c0_63 = arith.constant 0 : index
    %142 = vector.load %arg16[%c0_62, %c0_63] : memref<1x32xf32, #tpu.memory_space<vmem>>, vector<1x32xf32>
    %cst_64 = arith.constant dense<0.000000e+00> : vector<16xf32>
    %143 = vector.multi_reduction <add>, %140, %cst_64 [1] : vector<16x32xf32> to vector<16xf32>
    %144 = vector.shape_cast %143 : vector<16xf32> to vector<16x1xf32>
    %cst_65 = arith.constant 3.200000e+01 : f32
    %145 = vector.broadcast %cst_65 : f32 to vector<16x1xf32>
    %146 = arith.divf %144, %145 : vector<16x1xf32>
    %147 = vector.broadcast %146 : vector<16x1xf32> to vector<16x32xf32>
    %148 = arith.subf %140, %147 : vector<16x32xf32>
    %149 = arith.mulf %148, %148 : vector<16x32xf32>
    %cst_66 = arith.constant dense<0.000000e+00> : vector<16xf32>
    %150 = vector.multi_reduction <add>, %149, %cst_66 [1] : vector<16x32xf32> to vector<16xf32>
    %151 = vector.shape_cast %150 : vector<16xf32> to vector<16x1xf32>
    %cst_67 = arith.constant 3.200000e+01 : f32
    %152 = vector.broadcast %cst_67 : f32 to vector<16x1xf32>
    %153 = arith.divf %151, %152 : vector<16x1xf32>
    %cst_68 = arith.constant 9.99999974E-6 : f32
    %154 = vector.broadcast %cst_68 : f32 to vector<16x1xf32>
    %155 = arith.addf %153, %154 : vector<16x1xf32>
    %156 = math.rsqrt %155 : vector<16x1xf32>
    %157 = vector.broadcast %156 : vector<16x1xf32> to vector<16x32xf32>
    %158 = arith.mulf %148, %157 : vector<16x32xf32>
    %159 = vector.broadcast %141 : vector<1x32xf32> to vector<16x32xf32>
    %160 = arith.mulf %158, %159 : vector<16x32xf32>
    %161 = vector.broadcast %142 : vector<1x32xf32> to vector<16x32xf32>
    %162 = arith.addf %160, %161 : vector<16x32xf32>
    %c0_69 = arith.constant 0 : index
    %c0_70 = arith.constant 0 : index
    %163 = vector.load %arg17[%c0_69, %c0_70] : memref<32x128xbf16, #tpu.memory_space<vmem>>, vector<32x128xbf16>
    %164 = arith.truncf %162 : vector<16x32xf32> to vector<16x32xbf16>
    %cst_71 = arith.constant dense<0.000000e+00> : vector<16x128xf32>
    %165 = tpu.matmul %164, %163, %cst_71 {dimension_numbers = #tpu.dot_dimension_numbers<[1], [0], [0], [1], [0, 0, 1, 1], [], []>} : vector<16x32xbf16>, vector<32x128xbf16>, vector<16x128xf32> -> vector<16x128xf32>
    %c0_72 = arith.constant 0 : index
    %c0_73 = arith.constant 0 : index
    %166 = vector.load %arg18[%c0_72, %c0_73] : memref<1x128xf32, #tpu.memory_space<vmem>>, vector<1x128xf32>
    %167 = vector.broadcast %166 : vector<1x128xf32> to vector<16x128xf32>
    %168 = arith.addf %165, %167 : vector<16x128xf32>
    %cst_74 = arith.constant 5.000000e-01 : f32
    %169 = vector.broadcast %cst_74 : f32 to vector<16x128xf32>
    %170 = arith.mulf %169, %168 : vector<16x128xf32>
    %cst_75 = arith.constant 4.471500e-02 : f32
    %171 = vector.broadcast %cst_75 : f32 to vector<16x128xf32>
    %172 = arith.mulf %171, %168 : vector<16x128xf32>
    %173 = arith.mulf %172, %168 : vector<16x128xf32>
    %174 = arith.mulf %173, %168 : vector<16x128xf32>
    %175 = arith.addf %168, %174 : vector<16x128xf32>
    %cst_76 = arith.constant 0.797884583 : f32
    %176 = vector.broadcast %cst_76 : f32 to vector<16x128xf32>
    %177 = arith.mulf %176, %175 : vector<16x128xf32>
    %178 = math.tanh %177 : vector<16x128xf32>
    %cst_77 = arith.constant 1.000000e+00 : f32
    %179 = vector.broadcast %cst_77 : f32 to vector<16x128xf32>
    %180 = arith.addf %179, %178 : vector<16x128xf32>
    %181 = arith.mulf %170, %180 : vector<16x128xf32>
    %c0_78 = arith.constant 0 : index
    %c0_79 = arith.constant 0 : index
    %182 = vector.load %arg19[%c0_78, %c0_79] : memref<128x32xbf16, #tpu.memory_space<vmem>>, vector<128x32xbf16>
    %183 = arith.truncf %181 : vector<16x128xf32> to vector<16x128xbf16>
    %cst_80 = arith.constant dense<0.000000e+00> : vector<16x32xf32>
    %184 = tpu.matmul %183, %182, %cst_80 {dimension_numbers = #tpu.dot_dimension_numbers<[1], [0], [0], [1], [0, 0, 1, 1], [], []>} : vector<16x128xbf16>, vector<128x32xbf16>, vector<16x32xf32> -> vector<16x32xf32>
    %185 = arith.addf %140, %184 : vector<16x32xf32>
    %c0_81 = arith.constant 0 : index
    %c0_82 = arith.constant 0 : index
    %186 = vector.load %arg20[%c0_81, %c0_82] : memref<1x32xf32, #tpu.memory_space<vmem>>, vector<1x32xf32>
    %187 = vector.broadcast %186 : vector<1x32xf32> to vector<16x32xf32>
    %188 = arith.addf %185, %187 : vector<16x32xf32>
    %c0_83 = arith.constant 0 : index
    %c0_84 = arith.constant 0 : index
    %189 = vector.load %arg21[%c0_83, %c0_84] : memref<1x32xf32, #tpu.memory_space<vmem>>, vector<1x32xf32>
    %c0_85 = arith.constant 0 : index
    %c0_86 = arith.constant 0 : index
    %190 = vector.load %arg22[%c0_85, %c0_86] : memref<1x32xf32, #tpu.memory_space<vmem>>, vector<1x32xf32>
    %cst_87 = arith.constant dense<0.000000e+00> : vector<16xf32>
    %191 = vector.multi_reduction <add>, %188, %cst_87 [1] : vector<16x32xf32> to vector<16xf32>
    %192 = vector.shape_cast %191 : vector<16xf32> to vector<16x1xf32>
    %cst_88 = arith.constant 3.200000e+01 : f32
    %193 = vector.broadcast %cst_88 : f32 to vector<16x1xf32>
    %194 = arith.divf %192, %193 : vector<16x1xf32>
    %195 = vector.broadcast %194 : vector<16x1xf32> to vector<16x32xf32>
    %196 = arith.subf %188, %195 : vector<16x32xf32>
    %197 = arith.mulf %196, %196 : vector<16x32xf32>
    %cst_89 = arith.constant dense<0.000000e+00> : vector<16xf32>
    %198 = vector.multi_reduction <add>, %197, %cst_89 [1] : vector<16x32xf32> to vector<16xf32>
    %199 = vector.shape_cast %198 : vector<16xf32> to vector<16x1xf32>
    %cst_90 = arith.constant 3.200000e+01 : f32
    %200 = vector.broadcast %cst_90 : f32 to vector<16x1xf32>
    %201 = arith.divf %199, %200 : vector<16x1xf32>
    %cst_91 = arith.constant 9.99999974E-6 : f32
    %202 = vector.broadcast %cst_91 : f32 to vector<16x1xf32>
    %203 = arith.addf %201, %202 : vector<16x1xf32>
    %204 = math.rsqrt %203 : vector<16x1xf32>
    %205 = vector.broadcast %204 : vector<16x1xf32> to vector<16x32xf32>
    %206 = arith.mulf %196, %205 : vector<16x32xf32>
    %207 = vector.broadcast %189 : vector<1x32xf32> to vector<16x32xf32>
    %208 = arith.mulf %206, %207 : vector<16x32xf32>
    %209 = vector.broadcast %190 : vector<1x32xf32> to vector<16x32xf32>
    %210 = arith.addf %208, %209 : vector<16x32xf32>
    %c0_92 = arith.constant 0 : index
    %c0_93 = arith.constant 0 : index
    %211 = vector.load %arg23[%c0_92, %c0_93] : memref<16x16xbf16, #tpu.memory_space<vmem>>, vector<16x16xbf16>
    %212 = arith.truncf %210 : vector<16x32xf32> to vector<16x32xbf16>
    %cst_94 = arith.constant dense<0.000000e+00> : vector<16x32xf32>
    %213 = tpu.matmul %211, %212, %cst_94 {dimension_numbers = #tpu.dot_dimension_numbers<[1], [0], [0], [1], [0, 0, 1, 1], [], []>} : vector<16x16xbf16>, vector<16x32xbf16>, vector<16x32xf32> -> vector<16x32xf32>
    %c0_95 = arith.constant 0 : index
    %c0_96 = arith.constant 0 : index
    %214 = vector.load %arg24[%c0_95, %c0_96] : memref<16x1xf32, #tpu.memory_space<vmem>>, vector<16x1xf32>
    %215 = vector.broadcast %214 : vector<16x1xf32> to vector<16x32xf32>
    %216 = arith.addf %213, %215 : vector<16x32xf32>
    %cst_97 = arith.constant 5.000000e-01 : f32
    %217 = vector.broadcast %cst_97 : f32 to vector<16x32xf32>
    %218 = arith.mulf %217, %216 : vector<16x32xf32>
    %cst_98 = arith.constant 4.471500e-02 : f32
    %219 = vector.broadcast %cst_98 : f32 to vector<16x32xf32>
    %220 = arith.mulf %219, %216 : vector<16x32xf32>
    %221 = arith.mulf %220, %216 : vector<16x32xf32>
    %222 = arith.mulf %221, %216 : vector<16x32xf32>
    %223 = arith.addf %216, %222 : vector<16x32xf32>
    %cst_99 = arith.constant 0.797884583 : f32
    %224 = vector.broadcast %cst_99 : f32 to vector<16x32xf32>
    %225 = arith.mulf %224, %223 : vector<16x32xf32>
    %226 = math.tanh %225 : vector<16x32xf32>
    %cst_100 = arith.constant 1.000000e+00 : f32
    %227 = vector.broadcast %cst_100 : f32 to vector<16x32xf32>
    %228 = arith.addf %227, %226 : vector<16x32xf32>
    %229 = arith.mulf %218, %228 : vector<16x32xf32>
    %c0_101 = arith.constant 0 : index
    %c0_102 = arith.constant 0 : index
    %230 = vector.load %arg25[%c0_101, %c0_102] : memref<16x16xbf16, #tpu.memory_space<vmem>>, vector<16x16xbf16>
    %231 = arith.truncf %229 : vector<16x32xf32> to vector<16x32xbf16>
    %cst_103 = arith.constant dense<0.000000e+00> : vector<16x32xf32>
    %232 = tpu.matmul %230, %231, %cst_103 {dimension_numbers = #tpu.dot_dimension_numbers<[1], [0], [0], [1], [0, 0, 1, 1], [], []>} : vector<16x16xbf16>, vector<16x32xbf16>, vector<16x32xf32> -> vector<16x32xf32>
    %233 = arith.addf %188, %232 : vector<16x32xf32>
    %c0_104 = arith.constant 0 : index
    %c0_105 = arith.constant 0 : index
    %234 = vector.load %arg26[%c0_104, %c0_105] : memref<16x1xf32, #tpu.memory_space<vmem>>, vector<16x1xf32>
    %235 = vector.broadcast %234 : vector<16x1xf32> to vector<16x32xf32>
    %236 = arith.addf %233, %235 : vector<16x32xf32>
    %c0_106 = arith.constant 0 : index
    %c0_107 = arith.constant 0 : index
    %237 = vector.load %arg27[%c0_106, %c0_107] : memref<1x32xf32, #tpu.memory_space<vmem>>, vector<1x32xf32>
    %c0_108 = arith.constant 0 : index
    %c0_109 = arith.constant 0 : index
    %238 = vector.load %arg28[%c0_108, %c0_109] : memref<1x32xf32, #tpu.memory_space<vmem>>, vector<1x32xf32>
    %cst_110 = arith.constant dense<0.000000e+00> : vector<16xf32>
    %239 = vector.multi_reduction <add>, %236, %cst_110 [1] : vector<16x32xf32> to vector<16xf32>
    %240 = vector.shape_cast %239 : vector<16xf32> to vector<16x1xf32>
    %cst_111 = arith.constant 3.200000e+01 : f32
    %241 = vector.broadcast %cst_111 : f32 to vector<16x1xf32>
    %242 = arith.divf %240, %241 : vector<16x1xf32>
    %243 = vector.broadcast %242 : vector<16x1xf32> to vector<16x32xf32>
    %244 = arith.subf %236, %243 : vector<16x32xf32>
    %245 = arith.mulf %244, %244 : vector<16x32xf32>
    %cst_112 = arith.constant dense<0.000000e+00> : vector<16xf32>
    %246 = vector.multi_reduction <add>, %245, %cst_112 [1] : vector<16x32xf32> to vector<16xf32>
    %247 = vector.shape_cast %246 : vector<16xf32> to vector<16x1xf32>
    %cst_113 = arith.constant 3.200000e+01 : f32
    %248 = vector.broadcast %cst_113 : f32 to vector<16x1xf32>
    %249 = arith.divf %247, %248 : vector<16x1xf32>
    %cst_114 = arith.constant 9.99999974E-6 : f32
    %250 = vector.broadcast %cst_114 : f32 to vector<16x1xf32>
    %251 = arith.addf %249, %250 : vector<16x1xf32>
    %252 = math.rsqrt %251 : vector<16x1xf32>
    %253 = vector.broadcast %252 : vector<16x1xf32> to vector<16x32xf32>
    %254 = arith.mulf %244, %253 : vector<16x32xf32>
    %255 = vector.broadcast %237 : vector<1x32xf32> to vector<16x32xf32>
    %256 = arith.mulf %254, %255 : vector<16x32xf32>
    %257 = vector.broadcast %238 : vector<1x32xf32> to vector<16x32xf32>
    %258 = arith.addf %256, %257 : vector<16x32xf32>
    %c0_115 = arith.constant 0 : index
    %c0_116 = arith.constant 0 : index
    %259 = vector.load %arg29[%c0_115, %c0_116] : memref<32x128xbf16, #tpu.memory_space<vmem>>, vector<32x128xbf16>
    %260 = arith.truncf %258 : vector<16x32xf32> to vector<16x32xbf16>
    %cst_117 = arith.constant dense<0.000000e+00> : vector<16x128xf32>
    %261 = tpu.matmul %260, %259, %cst_117 {dimension_numbers = #tpu.dot_dimension_numbers<[1], [0], [0], [1], [0, 0, 1, 1], [], []>} : vector<16x32xbf16>, vector<32x128xbf16>, vector<16x128xf32> -> vector<16x128xf32>
    %c0_118 = arith.constant 0 : index
    %c0_119 = arith.constant 0 : index
    %262 = vector.load %arg30[%c0_118, %c0_119] : memref<1x128xf32, #tpu.memory_space<vmem>>, vector<1x128xf32>
    %263 = vector.broadcast %262 : vector<1x128xf32> to vector<16x128xf32>
    %264 = arith.addf %261, %263 : vector<16x128xf32>
    %cst_120 = arith.constant 5.000000e-01 : f32
    %265 = vector.broadcast %cst_120 : f32 to vector<16x128xf32>
    %266 = arith.mulf %265, %264 : vector<16x128xf32>
    %cst_121 = arith.constant 4.471500e-02 : f32
    %267 = vector.broadcast %cst_121 : f32 to vector<16x128xf32>
    %268 = arith.mulf %267, %264 : vector<16x128xf32>
    %269 = arith.mulf %268, %264 : vector<16x128xf32>
    %270 = arith.mulf %269, %264 : vector<16x128xf32>
    %271 = arith.addf %264, %270 : vector<16x128xf32>
    %cst_122 = arith.constant 0.797884583 : f32
    %272 = vector.broadcast %cst_122 : f32 to vector<16x128xf32>
    %273 = arith.mulf %272, %271 : vector<16x128xf32>
    %274 = math.tanh %273 : vector<16x128xf32>
    %cst_123 = arith.constant 1.000000e+00 : f32
    %275 = vector.broadcast %cst_123 : f32 to vector<16x128xf32>
    %276 = arith.addf %275, %274 : vector<16x128xf32>
    %277 = arith.mulf %266, %276 : vector<16x128xf32>
    %c0_124 = arith.constant 0 : index
    %c0_125 = arith.constant 0 : index
    %278 = vector.load %arg31[%c0_124, %c0_125] : memref<128x32xbf16, #tpu.memory_space<vmem>>, vector<128x32xbf16>
    %279 = arith.truncf %277 : vector<16x128xf32> to vector<16x128xbf16>
    %cst_126 = arith.constant dense<0.000000e+00> : vector<16x32xf32>
    %280 = tpu.matmul %279, %278, %cst_126 {dimension_numbers = #tpu.dot_dimension_numbers<[1], [0], [0], [1], [0, 0, 1, 1], [], []>} : vector<16x128xbf16>, vector<128x32xbf16>, vector<16x32xf32> -> vector<16x32xf32>
    %281 = arith.addf %236, %280 : vector<16x32xf32>
    %c0_127 = arith.constant 0 : index
    %c0_128 = arith.constant 0 : index
    %282 = vector.load %arg32[%c0_127, %c0_128] : memref<1x32xf32, #tpu.memory_space<vmem>>, vector<1x32xf32>
    %283 = vector.broadcast %282 : vector<1x32xf32> to vector<16x32xf32>
    %284 = arith.addf %281, %283 : vector<16x32xf32>
    %c0_129 = arith.constant 0 : index
    %c0_130 = arith.constant 0 : index
    %c0_131 = arith.constant 0 : index
    %285 = vector.load %arg33[%c0_129, %c0_130, %c0_131] : memref<1x16x32xf32, #tpu.memory_space<vmem>>, vector<1x16x32xf32>
    %286 = vector.shape_cast %285 : vector<1x16x32xf32> to vector<16x32xf32>
    %287 = vector.shape_cast %284 : vector<16x32xf32> to vector<1x16x32xf32>
    tpu.vector_store %arg33[%c0_129, %c0_130, %c0_131], %287 {strides = array<i32>} : memref<1x16x32xf32, #tpu.memory_space<vmem>>, vector<1x16x32xf32>,
    return
  }
  func.func @transform_0(%arg0: i32) -> (i32, i32, i32) {
    %c0_i32 = arith.constant 0 : i32
    %c0_i32_0 = arith.constant 0 : i32
    %c0_i32_1 = arith.constant 0 : i32
    %c0_i32_2 = arith.constant 0 : i32
    return %c0_i32, %c0_i32_0, %c0_i32_1 : i32, i32, i32
  }
  func.func @transform_1(%arg0: i32) -> (i32, i32, i32) {
    %c0_i32 = arith.constant 0 : i32
    %c0_i32_0 = arith.constant 0 : i32
    %c0_i32_1 = arith.constant 0 : i32
    return %arg0, %c0_i32, %c0_i32_0 : i32, i32, i32
  }
  func.func @transform_2(%arg0: i32) -> (i32, i32) {
    %c0_i32 = arith.constant 0 : i32
    %c0_i32_0 = arith.constant 0 : i32
    %c0_i32_1 = arith.constant 0 : i32
    return %c0_i32, %c0_i32_0 : i32, i32
  }
  func.func @transform_3(%arg0: i32) -> (i32, i32) {
    %c0_i32 = arith.constant 0 : i32
    %c0_i32_0 = arith.constant 0 : i32
    %c0_i32_1 = arith.constant 0 : i32
    return %c0_i32, %c0_i32_0 : i32, i32
  }
  func.func @transform_4(%arg0: i32) -> (i32, i32) {
    %c0_i32 = arith.constant 0 : i32
    %c0_i32_0 = arith.constant 0 : i32
    %c0_i32_1 = arith.constant 0 : i32
    return %c0_i32, %c0_i32_0 : i32, i32
  }
  func.func @transform_5(%arg0: i32) -> (i32, i32) {
    %c0_i32 = arith.constant 0 : i32
    %c0_i32_0 = arith.constant 0 : i32
    %c0_i32_1 = arith.constant 0 : i32
    return %c0_i32, %c0_i32_0 : i32, i32
  }
  func.func @transform_6(%arg0: i32) -> (i32, i32) {
    %c0_i32 = arith.constant 0 : i32
    %c0_i32_0 = arith.constant 0 : i32
    %c0_i32_1 = arith.constant 0 : i32
    return %c0_i32, %c0_i32_0 : i32, i32
  }
  func.func @transform_7(%arg0: i32) -> (i32, i32) {
    %c0_i32 = arith.constant 0 : i32
    %c0_i32_0 = arith.constant 0 : i32
    %c0_i32_1 = arith.constant 0 : i32
    return %c0_i32, %c0_i32_0 : i32, i32
  }
  func.func @transform_8(%arg0: i32) -> (i32, i32) {
    %c0_i32 = arith.constant 0 : i32
    %c0_i32_0 = arith.constant 0 : i32
    %c0_i32_1 = arith.constant 0 : i32
    return %c0_i32, %c0_i32_0 : i32, i32
  }
  func.func @transform_9(%arg0: i32) -> (i32, i32) {
    %c0_i32 = arith.constant 0 : i32
    %c0_i32_0 = arith.constant 0 : i32
    %c0_i32_1 = arith.constant 0 : i32
    return %c0_i32, %c0_i32_0 : i32, i32
  }
  func.func @transform_10(%arg0: i32) -> (i32, i32) {
    %c0_i32 = arith.constant 0 : i32
    %c0_i32_0 = arith.constant 0 : i32
    %c0_i32_1 = arith.constant 0 : i32
    return %c0_i32, %c0_i32_0 : i32, i32
  }
  func.func @transform_11(%arg0: i32) -> (i32, i32) {
    %c0_i32 = arith.constant 0 : i32
    %c0_i32_0 = arith.constant 0 : i32
    %c0_i32_1 = arith.constant 0 : i32
    return %c0_i32, %c0_i32_0 : i32, i32
  }
  func.func @transform_12(%arg0: i32) -> (i32, i32) {
    %c0_i32 = arith.constant 0 : i32
    %c0_i32_0 = arith.constant 0 : i32
    %c0_i32_1 = arith.constant 0 : i32
    return %c0_i32, %c0_i32_0 : i32, i32
  }
  func.func @transform_13(%arg0: i32) -> (i32, i32) {
    %c0_i32 = arith.constant 0 : i32
    %c0_i32_0 = arith.constant 0 : i32
    %c0_i32_1 = arith.constant 0 : i32
    return %c0_i32, %c0_i32_0 : i32, i32
  }
  func.func @transform_14(%arg0: i32) -> (i32, i32) {
    %c0_i32 = arith.constant 0 : i32
    %c0_i32_0 = arith.constant 0 : i32
    %c0_i32_1 = arith.constant 0 : i32
    return %c0_i32, %c0_i32_0 : i32, i32
  }
  func.func @transform_15(%arg0: i32) -> (i32, i32) {
    %c0_i32 = arith.constant 0 : i32
    %c0_i32_0 = arith.constant 0 : i32
    %c0_i32_1 = arith.constant 0 : i32
    return %c0_i32, %c0_i32_0 : i32, i32
  }
  func.func @transform_16(%arg0: i32) -> (i32, i32) {
    %c0_i32 = arith.constant 0 : i32
    %c0_i32_0 = arith.constant 0 : i32
    %c0_i32_1 = arith.constant 0 : i32
    return %c0_i32, %c0_i32_0 : i32, i32
  }
  func.func @transform_17(%arg0: i32) -> (i32, i32) {
    %c0_i32 = arith.constant 0 : i32
    %c0_i32_0 = arith.constant 0 : i32
    %c0_i32_1 = arith.constant 0 : i32
    return %c0_i32, %c0_i32_0 : i32, i32
  }
  func.func @transform_18(%arg0: i32) -> (i32, i32) {
    %c0_i32 = arith.constant 0 : i32
    %c0_i32_0 = arith.constant 0 : i32
    %c0_i32_1 = arith.constant 0 : i32
    return %c0_i32, %c0_i32_0 : i32, i32
  }
  func.func @transform_19(%arg0: i32) -> (i32, i32) {
    %c0_i32 = arith.constant 0 : i32
    %c0_i32_0 = arith.constant 0 : i32
    %c0_i32_1 = arith.constant 0 : i32
    return %c0_i32, %c0_i32_0 : i32, i32
  }
  func.func @transform_20(%arg0: i32) -> (i32, i32) {
    %c0_i32 = arith.constant 0 : i32
    %c0_i32_0 = arith.constant 0 : i32
    %c0_i32_1 = arith.constant 0 : i32
    return %c0_i32, %c0_i32_0 : i32, i32
  }
  func.func @transform_21(%arg0: i32) -> (i32, i32) {
    %c0_i32 = arith.constant 0 : i32
    %c0_i32_0 = arith.constant 0 : i32
    %c0_i32_1 = arith.constant 0 : i32
    return %c0_i32, %c0_i32_0 : i32, i32
  }
  func.func @transform_22(%arg0: i32) -> (i32, i32) {
    %c0_i32 = arith.constant 0 : i32
    %c0_i32_0 = arith.constant 0 : i32
    %c0_i32_1 = arith.constant 0 : i32
    return %c0_i32, %c0_i32_0 : i32, i32
  }
  func.func @transform_23(%arg0: i32) -> (i32, i32) {
    %c0_i32 = arith.constant 0 : i32
    %c0_i32_0 = arith.constant 0 : i32
    %c0_i32_1 = arith.constant 0 : i32
    return %c0_i32, %c0_i32_0 : i32, i32
  }
  func.func @transform_24(%arg0: i32) -> (i32, i32) {
    %c0_i32 = arith.constant 0 : i32
    %c0_i32_0 = arith.constant 0 : i32
    %c0_i32_1 = arith.constant 0 : i32
    return %c0_i32, %c0_i32_0 : i32, i32
  }
  func.func @transform_25(%arg0: i32) -> (i32, i32) {
    %c0_i32 = arith.constant 0 : i32
    %c0_i32_0 = arith.constant 0 : i32
    %c0_i32_1 = arith.constant 0 : i32
    return %c0_i32, %c0_i32_0 : i32, i32
  }
  func.func @transform_26(%arg0: i32) -> (i32, i32) {
    %c0_i32 = arith.constant 0 : i32
    %c0_i32_0 = arith.constant 0 : i32
    %c0_i32_1 = arith.constant 0 : i32
    return %c0_i32, %c0_i32_0 : i32, i32
  }
  func.func @transform_27(%arg0: i32) -> (i32, i32) {
    %c0_i32 = arith.constant 0 : i32
    %c0_i32_0 = arith.constant 0 : i32
    %c0_i32_1 = arith.constant 0 : i32
    return %c0_i32, %c0_i32_0 : i32, i32
  }
  func.func @transform_28(%arg0: i32) -> (i32, i32) {
    %c0_i32 = arith.constant 0 : i32
    %c0_i32_0 = arith.constant 0 : i32
    %c0_i32_1 = arith.constant 0 : i32
    return %c0_i32, %c0_i32_0 : i32, i32
  }
  func.func @transform_29(%arg0: i32) -> (i32, i32) {
    %c0_i32 = arith.constant 0 : i32
    %c0_i32_0 = arith.constant 0 : i32
    %c0_i32_1 = arith.constant 0 : i32
    return %c0_i32, %c0_i32_0 : i32, i32
  }
  func.func @transform_30(%arg0: i32) -> (i32, i32) {
    %c0_i32 = arith.constant 0 : i32
    %c0_i32_0 = arith.constant 0 : i32
    %c0_i32_1 = arith.constant 0 : i32
    return %c0_i32, %c0_i32_0 : i32, i32
  }
  func.func @transform_31(%arg0: i32) -> (i32, i32) {
    %c0_i32 = arith.constant 0 : i32
    %c0_i32_0 = arith.constant 0 : i32
    %c0_i32_1 = arith.constant 0 : i32
    return %c0_i32, %c0_i32_0 : i32, i32
  }
  func.func @transform_32(%arg0: i32) -> (i32, i32, i32) {
    %c0_i32 = arith.constant 0 : i32
    %c0_i32_0 = arith.constant 0 : i32
    %c0_i32_1 = arith.constant 0 : i32
    return %arg0, %c0_i32, %c0_i32_0 : i32, i32, i32
  }
}

module attributes {stable_mosaic.version = 11 : i64} {
  func.func @kernel(%arg0: i32, %arg1: memref<1x64x32xf32, #tpu.memory_space<vmem>>, %arg2: memref<1x16x32xf32, #tpu.memory_space<vmem>>, %arg3: memref<1x32xf32, #tpu.memory_space<vmem>>, %arg4: memref<1x32xf32, #tpu.memory_space<vmem>>, %arg5: memref<1x32xf32, #tpu.memory_space<vmem>>, %arg6: memref<1x32xf32, #tpu.memory_space<vmem>>, %arg7: memref<32x32xbf16, #tpu.memory_space<vmem>>, %arg8: memref<1x32xf32, #tpu.memory_space<vmem>>, %arg9: memref<32x32xbf16, #tpu.memory_space<vmem>>, %arg10: memref<1x32xf32, #tpu.memory_space<vmem>>, %arg11: memref<32x32xbf16, #tpu.memory_space<vmem>>, %arg12: memref<1x32xf32, #tpu.memory_space<vmem>>, %arg13: memref<32x32xbf16, #tpu.memory_space<vmem>>, %arg14: memref<32x32xbf16, #tpu.memory_space<vmem>>, %arg15: memref<1x32xf32, #tpu.memory_space<vmem>>, %arg16: memref<1x32xf32, #tpu.memory_space<vmem>>, %arg17: memref<1x32xf32, #tpu.memory_space<vmem>>, %arg18: memref<32x128xbf16, #tpu.memory_space<vmem>>, %arg19: memref<1x128xf32, #tpu.memory_space<vmem>>, %arg20: memref<128x32xbf16, #tpu.memory_space<vmem>>, %arg21: memref<1x32xf32, #tpu.memory_space<vmem>>, %arg22: memref<3x3x32xf32, #tpu.memory_space<vmem>>, %arg23: memref<1x1x32xf32, #tpu.memory_space<vmem>>, %arg24: memref<1x8x8x32xf32, #tpu.memory_space<vmem>>) attributes {dimension_semantics = [#tpu.dimension_semantics<parallel>], iteration_bounds = array<i64: 2>, scalar_prefetch = 0 : i64, scratch_operands = 0 : i64, tpu.core_type = #tpu.core_type<tc>, window_params = [{transform_indices = @transform_0, window_bounds = array<i64: 1, 64, 32>}, {transform_indices = @transform_1, window_bounds = array<i64: 1, 16, 32>}, {pipeline_mode = #tpu.pipeline_mode<synchronous>, transform_indices = @transform_2, window_bounds = array<i64: 1, 32>}, {pipeline_mode = #tpu.pipeline_mode<synchronous>, transform_indices = @transform_3, window_bounds = array<i64: 1, 32>}, {pipeline_mode = #tpu.pipeline_mode<synchronous>, transform_indices = @transform_4, window_bounds = array<i64: 1, 32>}, {pipeline_mode = #tpu.pipeline_mode<synchronous>, transform_indices = @transform_5, window_bounds = array<i64: 1, 32>}, {pipeline_mode = #tpu.pipeline_mode<synchronous>, transform_indices = @transform_6, window_bounds = array<i64: 32, 32>}, {pipeline_mode = #tpu.pipeline_mode<synchronous>, transform_indices = @transform_7, window_bounds = array<i64: 1, 32>}, {pipeline_mode = #tpu.pipeline_mode<synchronous>, transform_indices = @transform_8, window_bounds = array<i64: 32, 32>}, {pipeline_mode = #tpu.pipeline_mode<synchronous>, transform_indices = @transform_9, window_bounds = array<i64: 1, 32>}, {pipeline_mode = #tpu.pipeline_mode<synchronous>, transform_indices = @transform_10, window_bounds = array<i64: 32, 32>}, {pipeline_mode = #tpu.pipeline_mode<synchronous>, transform_indices = @transform_11, window_bounds = array<i64: 1, 32>}, {pipeline_mode = #tpu.pipeline_mode<synchronous>, transform_indices = @transform_12, window_bounds = array<i64: 32, 32>}, {pipeline_mode = #tpu.pipeline_mode<synchronous>, transform_indices = @transform_13, window_bounds = array<i64: 32, 32>}, {pipeline_mode = #tpu.pipeline_mode<synchronous>, transform_indices = @transform_14, window_bounds = array<i64: 1, 32>}, {pipeline_mode = #tpu.pipeline_mode<synchronous>, transform_indices = @transform_15, window_bounds = array<i64: 1, 32>}, {pipeline_mode = #tpu.pipeline_mode<synchronous>, transform_indices = @transform_16, window_bounds = array<i64: 1, 32>}, {pipeline_mode = #tpu.pipeline_mode<synchronous>, transform_indices = @transform_17, window_bounds = array<i64: 32, 128>}, {pipeline_mode = #tpu.pipeline_mode<synchronous>, transform_indices = @transform_18, window_bounds = array<i64: 1, 128>}, {pipeline_mode = #tpu.pipeline_mode<synchronous>, transform_indices = @transform_19, window_bounds = array<i64: 128, 32>}, {pipeline_mode = #tpu.pipeline_mode<synchronous>, transform_indices = @transform_20, window_bounds = array<i64: 1, 32>}, {pipeline_mode = #tpu.pipeline_mode<synchronous>, transform_indices = @transform_21, window_bounds = array<i64: 3, 3, 32>}, {pipeline_mode = #tpu.pipeline_mode<synchronous>, transform_indices = @transform_22, window_bounds = array<i64: 1, 1, 32>}, {transform_indices = @transform_23, window_bounds = array<i64: 1, 8, 8, 32>}]} {
    %c0 = arith.constant 0 : index
    %c0_0 = arith.constant 0 : index
    %c0_1 = arith.constant 0 : index
    %0 = vector.load %arg1[%c0, %c0_0, %c0_1] : memref<1x64x32xf32, #tpu.memory_space<vmem>>, vector<1x64x32xf32>
    %1 = vector.shape_cast %0 : vector<1x64x32xf32> to vector<64x32xf32>
    %c0_2 = arith.constant 0 : index
    %c0_3 = arith.constant 0 : index
    %c0_4 = arith.constant 0 : index
    %2 = vector.load %arg2[%c0_2, %c0_3, %c0_4] : memref<1x16x32xf32, #tpu.memory_space<vmem>>, vector<1x16x32xf32>
    %3 = vector.shape_cast %2 : vector<1x16x32xf32> to vector<16x32xf32>
    %c0_5 = arith.constant 0 : index
    %c0_6 = arith.constant 0 : index
    %4 = vector.load %arg3[%c0_5, %c0_6] : memref<1x32xf32, #tpu.memory_space<vmem>>, vector<1x32xf32>
    %c0_7 = arith.constant 0 : index
    %c0_8 = arith.constant 0 : index
    %5 = vector.load %arg4[%c0_7, %c0_8] : memref<1x32xf32, #tpu.memory_space<vmem>>, vector<1x32xf32>
    %cst = arith.constant dense<0.000000e+00> : vector<64xf32>
    %6 = vector.multi_reduction <add>, %1, %cst [1] : vector<64x32xf32> to vector<64xf32>
    %7 = vector.shape_cast %6 : vector<64xf32> to vector<64x1xf32>
    %cst_9 = arith.constant 3.200000e+01 : f32
    %8 = vector.broadcast %cst_9 : f32 to vector<64x1xf32>
    %9 = arith.divf %7, %8 : vector<64x1xf32>
    %10 = vector.broadcast %9 : vector<64x1xf32> to vector<64x32xf32>
    %11 = arith.subf %1, %10 : vector<64x32xf32>
    %12 = arith.mulf %11, %11 : vector<64x32xf32>
    %cst_10 = arith.constant dense<0.000000e+00> : vector<64xf32>
    %13 = vector.multi_reduction <add>, %12, %cst_10 [1] : vector<64x32xf32> to vector<64xf32>
    %14 = vector.shape_cast %13 : vector<64xf32> to vector<64x1xf32>
    %cst_11 = arith.constant 3.200000e+01 : f32
    %15 = vector.broadcast %cst_11 : f32 to vector<64x1xf32>
    %16 = arith.divf %14, %15 : vector<64x1xf32>
    %cst_12 = arith.constant 9.99999974E-6 : f32
    %17 = vector.broadcast %cst_12 : f32 to vector<64x1xf32>
    %18 = arith.addf %16, %17 : vector<64x1xf32>
    %19 = math.rsqrt %18 : vector<64x1xf32>
    %20 = vector.broadcast %19 : vector<64x1xf32> to vector<64x32xf32>
    %21 = arith.mulf %11, %20 : vector<64x32xf32>
    %22 = vector.broadcast %4 : vector<1x32xf32> to vector<64x32xf32>
    %23 = arith.mulf %21, %22 : vector<64x32xf32>
    %24 = vector.broadcast %5 : vector<1x32xf32> to vector<64x32xf32>
    %25 = arith.addf %23, %24 : vector<64x32xf32>
    %c0_13 = arith.constant 0 : index
    %c0_14 = arith.constant 0 : index
    %26 = vector.load %arg5[%c0_13, %c0_14] : memref<1x32xf32, #tpu.memory_space<vmem>>, vector<1x32xf32>
    %c0_15 = arith.constant 0 : index
    %c0_16 = arith.constant 0 : index
    %27 = vector.load %arg6[%c0_15, %c0_16] : memref<1x32xf32, #tpu.memory_space<vmem>>, vector<1x32xf32>
    %cst_17 = arith.constant dense<0.000000e+00> : vector<16xf32>
    %28 = vector.multi_reduction <add>, %3, %cst_17 [1] : vector<16x32xf32> to vector<16xf32>
    %29 = vector.shape_cast %28 : vector<16xf32> to vector<16x1xf32>
    %cst_18 = arith.constant 3.200000e+01 : f32
    %30 = vector.broadcast %cst_18 : f32 to vector<16x1xf32>
    %31 = arith.divf %29, %30 : vector<16x1xf32>
    %32 = vector.broadcast %31 : vector<16x1xf32> to vector<16x32xf32>
    %33 = arith.subf %3, %32 : vector<16x32xf32>
    %34 = arith.mulf %33, %33 : vector<16x32xf32>
    %cst_19 = arith.constant dense<0.000000e+00> : vector<16xf32>
    %35 = vector.multi_reduction <add>, %34, %cst_19 [1] : vector<16x32xf32> to vector<16xf32>
    %36 = vector.shape_cast %35 : vector<16xf32> to vector<16x1xf32>
    %cst_20 = arith.constant 3.200000e+01 : f32
    %37 = vector.broadcast %cst_20 : f32 to vector<16x1xf32>
    %38 = arith.divf %36, %37 : vector<16x1xf32>
    %cst_21 = arith.constant 9.99999974E-6 : f32
    %39 = vector.broadcast %cst_21 : f32 to vector<16x1xf32>
    %40 = arith.addf %38, %39 : vector<16x1xf32>
    %41 = math.rsqrt %40 : vector<16x1xf32>
    %42 = vector.broadcast %41 : vector<16x1xf32> to vector<16x32xf32>
    %43 = arith.mulf %33, %42 : vector<16x32xf32>
    %44 = vector.broadcast %26 : vector<1x32xf32> to vector<16x32xf32>
    %45 = arith.mulf %43, %44 : vector<16x32xf32>
    %46 = vector.broadcast %27 : vector<1x32xf32> to vector<16x32xf32>
    %47 = arith.addf %45, %46 : vector<16x32xf32>
    %48 = arith.truncf %47 : vector<16x32xf32> to vector<16x32xbf16>
    %c0_22 = arith.constant 0 : index
    %c0_23 = arith.constant 0 : index
    %49 = vector.load %arg7[%c0_22, %c0_23] : memref<32x32xbf16, #tpu.memory_space<vmem>>, vector<32x32xbf16>
    %50 = arith.truncf %25 : vector<64x32xf32> to vector<64x32xbf16>
    %cst_24 = arith.constant dense<0.000000e+00> : vector<64x32xf32>
    %51 = tpu.matmul %50, %49, %cst_24 {dimension_numbers = #tpu.dot_dimension_numbers<[1], [0], [0], [1], [0, 0, 1, 1], [], []>} : vector<64x32xbf16>, vector<32x32xbf16>, vector<64x32xf32> -> vector<64x32xf32>
    %c0_25 = arith.constant 0 : index
    %c0_26 = arith.constant 0 : index
    %52 = vector.load %arg8[%c0_25, %c0_26] : memref<1x32xf32, #tpu.memory_space<vmem>>, vector<1x32xf32>
    %53 = vector.broadcast %52 : vector<1x32xf32> to vector<64x32xf32>
    %54 = arith.addf %51, %53 : vector<64x32xf32>
    %55 = arith.truncf %54 : vector<64x32xf32> to vector<64x32xbf16>
    %c0_27 = arith.constant 0 : index
    %c0_28 = arith.constant 0 : index
    %56 = vector.load %arg9[%c0_27, %c0_28] : memref<32x32xbf16, #tpu.memory_space<vmem>>, vector<32x32xbf16>
    %cst_29 = arith.constant dense<0.000000e+00> : vector<16x32xf32>
    %57 = tpu.matmul %48, %56, %cst_29 {dimension_numbers = #tpu.dot_dimension_numbers<[1], [0], [0], [1], [0, 0, 1, 1], [], []>} : vector<16x32xbf16>, vector<32x32xbf16>, vector<16x32xf32> -> vector<16x32xf32>
    %c0_30 = arith.constant 0 : index
    %c0_31 = arith.constant 0 : index
    %58 = vector.load %arg10[%c0_30, %c0_31] : memref<1x32xf32, #tpu.memory_space<vmem>>, vector<1x32xf32>
    %59 = vector.broadcast %58 : vector<1x32xf32> to vector<16x32xf32>
    %60 = arith.addf %57, %59 : vector<16x32xf32>
    %61 = arith.truncf %60 : vector<16x32xf32> to vector<16x32xbf16>
    %c0_32 = arith.constant 0 : index
    %c0_33 = arith.constant 0 : index
    %62 = vector.load %arg11[%c0_32, %c0_33] : memref<32x32xbf16, #tpu.memory_space<vmem>>, vector<32x32xbf16>
    %cst_34 = arith.constant dense<0.000000e+00> : vector<16x32xf32>
    %63 = tpu.matmul %48, %62, %cst_34 {dimension_numbers = #tpu.dot_dimension_numbers<[1], [0], [0], [1], [0, 0, 1, 1], [], []>} : vector<16x32xbf16>, vector<32x32xbf16>, vector<16x32xf32> -> vector<16x32xf32>
    %c0_35 = arith.constant 0 : index
    %c0_36 = arith.constant 0 : index
    %64 = vector.load %arg12[%c0_35, %c0_36] : memref<1x32xf32, #tpu.memory_space<vmem>>, vector<1x32xf32>
    %65 = vector.broadcast %64 : vector<1x32xf32> to vector<16x32xf32>
    %66 = arith.addf %63, %65 : vector<16x32xf32>
    %67 = arith.truncf %66 : vector<16x32xf32> to vector<16x32xbf16>
    %68 = vector.extract_strided_slice %55 {offsets = [0, 0], sizes = [64, 16], strides = [1, 1]} : vector<64x32xbf16> to vector<64x16xbf16>
    %69 = vector.extract_strided_slice %61 {offsets = [0, 0], sizes = [16, 16], strides = [1, 1]} : vector<16x32xbf16> to vector<16x16xbf16>
    %70 = vector.extract_strided_slice %67 {offsets = [0, 0], sizes = [16, 16], strides = [1, 1]} : vector<16x32xbf16> to vector<16x16xbf16>
    %cst_37 = arith.constant dense<0.000000e+00> : vector<64x16xf32>
    %71 = tpu.matmul %68, %69, %cst_37 {dimension_numbers = #tpu.dot_dimension_numbers<[1], [1], [0], [0], [0, 0, 1, 0], [], []>} : vector<64x16xbf16>, vector<16x16xbf16>, vector<64x16xf32> -> vector<64x16xf32>
    %cst_38 = arith.constant 2.500000e-01 : f32
    %72 = vector.broadcast %cst_38 : f32 to vector<64x16xf32>
    %73 = arith.mulf %71, %72 : vector<64x16xf32>
    %cst_39 = arith.constant dense<0xFF800000> : vector<64xf32>
    %74 = vector.multi_reduction <maximumf>, %73, %cst_39 [1] : vector<64x16xf32> to vector<64xf32>
    %75 = vector.shape_cast %74 : vector<64xf32> to vector<64x1xf32>
    %76 = vector.broadcast %75 : vector<64x1xf32> to vector<64x16xf32>
    %77 = arith.subf %73, %76 : vector<64x16xf32>
    %78 = math.exp %77 : vector<64x16xf32>
    %cst_40 = arith.constant dense<0.000000e+00> : vector<64xf32>
    %79 = vector.multi_reduction <add>, %78, %cst_40 [1] : vector<64x16xf32> to vector<64xf32>
    %80 = vector.shape_cast %79 : vector<64xf32> to vector<64x1xf32>
    %81 = tpu.reciprocal %80 {approx = true} : vector<64x1xf32> -> vector<64x1xf32>
    %82 = vector.broadcast %81 : vector<64x1xf32> to vector<64x16xf32>
    %83 = arith.mulf %78, %82 : vector<64x16xf32>
    %84 = arith.truncf %83 : vector<64x16xf32> to vector<64x16xbf16>
    %cst_41 = arith.constant dense<0.000000e+00> : vector<64x16xf32>
    %85 = tpu.matmul %84, %70, %cst_41 {dimension_numbers = #tpu.dot_dimension_numbers<[1], [0], [0], [1], [0, 0, 1, 1], [], []>} : vector<64x16xbf16>, vector<16x16xbf16>, vector<64x16xf32> -> vector<64x16xf32>
    %86 = vector.extract_strided_slice %55 {offsets = [0, 16], sizes = [64, 16], strides = [1, 1]} : vector<64x32xbf16> to vector<64x16xbf16>
    %87 = vector.extract_strided_slice %61 {offsets = [0, 16], sizes = [16, 16], strides = [1, 1]} : vector<16x32xbf16> to vector<16x16xbf16>
    %88 = vector.extract_strided_slice %67 {offsets = [0, 16], sizes = [16, 16], strides = [1, 1]} : vector<16x32xbf16> to vector<16x16xbf16>
    %cst_42 = arith.constant dense<0.000000e+00> : vector<64x16xf32>
    %89 = tpu.matmul %86, %87, %cst_42 {dimension_numbers = #tpu.dot_dimension_numbers<[1], [1], [0], [0], [0, 0, 1, 0], [], []>} : vector<64x16xbf16>, vector<16x16xbf16>, vector<64x16xf32> -> vector<64x16xf32>
    %cst_43 = arith.constant 2.500000e-01 : f32
    %90 = vector.broadcast %cst_43 : f32 to vector<64x16xf32>
    %91 = arith.mulf %89, %90 : vector<64x16xf32>
    %cst_44 = arith.constant dense<0xFF800000> : vector<64xf32>
    %92 = vector.multi_reduction <maximumf>, %91, %cst_44 [1] : vector<64x16xf32> to vector<64xf32>
    %93 = vector.shape_cast %92 : vector<64xf32> to vector<64x1xf32>
    %94 = vector.broadcast %93 : vector<64x1xf32> to vector<64x16xf32>
    %95 = arith.subf %91, %94 : vector<64x16xf32>
    %96 = math.exp %95 : vector<64x16xf32>
    %cst_45 = arith.constant dense<0.000000e+00> : vector<64xf32>
    %97 = vector.multi_reduction <add>, %96, %cst_45 [1] : vector<64x16xf32> to vector<64xf32>
    %98 = vector.shape_cast %97 : vector<64xf32> to vector<64x1xf32>
    %99 = tpu.reciprocal %98 {approx = true} : vector<64x1xf32> -> vector<64x1xf32>
    %100 = vector.broadcast %99 : vector<64x1xf32> to vector<64x16xf32>
    %101 = arith.mulf %96, %100 : vector<64x16xf32>
    %102 = arith.truncf %101 : vector<64x16xf32> to vector<64x16xbf16>
    %cst_46 = arith.constant dense<0.000000e+00> : vector<64x16xf32>
    %103 = tpu.matmul %102, %88, %cst_46 {dimension_numbers = #tpu.dot_dimension_numbers<[1], [0], [0], [1], [0, 0, 1, 1], [], []>} : vector<64x16xbf16>, vector<16x16xbf16>, vector<64x16xf32> -> vector<64x16xf32>
    %104 = tpu.concatenate %85, %103 in 1 : vector<64x16xf32>, vector<64x16xf32> -> vector<64x32xf32>
    %c0_47 = arith.constant 0 : index
    %c0_48 = arith.constant 0 : index
    %105 = vector.load %arg13[%c0_47, %c0_48] : memref<32x32xbf16, #tpu.memory_space<vmem>>, vector<32x32xbf16>
    %106 = arith.truncf %1 : vector<64x32xf32> to vector<64x32xbf16>
    %cst_49 = arith.constant dense<0.000000e+00> : vector<64x32xf32>
    %107 = tpu.matmul %106, %105, %cst_49 {dimension_numbers = #tpu.dot_dimension_numbers<[1], [0], [0], [1], [0, 0, 1, 1], [], []>} : vector<64x32xbf16>, vector<32x32xbf16>, vector<64x32xf32> -> vector<64x32xf32>
    %c0_50 = arith.constant 0 : index
    %c0_51 = arith.constant 0 : index
    %108 = vector.load %arg14[%c0_50, %c0_51] : memref<32x32xbf16, #tpu.memory_space<vmem>>, vector<32x32xbf16>
    %109 = arith.truncf %104 : vector<64x32xf32> to vector<64x32xbf16>
    %cst_52 = arith.constant dense<0.000000e+00> : vector<64x32xf32>
    %110 = tpu.matmul %109, %108, %cst_52 {dimension_numbers = #tpu.dot_dimension_numbers<[1], [0], [0], [1], [0, 0, 1, 1], [], []>} : vector<64x32xbf16>, vector<32x32xbf16>, vector<64x32xf32> -> vector<64x32xf32>
    %111 = arith.addf %107, %110 : vector<64x32xf32>
    %c0_53 = arith.constant 0 : index
    %c0_54 = arith.constant 0 : index
    %112 = vector.load %arg15[%c0_53, %c0_54] : memref<1x32xf32, #tpu.memory_space<vmem>>, vector<1x32xf32>
    %113 = vector.broadcast %112 : vector<1x32xf32> to vector<64x32xf32>
    %114 = arith.addf %111, %113 : vector<64x32xf32>
    %c0_55 = arith.constant 0 : index
    %c0_56 = arith.constant 0 : index
    %115 = vector.load %arg16[%c0_55, %c0_56] : memref<1x32xf32, #tpu.memory_space<vmem>>, vector<1x32xf32>
    %c0_57 = arith.constant 0 : index
    %c0_58 = arith.constant 0 : index
    %116 = vector.load %arg17[%c0_57, %c0_58] : memref<1x32xf32, #tpu.memory_space<vmem>>, vector<1x32xf32>
    %cst_59 = arith.constant dense<0.000000e+00> : vector<64xf32>
    %117 = vector.multi_reduction <add>, %114, %cst_59 [1] : vector<64x32xf32> to vector<64xf32>
    %118 = vector.shape_cast %117 : vector<64xf32> to vector<64x1xf32>
    %cst_60 = arith.constant 3.200000e+01 : f32
    %119 = vector.broadcast %cst_60 : f32 to vector<64x1xf32>
    %120 = arith.divf %118, %119 : vector<64x1xf32>
    %121 = vector.broadcast %120 : vector<64x1xf32> to vector<64x32xf32>
    %122 = arith.subf %114, %121 : vector<64x32xf32>
    %123 = arith.mulf %122, %122 : vector<64x32xf32>
    %cst_61 = arith.constant dense<0.000000e+00> : vector<64xf32>
    %124 = vector.multi_reduction <add>, %123, %cst_61 [1] : vector<64x32xf32> to vector<64xf32>
    %125 = vector.shape_cast %124 : vector<64xf32> to vector<64x1xf32>
    %cst_62 = arith.constant 3.200000e+01 : f32
    %126 = vector.broadcast %cst_62 : f32 to vector<64x1xf32>
    %127 = arith.divf %125, %126 : vector<64x1xf32>
    %cst_63 = arith.constant 9.99999974E-6 : f32
    %128 = vector.broadcast %cst_63 : f32 to vector<64x1xf32>
    %129 = arith.addf %127, %128 : vector<64x1xf32>
    %130 = math.rsqrt %129 : vector<64x1xf32>
    %131 = vector.broadcast %130 : vector<64x1xf32> to vector<64x32xf32>
    %132 = arith.mulf %122, %131 : vector<64x32xf32>
    %133 = vector.broadcast %115 : vector<1x32xf32> to vector<64x32xf32>
    %134 = arith.mulf %132, %133 : vector<64x32xf32>
    %135 = vector.broadcast %116 : vector<1x32xf32> to vector<64x32xf32>
    %136 = arith.addf %134, %135 : vector<64x32xf32>
    %c0_64 = arith.constant 0 : index
    %c0_65 = arith.constant 0 : index
    %137 = vector.load %arg18[%c0_64, %c0_65] : memref<32x128xbf16, #tpu.memory_space<vmem>>, vector<32x128xbf16>
    %138 = arith.truncf %136 : vector<64x32xf32> to vector<64x32xbf16>
    %cst_66 = arith.constant dense<0.000000e+00> : vector<64x128xf32>
    %139 = tpu.matmul %138, %137, %cst_66 {dimension_numbers = #tpu.dot_dimension_numbers<[1], [0], [0], [1], [0, 0, 1, 1], [], []>} : vector<64x32xbf16>, vector<32x128xbf16>, vector<64x128xf32> -> vector<64x128xf32>
    %c0_67 = arith.constant 0 : index
    %c0_68 = arith.constant 0 : index
    %140 = vector.load %arg19[%c0_67, %c0_68] : memref<1x128xf32, #tpu.memory_space<vmem>>, vector<1x128xf32>
    %141 = vector.broadcast %140 : vector<1x128xf32> to vector<64x128xf32>
    %142 = arith.addf %139, %141 : vector<64x128xf32>
    %cst_69 = arith.constant 5.000000e-01 : f32
    %143 = vector.broadcast %cst_69 : f32 to vector<64x128xf32>
    %144 = arith.mulf %143, %142 : vector<64x128xf32>
    %cst_70 = arith.constant 4.471500e-02 : f32
    %145 = vector.broadcast %cst_70 : f32 to vector<64x128xf32>
    %146 = arith.mulf %145, %142 : vector<64x128xf32>
    %147 = arith.mulf %146, %142 : vector<64x128xf32>
    %148 = arith.mulf %147, %142 : vector<64x128xf32>
    %149 = arith.addf %142, %148 : vector<64x128xf32>
    %cst_71 = arith.constant 0.797884583 : f32
    %150 = vector.broadcast %cst_71 : f32 to vector<64x128xf32>
    %151 = arith.mulf %150, %149 : vector<64x128xf32>
    %152 = math.tanh %151 : vector<64x128xf32>
    %cst_72 = arith.constant 1.000000e+00 : f32
    %153 = vector.broadcast %cst_72 : f32 to vector<64x128xf32>
    %154 = arith.addf %153, %152 : vector<64x128xf32>
    %155 = arith.mulf %144, %154 : vector<64x128xf32>
    %c0_73 = arith.constant 0 : index
    %c0_74 = arith.constant 0 : index
    %156 = vector.load %arg20[%c0_73, %c0_74] : memref<128x32xbf16, #tpu.memory_space<vmem>>, vector<128x32xbf16>
    %157 = arith.truncf %155 : vector<64x128xf32> to vector<64x128xbf16>
    %cst_75 = arith.constant dense<0.000000e+00> : vector<64x32xf32>
    %158 = tpu.matmul %157, %156, %cst_75 {dimension_numbers = #tpu.dot_dimension_numbers<[1], [0], [0], [1], [0, 0, 1, 1], [], []>} : vector<64x128xbf16>, vector<128x32xbf16>, vector<64x32xf32> -> vector<64x32xf32>
    %159 = arith.addf %114, %158 : vector<64x32xf32>
    %c0_76 = arith.constant 0 : index
    %c0_77 = arith.constant 0 : index
    %160 = vector.load %arg21[%c0_76, %c0_77] : memref<1x32xf32, #tpu.memory_space<vmem>>, vector<1x32xf32>
    %161 = vector.broadcast %160 : vector<1x32xf32> to vector<64x32xf32>
    %162 = arith.addf %159, %161 : vector<64x32xf32>
    %163 = vector.shape_cast %162 : vector<64x32xf32> to vector<8x8x32xf32>
    %cst_78 = arith.constant 0.000000e+00 : f32
    %164 = vector.broadcast %cst_78 : f32 to vector<1x8x32xf32>
    %cst_79 = arith.constant 0.000000e+00 : f32
    %165 = vector.broadcast %cst_79 : f32 to vector<10x1x32xf32>
    %166 = tpu.concatenate %164, %163, %164 in 0 : vector<1x8x32xf32>, vector<8x8x32xf32>, vector<1x8x32xf32> -> vector<10x8x32xf32>
    %167 = tpu.concatenate %165, %166, %165 in 1 : vector<10x1x32xf32>, vector<10x8x32xf32>, vector<10x1x32xf32> -> vector<10x10x32xf32>
    %c0_80 = arith.constant 0 : index
    %c0_81 = arith.constant 0 : index
    %c0_82 = arith.constant 0 : index
    %168 = vector.load %arg22[%c0_80, %c0_81, %c0_82] : memref<3x3x32xf32, #tpu.memory_space<vmem>>, vector<3x3x32xf32>
    %169 = vector.extract_strided_slice %167 {offsets = [0, 0, 0], sizes = [8, 8, 32], strides = [1, 1, 1]} : vector<10x10x32xf32> to vector<8x8x32xf32>
    %170 = vector.extract_strided_slice %168 {offsets = [0, 0, 0], sizes = [1, 1, 32], strides = [1, 1, 1]} : vector<3x3x32xf32> to vector<1x1x32xf32>
    %171 = vector.shape_cast %170 : vector<1x1x32xf32> to vector<32xf32>
    %172 = vector.shape_cast %171 : vector<32xf32> to vector<1x1x32xf32>
    %173 = vector.broadcast %172 : vector<1x1x32xf32> to vector<8x8x32xf32>
    %174 = arith.mulf %169, %173 : vector<8x8x32xf32>
    %175 = vector.extract_strided_slice %167 {offsets = [0, 1, 0], sizes = [8, 8, 32], strides = [1, 1, 1]} : vector<10x10x32xf32> to vector<8x8x32xf32>
    %176 = vector.extract_strided_slice %168 {offsets = [0, 1, 0], sizes = [1, 1, 32], strides = [1, 1, 1]} : vector<3x3x32xf32> to vector<1x1x32xf32>
    %177 = vector.shape_cast %176 : vector<1x1x32xf32> to vector<32xf32>
    %178 = vector.shape_cast %177 : vector<32xf32> to vector<1x1x32xf32>
    %179 = vector.broadcast %178 : vector<1x1x32xf32> to vector<8x8x32xf32>
    %180 = arith.mulf %175, %179 : vector<8x8x32xf32>
    %181 = arith.addf %174, %180 : vector<8x8x32xf32>
    %182 = vector.extract_strided_slice %167 {offsets = [0, 2, 0], sizes = [8, 8, 32], strides = [1, 1, 1]} : vector<10x10x32xf32> to vector<8x8x32xf32>
    %183 = vector.extract_strided_slice %168 {offsets = [0, 2, 0], sizes = [1, 1, 32], strides = [1, 1, 1]} : vector<3x3x32xf32> to vector<1x1x32xf32>
    %184 = vector.shape_cast %183 : vector<1x1x32xf32> to vector<32xf32>
    %185 = vector.shape_cast %184 : vector<32xf32> to vector<1x1x32xf32>
    %186 = vector.broadcast %185 : vector<1x1x32xf32> to vector<8x8x32xf32>
    %187 = arith.mulf %182, %186 : vector<8x8x32xf32>
    %188 = arith.addf %181, %187 : vector<8x8x32xf32>
    %189 = vector.extract_strided_slice %167 {offsets = [1, 0, 0], sizes = [8, 8, 32], strides = [1, 1, 1]} : vector<10x10x32xf32> to vector<8x8x32xf32>
    %190 = vector.extract_strided_slice %168 {offsets = [1, 0, 0], sizes = [1, 1, 32], strides = [1, 1, 1]} : vector<3x3x32xf32> to vector<1x1x32xf32>
    %191 = vector.shape_cast %190 : vector<1x1x32xf32> to vector<32xf32>
    %192 = vector.shape_cast %191 : vector<32xf32> to vector<1x1x32xf32>
    %193 = vector.broadcast %192 : vector<1x1x32xf32> to vector<8x8x32xf32>
    %194 = arith.mulf %189, %193 : vector<8x8x32xf32>
    %195 = arith.addf %188, %194 : vector<8x8x32xf32>
    %196 = vector.extract_strided_slice %167 {offsets = [1, 1, 0], sizes = [8, 8, 32], strides = [1, 1, 1]} : vector<10x10x32xf32> to vector<8x8x32xf32>
    %197 = vector.extract_strided_slice %168 {offsets = [1, 1, 0], sizes = [1, 1, 32], strides = [1, 1, 1]} : vector<3x3x32xf32> to vector<1x1x32xf32>
    %198 = vector.shape_cast %197 : vector<1x1x32xf32> to vector<32xf32>
    %199 = vector.shape_cast %198 : vector<32xf32> to vector<1x1x32xf32>
    %200 = vector.broadcast %199 : vector<1x1x32xf32> to vector<8x8x32xf32>
    %201 = arith.mulf %196, %200 : vector<8x8x32xf32>
    %202 = arith.addf %195, %201 : vector<8x8x32xf32>
    %203 = vector.extract_strided_slice %167 {offsets = [1, 2, 0], sizes = [8, 8, 32], strides = [1, 1, 1]} : vector<10x10x32xf32> to vector<8x8x32xf32>
    %204 = vector.extract_strided_slice %168 {offsets = [1, 2, 0], sizes = [1, 1, 32], strides = [1, 1, 1]} : vector<3x3x32xf32> to vector<1x1x32xf32>
    %205 = vector.shape_cast %204 : vector<1x1x32xf32> to vector<32xf32>
    %206 = vector.shape_cast %205 : vector<32xf32> to vector<1x1x32xf32>
    %207 = vector.broadcast %206 : vector<1x1x32xf32> to vector<8x8x32xf32>
    %208 = arith.mulf %203, %207 : vector<8x8x32xf32>
    %209 = arith.addf %202, %208 : vector<8x8x32xf32>
    %210 = vector.extract_strided_slice %167 {offsets = [2, 0, 0], sizes = [8, 8, 32], strides = [1, 1, 1]} : vector<10x10x32xf32> to vector<8x8x32xf32>
    %211 = vector.extract_strided_slice %168 {offsets = [2, 0, 0], sizes = [1, 1, 32], strides = [1, 1, 1]} : vector<3x3x32xf32> to vector<1x1x32xf32>
    %212 = vector.shape_cast %211 : vector<1x1x32xf32> to vector<32xf32>
    %213 = vector.shape_cast %212 : vector<32xf32> to vector<1x1x32xf32>
    %214 = vector.broadcast %213 : vector<1x1x32xf32> to vector<8x8x32xf32>
    %215 = arith.mulf %210, %214 : vector<8x8x32xf32>
    %216 = arith.addf %209, %215 : vector<8x8x32xf32>
    %217 = vector.extract_strided_slice %167 {offsets = [2, 1, 0], sizes = [8, 8, 32], strides = [1, 1, 1]} : vector<10x10x32xf32> to vector<8x8x32xf32>
    %218 = vector.extract_strided_slice %168 {offsets = [2, 1, 0], sizes = [1, 1, 32], strides = [1, 1, 1]} : vector<3x3x32xf32> to vector<1x1x32xf32>
    %219 = vector.shape_cast %218 : vector<1x1x32xf32> to vector<32xf32>
    %220 = vector.shape_cast %219 : vector<32xf32> to vector<1x1x32xf32>
    %221 = vector.broadcast %220 : vector<1x1x32xf32> to vector<8x8x32xf32>
    %222 = arith.mulf %217, %221 : vector<8x8x32xf32>
    %223 = arith.addf %216, %222 : vector<8x8x32xf32>
    %224 = vector.extract_strided_slice %167 {offsets = [2, 2, 0], sizes = [8, 8, 32], strides = [1, 1, 1]} : vector<10x10x32xf32> to vector<8x8x32xf32>
    %225 = vector.extract_strided_slice %168 {offsets = [2, 2, 0], sizes = [1, 1, 32], strides = [1, 1, 1]} : vector<3x3x32xf32> to vector<1x1x32xf32>
    %226 = vector.shape_cast %225 : vector<1x1x32xf32> to vector<32xf32>
    %227 = vector.shape_cast %226 : vector<32xf32> to vector<1x1x32xf32>
    %228 = vector.broadcast %227 : vector<1x1x32xf32> to vector<8x8x32xf32>
    %229 = arith.mulf %224, %228 : vector<8x8x32xf32>
    %230 = arith.addf %223, %229 : vector<8x8x32xf32>
    %c0_83 = arith.constant 0 : index
    %c0_84 = arith.constant 0 : index
    %c0_85 = arith.constant 0 : index
    %231 = vector.load %arg23[%c0_83, %c0_84, %c0_85] : memref<1x1x32xf32, #tpu.memory_space<vmem>>, vector<1x1x32xf32>
    %232 = vector.broadcast %231 : vector<1x1x32xf32> to vector<8x8x32xf32>
    %233 = arith.addf %230, %232 : vector<8x8x32xf32>
    %cst_86 = arith.constant 0.000000e+00 : f32
    %234 = vector.broadcast %cst_86 : f32 to vector<8x8x32xf32>
    %235 = arith.maximumf %233, %234 : vector<8x8x32xf32>
    %c0_87 = arith.constant 0 : index
    %c0_88 = arith.constant 0 : index
    %c0_89 = arith.constant 0 : index
    %c0_90 = arith.constant 0 : index
    %236 = vector.load %arg24[%c0_87, %c0_88, %c0_89, %c0_90] : memref<1x8x8x32xf32, #tpu.memory_space<vmem>>, vector<1x8x8x32xf32>
    %237 = vector.shape_cast %236 : vector<1x8x8x32xf32> to vector<8x8x32xf32>
    %238 = vector.shape_cast %235 : vector<8x8x32xf32> to vector<1x8x8x32xf32>
    tpu.vector_store %arg24[%c0_87, %c0_88, %c0_89, %c0_90], %238 {strides = array<i32>} : memref<1x8x8x32xf32, #tpu.memory_space<vmem>>, vector<1x8x8x32xf32>,
    return
  }
  func.func @transform_0(%arg0: i32) -> (i32, i32, i32) {
    %c0_i32 = arith.constant 0 : i32
    %c0_i32_0 = arith.constant 0 : i32
    %c0_i32_1 = arith.constant 0 : i32
    return %arg0, %c0_i32, %c0_i32_0 : i32, i32, i32
  }
  func.func @transform_1(%arg0: i32) -> (i32, i32, i32) {
    %c0_i32 = arith.constant 0 : i32
    %c0_i32_0 = arith.constant 0 : i32
    %c0_i32_1 = arith.constant 0 : i32
    return %arg0, %c0_i32, %c0_i32_0 : i32, i32, i32
  }
  func.func @transform_2(%arg0: i32) -> (i32, i32) {
    %c0_i32 = arith.constant 0 : i32
    %c0_i32_0 = arith.constant 0 : i32
    %c0_i32_1 = arith.constant 0 : i32
    return %c0_i32, %c0_i32_0 : i32, i32
  }
  func.func @transform_3(%arg0: i32) -> (i32, i32) {
    %c0_i32 = arith.constant 0 : i32
    %c0_i32_0 = arith.constant 0 : i32
    %c0_i32_1 = arith.constant 0 : i32
    return %c0_i32, %c0_i32_0 : i32, i32
  }
  func.func @transform_4(%arg0: i32) -> (i32, i32) {
    %c0_i32 = arith.constant 0 : i32
    %c0_i32_0 = arith.constant 0 : i32
    %c0_i32_1 = arith.constant 0 : i32
    return %c0_i32, %c0_i32_0 : i32, i32
  }
  func.func @transform_5(%arg0: i32) -> (i32, i32) {
    %c0_i32 = arith.constant 0 : i32
    %c0_i32_0 = arith.constant 0 : i32
    %c0_i32_1 = arith.constant 0 : i32
    return %c0_i32, %c0_i32_0 : i32, i32
  }
  func.func @transform_6(%arg0: i32) -> (i32, i32) {
    %c0_i32 = arith.constant 0 : i32
    %c0_i32_0 = arith.constant 0 : i32
    %c0_i32_1 = arith.constant 0 : i32
    return %c0_i32, %c0_i32_0 : i32, i32
  }
  func.func @transform_7(%arg0: i32) -> (i32, i32) {
    %c0_i32 = arith.constant 0 : i32
    %c0_i32_0 = arith.constant 0 : i32
    %c0_i32_1 = arith.constant 0 : i32
    return %c0_i32, %c0_i32_0 : i32, i32
  }
  func.func @transform_8(%arg0: i32) -> (i32, i32) {
    %c0_i32 = arith.constant 0 : i32
    %c0_i32_0 = arith.constant 0 : i32
    %c0_i32_1 = arith.constant 0 : i32
    return %c0_i32, %c0_i32_0 : i32, i32
  }
  func.func @transform_9(%arg0: i32) -> (i32, i32) {
    %c0_i32 = arith.constant 0 : i32
    %c0_i32_0 = arith.constant 0 : i32
    %c0_i32_1 = arith.constant 0 : i32
    return %c0_i32, %c0_i32_0 : i32, i32
  }
  func.func @transform_10(%arg0: i32) -> (i32, i32) {
    %c0_i32 = arith.constant 0 : i32
    %c0_i32_0 = arith.constant 0 : i32
    %c0_i32_1 = arith.constant 0 : i32
    return %c0_i32, %c0_i32_0 : i32, i32
  }
  func.func @transform_11(%arg0: i32) -> (i32, i32) {
    %c0_i32 = arith.constant 0 : i32
    %c0_i32_0 = arith.constant 0 : i32
    %c0_i32_1 = arith.constant 0 : i32
    return %c0_i32, %c0_i32_0 : i32, i32
  }
  func.func @transform_12(%arg0: i32) -> (i32, i32) {
    %c0_i32 = arith.constant 0 : i32
    %c0_i32_0 = arith.constant 0 : i32
    %c0_i32_1 = arith.constant 0 : i32
    return %c0_i32, %c0_i32_0 : i32, i32
  }
  func.func @transform_13(%arg0: i32) -> (i32, i32) {
    %c0_i32 = arith.constant 0 : i32
    %c0_i32_0 = arith.constant 0 : i32
    %c0_i32_1 = arith.constant 0 : i32
    return %c0_i32, %c0_i32_0 : i32, i32
  }
  func.func @transform_14(%arg0: i32) -> (i32, i32) {
    %c0_i32 = arith.constant 0 : i32
    %c0_i32_0 = arith.constant 0 : i32
    %c0_i32_1 = arith.constant 0 : i32
    return %c0_i32, %c0_i32_0 : i32, i32
  }
  func.func @transform_15(%arg0: i32) -> (i32, i32) {
    %c0_i32 = arith.constant 0 : i32
    %c0_i32_0 = arith.constant 0 : i32
    %c0_i32_1 = arith.constant 0 : i32
    return %c0_i32, %c0_i32_0 : i32, i32
  }
  func.func @transform_16(%arg0: i32) -> (i32, i32) {
    %c0_i32 = arith.constant 0 : i32
    %c0_i32_0 = arith.constant 0 : i32
    %c0_i32_1 = arith.constant 0 : i32
    return %c0_i32, %c0_i32_0 : i32, i32
  }
  func.func @transform_17(%arg0: i32) -> (i32, i32) {
    %c0_i32 = arith.constant 0 : i32
    %c0_i32_0 = arith.constant 0 : i32
    %c0_i32_1 = arith.constant 0 : i32
    return %c0_i32, %c0_i32_0 : i32, i32
  }
  func.func @transform_18(%arg0: i32) -> (i32, i32) {
    %c0_i32 = arith.constant 0 : i32
    %c0_i32_0 = arith.constant 0 : i32
    %c0_i32_1 = arith.constant 0 : i32
    return %c0_i32, %c0_i32_0 : i32, i32
  }
  func.func @transform_19(%arg0: i32) -> (i32, i32) {
    %c0_i32 = arith.constant 0 : i32
    %c0_i32_0 = arith.constant 0 : i32
    %c0_i32_1 = arith.constant 0 : i32
    return %c0_i32, %c0_i32_0 : i32, i32
  }
  func.func @transform_20(%arg0: i32) -> (i32, i32) {
    %c0_i32 = arith.constant 0 : i32
    %c0_i32_0 = arith.constant 0 : i32
    %c0_i32_1 = arith.constant 0 : i32
    return %c0_i32, %c0_i32_0 : i32, i32
  }
  func.func @transform_21(%arg0: i32) -> (i32, i32, i32) {
    %c0_i32 = arith.constant 0 : i32
    %c0_i32_0 = arith.constant 0 : i32
    %c0_i32_1 = arith.constant 0 : i32
    %c0_i32_2 = arith.constant 0 : i32
    return %c0_i32, %c0_i32_0, %c0_i32_1 : i32, i32, i32
  }
  func.func @transform_22(%arg0: i32) -> (i32, i32, i32) {
    %c0_i32 = arith.constant 0 : i32
    %c0_i32_0 = arith.constant 0 : i32
    %c0_i32_1 = arith.constant 0 : i32
    %c0_i32_2 = arith.constant 0 : i32
    return %c0_i32, %c0_i32_0, %c0_i32_1 : i32, i32, i32
  }
  func.func @transform_23(%arg0: i32) -> (i32, i32, i32, i32) {
    %c0_i32 = arith.constant 0 : i32
    %c0_i32_0 = arith.constant 0 : i32
    %c0_i32_1 = arith.constant 0 : i32
    %c0_i32_2 = arith.constant 0 : i32
    return %arg0, %c0_i32, %c0_i32_0, %c0_i32_1 : i32, i32, i32, i32
  }
}

</mosaic_0001>

<bundles_post_ra>
// kernel: gpblock_forward.2
= control target key start
LH: loop header
LB: loop body
LE: loop exit
PB: predicated region body
PF: predicated region fallthrough
CT: control target
= control target key end

     0   :  { %s2968_s6 = smov 1   ;;  %s2969_s10 = smov 2   ;;  %s3516_s0 = inlined_call_operand.smem [shape: u32[33], index: -1, kind: input, shape index: {}] }
   0x1   :  { %s3013_s5 = sld [smem:[%s3516_s0]]   ;;  %s2970_s14 = smov 3  }
   0x2   :  { %s3018_s9 = sld [smem:[%s3516_s0 + %s2968_s6]]   ;;  %s2971_s18 = smov 4  }
   0x3   :  { %s3023_s13 = sld [smem:[%s3516_s0 + %s2969_s10]]   ;;  %s2972_s22 = smov 5  }
   0x4   :  { %s3028_s17 = sld [smem:[%s3516_s0 + %s2970_s14]]   ;;  %s2973_s26 = smov 6  }
   0x5   :  { %s3033_s21 = sld [smem:[%s3516_s0 + %s2971_s18]]   ;;  %s2974_s30 = smov 7  }
   0x6   :  { %s3038_s25 = sld [smem:[%s3516_s0 + %s2972_s22]]   ;;  %s2975_s4 = smov 8  }
   0x7   :  { %s3043_s29 = sld [smem:[%s3516_s0 + %s2973_s26]]   ;;  %s2976_s10 = smov 9  }
   0x8   :  { %s3048_s3 = sld [smem:[%s3516_s0 + %s2974_s30]]   ;;  %s2977_s15 = smov 10  }
   0x9   :  { %s3053_s8 = sld [smem:[%s3516_s0 + %s2975_s4]]   ;;  %s2978_s20 = smov 11  }
   0xa   :  { %s3058_s14 = sld [smem:[%s3516_s0 + %s2976_s10]]   ;;  %s2979_s26 = smov 12  }
   0xb   :  { %s3063_s19 = sld [smem:[%s3516_s0 + %s2977_s15]]   ;;  %s2980_s1 = smov 13  }
   0xc   :  { %s3068_s24 = sld [smem:[%s3516_s0 + %s2978_s20]]   ;;  %s2981_s7 = smov 14  }
   0xd   :  { %s3073_s30 = sld [smem:[%s3516_s0 + %s2979_s26]]   ;;  %s2982_s15 = smov 15  }
   0xe   :  { %s3078_s6 = sld [smem:[%s3516_s0 + %s2980_s1]]   ;;  %s2983_s22 = smov 16  }
   0xf   :  { %s3083_s12 = sld [smem:[%s3516_s0 + %s2981_s7]]   ;;  %s2984_s28 = smov 17  }
  0x10   :  { %s3088_s20 = sld [smem:[%s3516_s0 + %s2982_s15]]   ;;  %s2985_s7 = smov 18  }
  0x11   :  { %s3093_s27 = sld [smem:[%s3516_s0 + %s2983_s22]]   ;;  %s2986_s15 = smov 19  }
  0x12   :  { %s3098_s4 = sld [smem:[%s3516_s0 + %s2984_s28]]   ;;  %s2987_s22 = smov 20  }
  0x13   :  { %s2988_s28 = smov 21  }
  0x15   :  { %3522 = sst [smem:[#allocation2_spill]] %s3083_s12 }
  0x16   :  { %3523 = sst [smem:[#allocation3_spill]] %s3088_s20 }
  0x17   :  { %3524 = sst [smem:[#allocation4_spill]] %s3093_s27 }
  0x18   :  { %3525 = sst [smem:[#allocation5_spill]] %s3098_s4 }
  0x19   :  { %s3103_s12 = sld [smem:[%s3516_s0 + %s2985_s7]]   ;;  %s2989_s7 = smov 22  }
  0x1a   :  { %s3108_s20 = sld [smem:[%s3516_s0 + %s2986_s15]]   ;;  %s2990_s15 = smov 23  }
  0x1b   :  { %s3113_s27 = sld [smem:[%s3516_s0 + %s2987_s22]]   ;;  %s2991_s22 = smov 24  }
  0x1c   :  { %s3118_s4 = sld [smem:[%s3516_s0 + %s2988_s28]]   ;;  %s2992_s28 = smov 25  }
  0x1f   :  { %3526 = sst [smem:[#allocation6_spill]] %s3103_s12 }
  0x20   :  { %3527 = sst [smem:[#allocation7_spill]] %s3108_s20 }
  0x21   :  { %3528 = sst [smem:[#allocation8_spill]] %s3113_s27 }
  0x22   :  { %3529 = sst [smem:[#allocation9_spill]] %s3118_s4 }
  0x23   :  { %s3123_s12 = sld [smem:[%s3516_s0 + %s2989_s7]]   ;;  %s2993_s7 = smov 26  }
  0x24   :  { %s3128_s20 = sld [smem:[%s3516_s0 + %s2990_s15]]   ;;  %s2994_s15 = smov 27  }
  0x25   :  { %s3133_s27 = sld [smem:[%s3516_s0 + %s2991_s22]]   ;;  %s2995_s22 = smov 28  }
  0x26   :  { %s3138_s4 = sld [smem:[%s3516_s0 + %s2992_s28]]   ;;  %s2996_s28 = smov 29  }
  0x29   :  { %3530 = sst [smem:[#allocation10_spill]] %s3123_s12 }
  0x2a   :  { %3531 = sst [smem:[#allocation11_spill]] %s3128_s20 }
  0x2b   :  { %3532 = sst [smem:[#allocation12_spill]] %s3133_s27 }
  0x2c   :  { %3533 = sst [smem:[#allocation13_spill]] %s3138_s4 }
  0x2d   :  { %s3143_s12 = sld [smem:[%s3516_s0 + %s2993_s7]]   ;;  %s2997_s7 = smov 30  }
  0x2e   :  { %s3148_s20 = sld [smem:[%s3516_s0 + %s2994_s15]]   ;;  %s2998_s15 = smov 31  }
  0x2f   :  { %s3153_s27 = sld [smem:[%s3516_s0 + %s2995_s22]]   ;;  %s2999_s22 = smov 32  }
  0x30   :  { %s3158_s4 = sld [smem:[%s3516_s0 + %s2996_s28]]   ;;  %s3175_s28 = smov 0  }
  0x33   :  { %3534 = sst [smem:[#allocation14_spill]] %s3143_s12 }
  0x34   :  { %3535 = sst [smem:[#allocation15_spill]] %s3148_s20 }
  0x35   :  { %3536 = sst [smem:[#allocation16_spill]] %s3153_s27 }
  0x36   :  { %s3163_s12 = sld [smem:[%s3516_s0 + %s2997_s7]]  }
  0x37   :  { %s3168_s20 = sld [smem:[%s3516_s0 + %s2998_s15]]  }
  0x38   :  { %s3173_s27 = sld [smem:[%s3516_s0 + %s2999_s22]]  }
  0x39 LB: > { %s2551_s1 = sadd.s32 4294967295, %s2966_s28   ;;  %p2555_p0 = scmp.ge.s32.totalorder %s2966_s28, 1  ;;  %s2966_s28 = sphi %s3175_s28, %s75_s28  }
  0x3a   : > { %p895_p1 = scmp.lt.s32.totalorder %s2966_s28, 3 }
  0x3c   : > { %p896_p2 = pnand %p2555_p0, %p895_p1 }
  0x3d   : > { %p977_p3 = scmp.lt.s32.totalorder (!%p896_p2), %s2551_s1, 1  ;;  %vm1000_vm0 = vcmask (!%p896_p2), 261120   ;;  %v988_v54 = vld [vmem:[%s3013_s5] sm:$0xff] (!%p896_p2)  ;;  %v3238_v58 = vld [vmem:[%s3013_s5 + $0x8] sm:$0xff] (!%p896_p2)  ;;  %v3000_v62 = vmov (!%p896_p2), 0.0   ;;  %vm3001_vm1 = vmmov (!%p896_p2), 0  }
  0x3e   : > { %899 = sbr.rel (%p896_p2) target bundleno = 5200 (0x1450), region = 148  ;;  %v1001_v57 = vsel (!%p896_p2), %vm1000_vm0, %v988_v54, 0.0  ;;  %v1004_v59 = vsel (!%p896_p2), %vm1000_vm0, %v3238_v58, 0.0  ;;  %v2866_v60 = vld [vmem:[%s3043_s29] sm:$0xff] (!%p896_p2)   ;;  %v2867_v61 = vld [vmem:[%s3043_s29 + $0x8] sm:$0xff] (!%p896_p2)   ;;  %2691 = vmatprep.subr.bf16.mxu1 (!%p896_p2), %v3000_v62  ;;  %2699 = vmatprep.mubr.msk.bf16.mxu1 (!%p896_p2), %vm3001_vm1, %v3000_v62  ;;  %vm1287_vm2 = vcmask (!%p896_p2), 130048  }
  0x3f   : > { %2679 = vmatprep.subr.bf16.mxu0 (!%p896_p2), %v2866_v60  ;;  %vm1346_vm3 = vcmask (!%p896_p2), 523264   ;;  %s3002_s7 = smov (!%p896_p2), 112   ;;  %s3003_s10 = smov (!%p896_p2), 16  }
  0x40   : > { %2680 = vmatpush3.bf16.msra.mxu0 (!%p896_p2), %v2866_v60  ;;  %s3537_s11 = sld [smem:[#allocation4_spill]] (!%p896_p2)  ;;  %s3538_s15 = sld [smem:[#allocation2_spill]] (!%p896_p2) }
  0x41   : > { %2681 = vmatprep.subr.bf16.mxu0 (!%p896_p2), %v2867_v61  ;;  %s3539_s16 = sld [smem:[#allocation3_spill]] (!%p896_p2)  ;;  %s3540_s18 = sld [smem:[#allocation6_spill]] (!%p896_p2) }
  0x42   : > { %s3541_s22 = sld [smem:[#allocation5_spill]] (!%p896_p2)  ;;  %s3542_s23 = sld [smem:[#allocation7_spill]] (!%p896_p2) }
  0x43   : > { %s3543_s26 = sld [smem:[#allocation11_spill]] (!%p896_p2) }
  0x44   : > { %2682 = vmatpush3.bf16.msra.mxu0 (!%p896_p2), %v2867_v61 }
  0x45   : > { %s3553_s1 = smov (!%p977_p3, %s2551_s1), 1  ;;  %2703 = vmatprep.subr.bf16.mxu0 %v3000_v62 }
  0x46   : > { %s2619_s0 = sshll.u32 %s3553_s1, 6 }
  0x47   : > { %s981_s2 = scalar_lea.vmem %s3018_s9, %s2619_s0  ;;  %s3544_s0 = sld [smem:[#allocation13_spill]] }
  0x48   : > { %v990_v0 = vld [vmem:[%s981_s2] sm:$0xff]  ;;  %v992_v1 = vld [vmem:[%s981_s2 + $0x10] sm:$0xff]  ;;  %v991_v2 = vld [vmem:[%s981_s2 + $0x8] sm:$0xff] }
  0x49   : > { %v1047_v3 = vsel %vm1000_vm0, %v990_v0, 0.0  ;;  %v1053_v4 = vsel %vm1000_vm0, %v992_v1, 0.0  ;;  %v993_v5 = vld [vmem:[%s981_s2 + $0x18] sm:$0xff]  ;;  %v994_v6 = vld [vmem:[%s981_s2 + $0x20] sm:$0xff]  ;;  %v995_v7 = vld [vmem:[%s981_s2 + $0x28] sm:$0xff]  ;;  %v1050_v8 = vsel %vm1000_vm0, %v991_v2, 0.0 }
  0x4a   : > { %1048 = vadd.xlane.f32.xlu0 %v1047_v3  ;;  %1054 = vadd.xlane.f32.xlu1 %v1053_v4  ;;  %v1056_v9 = vsel %vm1000_vm0, %v993_v5, 0.0  ;;  %v1059_v10 = vsel %vm1000_vm0, %v994_v6, 0.0  ;;  %v1062_v11 = vsel %vm1000_vm0, %v995_v7, 0.0  ;;  %v996_v12 = vld [vmem:[%s981_s2 + $0x30] sm:$0xff]  ;;  %v997_v13 = vld [vmem:[%s981_s2 + $0x38] sm:$0xff]  ;;  %s3545_s2 = sld [smem:[#allocation8_spill]] }
  0x4b   : > { %v1065_v14 = vsel %vm1000_vm0, %v996_v12, 0.0  ;;  %v1068_v15 = vsel %vm1000_vm0, %v997_v13, 0.0 }
  0x4e   : > { %1051 = vadd.xlane.f32.xlu0 %v1050_v8  ;;  %1057 = vadd.xlane.f32.xlu1 %v1056_v9 }
  0x52   : > { %1060 = vadd.xlane.f32.xlu0 %v1059_v10  ;;  %1063 = vadd.xlane.f32.xlu1 %v1062_v11 }
  0x56   : > { %1066 = vadd.xlane.f32.xlu0 %v1065_v14  ;;  %1069 = vadd.xlane.f32.xlu1 %v1068_v15 }
  0xd7   : > { %v1049_v16 = vpop.xlane.xlu0 %1048  ;;  %v1055_v17 = vpop.xlane.xlu1 %1054 }
  0xd8   : > { %v1071_v18 = vmul.f32 0.03125, %v1049_v16  ;;  %v1073_v19 = vmul.f32 0.03125, %v1055_v17 }
  0xda   : > { %v3195_v20 = vsub.f32 %v990_v0, %v1071_v18  ;;  %v3197_v21 = vsub.f32 %v992_v1, %v1073_v19 }
  0xdb   : > { %v1052_v22 = vpop.xlane.xlu0 %1051  ;;  %v1058_v23 = vpop.xlane.xlu1 %1057 }
  0xdc   : > { %v1072_v24 = vmul.f32 0.03125, %v1052_v22  ;;  %v1074_v25 = vmul.f32 0.03125, %v1058_v23  ;;  %v1087_v26 = vmul.f32 %v3195_v20, %v3195_v20  ;;  %v1089_v27 = vmul.f32 %v3197_v21, %v3197_v21 }
  0xde   : > { %v3203_v28 = vsub.f32 %v991_v2, %v1072_v24  ;;  %v3205_v29 = vsub.f32 %v993_v5, %v1074_v25  ;;  %v1095_v30 = vsel %vm1000_vm0, %v1087_v26, 0.0  ;;  %v1101_v33 = vsel %vm1000_vm0, %v1089_v27, 0.0 }
  0xdf   : > { %1096 = vadd.xlane.f32.xlu0 %v1095_v30  ;;  %v1061_v31 = vpop.xlane.xlu0 %1060  ;;  %v1064_v32 = vpop.xlane.xlu1 %1063  ;;  %v2562_v30 = vld [vmem:[%s3033_s21] ss:$0 sm:$0xff] }
  0xe0   : > { %v1075_v34 = vmul.f32 0.03125, %v1061_v31  ;;  %v1076_v35 = vmul.f32 0.03125, %v1064_v32  ;;  %v1088_v36 = vmul.f32 %v3203_v28, %v3203_v28  ;;  %v1090_v37 = vmul.f32 %v3205_v29, %v3205_v29 }
  0xe2   : > { %v3213_v38 = vsub.f32 %v994_v6, %v1075_v34  ;;  %v3215_v39 = vsub.f32 %v995_v7, %v1076_v35  ;;  %v1098_v40 = vsel %vm1000_vm0, %v1088_v36, 0.0  ;;  %v1104_v43 = vsel %vm1000_vm0, %v1090_v37, 0.0 }
  0xe3   : > { %1102 = vadd.xlane.f32.xlu0 %v1101_v33  ;;  %1099 = vadd.xlane.f32.xlu1 %v1098_v40  ;;  %v1067_v41 = vpop.xlane.xlu0 %1066  ;;  %v1070_v42 = vpop.xlane.xlu1 %1069 }
  0xe4   : > { %v1077_v44 = vmul.f32 0.03125, %v1067_v41  ;;  %v1078_v45 = vmul.f32 0.03125, %v1070_v42  ;;  %v1091_v46 = vmul.f32 %v3213_v38, %v3213_v38  ;;  %v1092_v47 = vmul.f32 %v3215_v39, %v3215_v39  ;;  %v2563_v42 = vld [vmem:[%s3038_s25] ss:$0 sm:$0xff] }
  0xe6   : > { %v3223_v48 = vsub.f32 %v996_v12, %v1077_v44  ;;  %v3225_v49 = vsub.f32 %v997_v13, %v1078_v45  ;;  %v1107_v50 = vsel %vm1000_vm0, %v1091_v46, 0.0  ;;  %v1110_v51 = vsel %vm1000_vm0, %v1092_v47, 0.0 }
  0xe7   : > { %1105 = vadd.xlane.f32.xlu1 %v1104_v43  ;;  %1108 = vadd.xlane.f32.xlu0 %v1107_v50 }
  0xe8   : > { %v1093_v52 = vmul.f32 %v3223_v48, %v3223_v48  ;;  %v1094_v53 = vmul.f32 %v3225_v49, %v3225_v49 }
  0xea   : > { %v1113_v55 = vsel %vm1000_vm0, %v1093_v52, 0.0  ;;  %v1116_v56 = vsel %vm1000_vm0, %v1094_v53, 0.0 }
  0xeb   : > { %1111 = vadd.xlane.f32.xlu1 %v1110_v51  ;;  %1114 = vadd.xlane.f32.xlu0 %v1113_v55 }
  0xef   : > { %1117 = vadd.xlane.f32.xlu1 %v1116_v56  ;;  %1002 = vadd.xlane.f32.xlu0 %v1001_v57 }
  0xf3   : > { %1005 = vadd.xlane.f32.xlu1 %v1004_v59 }
 0x16c   : > { %v1097_v63 = vpop.xlane.xlu0 %1096 }
 0x16d   : > { %v1119_v0 = vmul.f32 0.03125, %v1097_v63 }
 0x16f   : > { %v1127_v1 = vadd.f32 1e-05, %v1119_v0 }
 0x170   : > { %v1100_v2 = vpop.xlane.xlu1 %1099  ;;  %v1103_v3 = vpop.xlane.xlu0 %1102 }
 0x171   : > { %2892 = vrsqrt.f32 %v1127_v1  ;;  %v1120_v4 = vmul.f32 0.03125, %v1100_v2  ;;  %v1121_v5 = vmul.f32 0.03125, %v1103_v3 }
 0x173   : > { %v1128_v6 = vadd.f32 1e-05, %v1120_v4  ;;  %v1129_v7 = vadd.f32 1e-05, %v1121_v5 }
 0x174   : > { %v1106_v8 = vpop.xlane.xlu1 %1105  ;;  %v1109_v9 = vpop.xlane.xlu0 %1108 }
 0x175   : > { %2894 = vrsqrt.f32 %v1128_v6  ;;  %v1122_v10 = vmul.f32 0.03125, %v1106_v8  ;;  %v1123_v11 = vmul.f32 0.03125, %v1109_v9  ;;  %v2564_v9 = vld [vmem:[%s3048_s3] ss:$0 sm:$0xff] }
 0x176   : > { %2896 = vrsqrt.f32 %v1129_v7 }
 0x177   : > { %v1130_v12 = vadd.f32 1e-05, %v1122_v10  ;;  %v1131_v13 = vadd.f32 1e-05, %v1123_v11 }
 0x178   : > { %v1112_v14 = vpop.xlane.xlu1 %1111  ;;  %v1115_v15 = vpop.xlane.xlu0 %1114 }
 0x179   : > { %2898 = vrsqrt.f32 %v1130_v12  ;;  %v1124_v16 = vmul.f32 0.03125, %v1112_v14  ;;  %v1125_v17 = vmul.f32 0.03125, %v1115_v15 }
 0x17a   : > { %2900 = vrsqrt.f32 %v1131_v13 }
 0x17b   : > { %v2893_v18 = vpop.eup %2892  ;;  %v1132_v19 = vadd.f32 1e-05, %v1124_v16  ;;  %v1133_v22 = vadd.f32 1e-05, %v1125_v17 }
 0x17c   : > { %v1118_v23 = vpop.xlane.xlu1 %1117  ;;  %v1003_v24 = vpop.xlane.xlu0 %1002  ;;  %v1143_v25 = vmul.f32 %v2893_v18, %v3195_v20 }
 0x17d   : > { %2902 = vrsqrt.f32 %v1132_v19  ;;  %v1126_v26 = vmul.f32 0.03125, %v1118_v23  ;;  %v1008_v27 = vmul.f32 0.03125, %v1003_v24 }
 0x17e   : > { %2904 = vrsqrt.f32 %v1133_v22  ;;  %v1157_v37 = vmul.f32 %v2562_v30, %v1143_v25 }
 0x17f   : > { %v2895_v31 = vpop.eup %2894  ;;  %v1134_v32 = vadd.f32 1e-05, %v1126_v26  ;;  %v3248_v33 = vsub.f32 %v988_v54, %v1008_v27 }
 0x180   : > { %v2897_v34 = vpop.eup %2896  ;;  %v1006_v35 = vpop.xlane.xlu1 %1005  ;;  %v1144_v36 = vmul.f32 %v2895_v31, %v3203_v28  ;;  %v1171_v51 = vadd.f32 %v2563_v42, %v1157_v37 }
 0x181   : > { %v1145_v40 = vmul.f32 %v2897_v34, %v3197_v21  ;;  %2906 = vrsqrt.f32 %v1134_v32  ;;  %v1009_v41 = vmul.f32 0.03125, %v1006_v35  ;;  %v1012_v20 = vmul.f32 %v3248_v33, %v3248_v33 }
 0x182   : > { %v1158_v43 = vmul.f32 %v2562_v30, %v1144_v36 }
 0x183   : > { %v2899_v44 = vpop.eup %2898  ;;  %v3256_v45 = vsub.f32 %v3238_v58, %v1009_v41  ;;  %v1014_v46 = vsel %vm1000_vm0, %v1012_v20, 0.0  ;;  %v1159_v47 = vmul.f32 %v2562_v30, %v1145_v40 }
 0x184   : > { %v2901_v50 = vpop.eup %2900  ;;  %v1146_v28 = vmul.f32 %v2899_v44, %v3205_v29  ;;  %1015 = vadd.xlane.f32.xlu0 %v1014_v46  ;;  %v1172_v21 = vadd.f32 %v2563_v42, %v1158_v43 }
 0x185   : > { %v1147_v52 = vmul.f32 %v2901_v50, %v3213_v38  ;;  %v1013_v53 = vmul.f32 %v3256_v45, %v3256_v45  ;;  %v1173_v58 = vadd.f32 %v2563_v42, %v1159_v47 }
 0x186   : > { %v3263_v54 = vpack.c.bf16 %v1172_v21, %v1171_v51  ;;  %v1160_v55 = vmul.f32 %v2562_v30, %v1146_v28  ;;  %v2560_v28 = vld [vmem:[%s3023_s13] ss:$0 sm:$0xff] }
 0x187   : > { %v2903_v56 = vpop.eup %2902  ;;  %v1017_v57 = vsel %vm1000_vm0, %v1013_v53, 0.0  ;;  %v1161_v61 = vmul.f32 %v2562_v30, %v1147_v52  ;;  %v2561_v53 = vld [vmem:[%s3028_s17] ss:$0 sm:$0xff] }
 0x188   : > { %v2905_v59 = vpop.eup %2904  ;;  %v1148_v60 = vmul.f32 %v2903_v56, %v3215_v39  ;;  %1018 = vadd.xlane.f32.xlu1 %v1017_v57  ;;  %2683 = vmatprep.mubr.msk.bf16.mxu0 %vm1000_vm0, %v3263_v54  ;;  %v1174_v29 = vadd.f32 %v2563_v42, %v1160_v55 }
 0x189   : > { %v1149_v38 = vmul.f32 %v2905_v59, %v3223_v48  ;;  %v1175_v3 = vadd.f32 %v2563_v42, %v1161_v61 }
 0x18a   : > { %v3270_v63 = vpack.c.bf16 %v1174_v29, %v1173_v58  ;;  %v1162_v0 = vmul.f32 %v2562_v30, %v1148_v60 }
 0x18b   : > { %v2907_v1 = vpop.eup %2906  ;;  %v1163_v39 = vmul.f32 %v2562_v30, %v1149_v38 }
 0x18c   : > { %v1150_v2 = vmul.f32 %v2907_v1, %v3225_v49  ;;  %2684 = vmatmul.mubr.msk.bf16.vlgmr.msra.gmra.mrb[0].mxu0 %vm1000_vm0, %v3270_v63  ;;  %v1176_v4 = vadd.f32 %v2563_v42, %v1162_v0 }
 0x18d   : > { %2704 = vmatpush3.bf16.msra.mxu0 %v3263_v54  ;;  %v1177_v48 = vadd.f32 %v2563_v42, %v1163_v39 }
 0x18e   : > { %2705 = vmatprep.subr.bf16.mxu0 %v3000_v62  ;;  %v3277_v5 = vpack.c.bf16 %v1176_v4, %v1175_v3  ;;  %v1164_v6 = vmul.f32 %v2562_v30, %v1150_v2 }
 0x190   : > { %2687 = vmatprep.mubr.msk.bf16.mxu0 %vm1000_vm0, %v3277_v5  ;;  %v1178_v7 = vadd.f32 %v2563_v42, %v1164_v6 }
 0x191   : > { %2706 = vmatpush3.bf16.msra.mxu0 %v3270_v63 }
 0x192   : > { %2707 = vmatprep.subr.bf16.mxu0 %v3000_v62  ;;  %v3283_v49 = vpack.c.bf16 %v1178_v7, %v1177_v48 }
 0x194   : > { %2688 = vmatmul.mubr.msk.bf16.gmra.mrb[4].mxu0 %vm1000_vm0, %v3283_v49 }
 0x195   : > { %2708 = vmatpush3.bf16.msra.mxu0 %v3277_v5  ;;  %2711 = vmatprep.mubr.msk.bf16.mxu0 %vm3001_vm1, %v3000_v62 }
 0x196   : > { %2709 = vmatprep.subr.bf16.mxu0 %v3000_v62 }
 0x199   : > { %2710 = vmatpush3.bf16.msra.mxu0 %v3283_v49 }
 0x19a   : > { %2715 = vmatprep.subr.bf16.mxu0 %v3000_v62 }
 0x211   : > { %v1016_v16 = vpop.xlane.xlu0 %1015 }
 0x212   : > { %v1020_v24 = vmul.f32 0.03125, %v1016_v16 }
 0x214   : > { %v1022_v32 = vadd.f32 1e-05, %v1020_v24 }
 0x215   : > { %v1019_v11 = vpop.xlane.xlu1 %1018 }
 0x216   : > { %v1021_v19 = vmul.f32 0.03125, %v1019_v11 }
 0x218   : > { %v1023_v27 = vadd.f32 1e-05, %v1021_v19 }
 0x21a   : > { %2908 = vrsqrt.f32 %v1023_v27 }
 0x21b   : > { %2910 = vrsqrt.f32 %v1022_v32 }
 0x224   : > { %v2909_v43 = vpop.eup %2908 }
 0x225   : > { %v2911_v46 = vpop.eup %2910  ;;  %v1027_v47 = vmul.f32 %v2909_v43, %v3256_v45 }
 0x226   : > { %v1026_v50 = vmul.f32 %v2911_v46, %v3248_v33 }
 0x227   : > { %v1035_v51 = vmul.f32 %v2560_v28, %v1027_v47 }
 0x228   : > { %v1034_v52 = vmul.f32 %v2560_v28, %v1026_v50 }
 0x229   : > { %v1043_v55 = vadd.f32 %v2561_v53, %v1035_v51 }
 0x22a   : > { %v1042_v56 = vadd.f32 %v2561_v53, %v1034_v52 }
 0x22c   : > { %v1044_v57 = vpack.c.bf16 %v1043_v55, %v1042_v56 }
 0x25f   : > { %v2685_v8 = vpop.f32.mrb[0].mxu0 }
 0x260   : > { %v1252_v10 = vpop.f32.mrb[1].mxu0  ;;  %v1261_v13 = vadd.f32 %v2685_v8, %v2564_v9 }
 0x261   : > { %v2686_v12 = vpop.f32.mrb[2].mxu0  ;;  %v1253_v17 = vadd.f32 %v2564_v9, %v1252_v10 }
 0x262   : > { %v1264_v14 = vadd.f32 %v2686_v12, %v2564_v9  ;;  %v1255_v15 = vpop.f32.mrb[3].mxu0 }
 0x263   : > { %v1256_v18 = vadd.f32 %v2564_v9, %v1255_v15 }
 0x264   : > { %v3296_v22 = vpack.c.bf16 %v1264_v14, %v1261_v13 }
 0x265   : > { %v3298_v23 = vpack.c.bf16 %v1256_v18, %v1253_v17 }
 0x266   : > { %v1295_v42 = vsel %vm1287_vm2, %v3296_v22, 0 }
 0x267   : > { %v2689_v25 = vpop.f32.mrb[4].mxu0  ;;  %v1292_v26 = vsel %vm1287_vm2, %v3298_v23, 0 }
 0x268   : > { %v1268_v30 = vpop.f32.mrb[5].mxu0  ;;  %2692 = vmatpush3.bf16.xpose.msra.mxu1 %v1292_v26  ;;  %v1277_v34 = vadd.f32 %v2689_v25, %v2564_v9 }
 0x269   : > { %v2690_v31 = vpop.f32.mrb[6].mxu0  ;;  %2693 = vmatprep.subr.bf16.mxu1 %v3000_v62  ;;  %v1269_v37 = vadd.f32 %v2564_v9, %v1268_v30 }
 0x26a   : > { %v1280_v35 = vadd.f32 %v2690_v31, %v2564_v9  ;;  %v1271_v36 = vpop.f32.mrb[7].mxu0 }
 0x26b   : > { %v1272_v40 = vadd.f32 %v2564_v9, %v1271_v36 }
 0x26c   : > { %v1286_v41 = vpack.c.bf16 %v1280_v35, %v1277_v34 }
 0x26d   : > { %v1285_v20 = vpack.c.bf16 %v1272_v40, %v1269_v37 }
 0x26e   : > { %v1301_v21 = vsel %vm1287_vm2, %v1286_v41, 0 }
 0x26f   : > { %v1298_v44 = vsel %vm1287_vm2, %v1285_v20, 0 }
 0x270   : > { %2694 = vmatpush3.bf16.xpose.msra.mxu1 %v1295_v42 }
 0x271   : > { %2695 = vmatprep.subr.bf16.mxu1 %v3000_v62 }
 0x278   : > { %2696 = vmatpush3.bf16.xpose.msra.mxu1 %v1298_v44 }
 0x279   : > { %2697 = vmatprep.subr.bf16.mxu1 %v3000_v62 }
 0x280   : > { %2698 = vmatpush3.bf16.xpose.msra.mxu1 %v1301_v21 }
 0x281   : > { %2739 = vmatprep.subr.bf16.mxu1 %v3000_v62 }
 0x287   : > { %2700 = vmatmul.mubr.msk.bf16.vlgmr.msra.gmra.mrb[0].mxu1 %vm1287_vm2, %v1044_v57 }
 0x288   : > { %2741 = vmatprep.mubr.msk.bf16.mxu1 %vm3001_vm1, %v3000_v62 }
 0x35a   : > { %v1337_v45 = vpop.f32.mrb[0].mxu1 }
 0x35b   : > { %v1344_v33 = vmul.f32 0.25, %v1337_v45  ;;  %v2701_v58 = vpop.f32.mrb[1].mxu1 }
 0x35c   : > { %v1340_v59 = vpop.f32.mrb[2].mxu1 }
 0x35d   : > { %v1345_v60 = vmul.f32 0.25, %v1340_v59  ;;  %v2702_v29 = vpop.f32.mrb[3].mxu1  ;;  %v1347_v61 = vsel %vm1346_vm3, %v1344_v33, -inf }
 0x35e   : > { %1348 = vmax.xlane.f32.xlu0 %v1347_v61 }
 0x35f   : > { %v1350_v38 = vsel %vm1346_vm3, %v1345_v60, -inf }
 0x360   : > { %1351 = vmax.xlane.f32.xlu1 %v1350_v38 }
 0x3eb   : > { %v1349_v0 = vpop.xlane.xlu0 %1348 }
 0x3ec   : > { %v1353_v1 = vsub.f32 %v1344_v33, %v1349_v0 }
 0x3ed   : > { %v1352_v2 = vpop.xlane.xlu1 %1351 }
 0x3ee   : > { %v1355_v3 = vmul.f32 1.442695, %v1353_v1  ;;  %v1354_v4 = vsub.f32 %v1345_v60, %v1352_v2 }
 0x3f0   : > { %2912 = vpow2.f32 %v1355_v3  ;;  %v1357_v39 = vmul.f32 1.442695, %v1354_v4 }
 0x3f2   : > { %2914 = vpow2.f32 %v1357_v39 }
 0x3fa   : > { %v2913_v6 = vpop.eup %2912 }
 0x3fb   : > { %v1359_v48 = vsel %vm1346_vm3, %v2913_v6, 0.0 }
 0x3fc   : > { %v2915_v7 = vpop.eup %2914  ;;  %1360 = vadd.xlane.f32.xlu0 %v1359_v48 }
 0x3fd   : > { %v1362_v8 = vsel %vm1346_vm3, %v2915_v7, 0.0 }
 0x3fe   : > { %1363 = vadd.xlane.f32.xlu1 %v1362_v8 }
 0x40f   : > { %1423 = vrot.lane.b32.xlu1 %v3296_v22, %s3002_s7 }
 0x412   : > { %1421 = vrot.lane.b32.xlu0 %v3298_v23, %s3002_s7 }
 0x413   : > { %1425 = vrot.lane.b32.xlu1 %v1285_v20, %s3002_s7 }
 0x416   : > { %1415 = vrot.lane.b32.xlu0 %v1044_v57, %s3002_s7 }
 0x417   : > { %1427 = vrot.lane.b32.xlu1 %v1286_v41, %s3002_s7 }
 0x489   : > { %v1361_v9 = vpop.xlane.xlu0 %1360 }
 0x48a   : > { %2916 = vrcp.f32 %v1361_v9 }
 0x48b   : > { %v1364_v10 = vpop.xlane.xlu1 %1363 }
 0x48c   : > { %2918 = vrcp.f32 %v1364_v10 }
 0x48d   : > { %v1422_v15 = vpop.permute.xlu0 %1421 }
 0x48e   : > { %v1433_v17 = vsel %vm1287_vm2, %v1422_v15, 0  ;;  %v1627_v15 = vld [vmem:[%s3068_s24] sm:$0xff] }
 0x48f   : > { %v1424_v18 = vpop.permute.xlu1 %1423 }
 0x490   : > { %v1436_v19 = vsel %vm1287_vm2, %v1424_v18, 0  ;;  %v1760_v18 = vld [vmem:[%s3078_s6] sm:$0xff] }
 0x491   : > { %v1416_v26 = vpop.permute.xlu0 %1415 }
 0x493   : > { %v1426_v22 = vpop.permute.xlu1 %1425 }
 0x494   : > { %v2917_v11 = vpop.eup %2916  ;;  %v1439_v23 = vsel %vm1287_vm2, %v1426_v22, 0 }
 0x495   : > { %v1367_v13 = vmul.f32 %v2917_v11, %v2913_v6 }
 0x496   : > { %v2919_v12 = vpop.eup %2918 }
 0x497   : > { %v1368_v14 = vmul.f32 %v2919_v12, %v2915_v7  ;;  %v1428_v24 = vpop.permute.xlu1 %1427 }
 0x498   : > { %v1442_v25 = vsel %vm1287_vm2, %v1428_v24, 0 }
 0x499   : > { %v1369_v16 = vpack.c.bf16 %v1368_v14, %v1367_v13 }
 0x49b   : > { %2712 = vmatmul.mubr.msk.bf16.vlgmr.msra.gmra.mrb[8].mxu0 %vm1346_vm3, %v1369_v16  ;;  %v3004_v16 = vmov 0  }
 0x49c   : > { %2716 = vmatpush3.bf16.xpose.msra.mxu0 %v1433_v17  ;;  %2723 = vmatprep.mubr.msk.bf16.mxu0 %vm3001_vm1, %v3000_v62  ;;  %v1628_v17 = vld [vmem:[%s3068_s24 + $0x8] sm:$0xff] }
 0x49d   : > { %2717 = vmatprep.subr.bf16.mxu0 %v3000_v62  ;;  %2864 = vset.pattern.permute.xlu1 %v3004_v16 }
 0x49e   : > { %2865 = vset.pattern.permute.xlu0 %v3004_v16 }
 0x4a4   : > { %2718 = vmatpush3.bf16.xpose.msra.mxu0 %v1436_v19  ;;  %v1761_v19 = vld [vmem:[%s3078_s6 + $0x8] sm:$0xff] }
 0x4a5   : > { %2719 = vmatprep.subr.bf16.mxu0 %v3000_v62 }
 0x4ac   : > { %2720 = vmatpush3.bf16.xpose.msra.mxu0 %v1439_v23 }
 0x4ad   : > { %2721 = vmatprep.subr.bf16.mxu0 %v3000_v62 }
 0x4b4   : > { %2722 = vmatpush3.bf16.xpose.msra.mxu0 %v1442_v25 }
 0x4b5   : > { %2727 = vmatprep.subr.bf16.mxu0 %v3000_v62 }
 0x4bb   : > { %2724 = vmatmul.mubr.msk.bf16.vlgmr.msra.gmra.mrb[12].mxu0 %vm1287_vm2, %v1416_v26 }
 0x4bc   : > { %2735 = vmatprep.mubr.msk.bf16.mxu0 %vm3001_vm1, %v3000_v62 }
 0x56e   : > { %v3342_v27 = vpop.f32.mrb[8].mxu0 }
 0x56f   : > { %v2713_v30 = vpop.f32.mrb[9].mxu0 }
 0x570   : > { %v3344_v31 = vpop.f32.mrb[10].mxu0 }
 0x571   : > { %v2714_v32 = vpop.f32.mrb[11].mxu0 }
 0x572   : > { %v2575_v32 = vld [vmem:[%s3053_s8] ss:$0 sm:$0xff] }
 0x58e   : > { %v1478_v34 = vpop.f32.mrb[12].mxu0 }
 0x58f   : > { %v1485_v35 = vmul.f32 0.25, %v1478_v34  ;;  %v2725_v36 = vpop.f32.mrb[13].mxu0 }
 0x590   : > { %v1481_v37 = vpop.f32.mrb[14].mxu0 }
 0x591   : > { %v1486_v40 = vmul.f32 0.25, %v1481_v37  ;;  %v2726_v41 = vpop.f32.mrb[15].mxu0  ;;  %v1487_v20 = vsel %vm1346_vm3, %v1485_v35, -inf  ;;  %v2576_v37 = vld [vmem:[%s3058_s14] ss:$0 sm:$0xff] }
 0x592   : > { %1488 = vmax.xlane.f32.xlu1 %v1487_v20 }
 0x593   : > { %v1490_v42 = vsel %vm1346_vm3, %v1486_v40, -inf }
 0x594   : > { %1491 = vmax.xlane.f32.xlu0 %v1490_v42 }
 0x5a3   : > { %1514 = vrot.lane.b32.xlu1 %v3263_v54, %s3002_s7 }
 0x5a7   : > { %1518 = vrot.lane.b32.xlu1 %v3277_v5, %s3002_s7 }
 0x5ab   : > { %1520 = vrot.lane.b32.xlu1 %v3283_v49, %s3002_s7 }
 0x61f   : > { %v1489_v43 = vpop.xlane.xlu1 %1488 }
 0x620   : > { %v1493_v44 = vsub.f32 %v1485_v35, %v1489_v43  ;;  %v2868_v43 = vld [vmem:[%s3063_s19] sm:$0xff]  }
 0x621   : > { %v1492_v46 = vpop.xlane.xlu0 %1491 }
 0x622   : > { %v1495_v47 = vmul.f32 1.442695, %v1493_v44  ;;  %v1494_v50 = vsub.f32 %v1486_v40, %v1492_v46 }
 0x623   : > { %v1515_v28 = vpop.permute.xlu1 %1514 }
 0x624   : > { %2920 = vpow2.f32 %v1495_v47  ;;  %v1497_v51 = vmul.f32 1.442695, %v1494_v50  ;;  %2728 = vmatpush3.bf16.msra.mxu0 %v1515_v28 }
 0x625   : > { %2729 = vmatprep.subr.bf16.mxu0 %v3000_v62 }
 0x626   : > { %2922 = vpow2.f32 %v1497_v51 }
 0x627   : > { %v1519_v56 = vpop.permute.xlu1 %1518 }
 0x62b   : > { %v1521_v33 = vpop.permute.xlu1 %1520 }
 0x62e   : > { %v2921_v21 = vpop.eup %2920 }
 0x62f   : > { %v1499_v54 = vsel %vm1346_vm3, %v2921_v21, 0.0 }
 0x630   : > { %v2923_v52 = vpop.eup %2922  ;;  %1500 = vadd.xlane.f32.xlu0 %v1499_v54 }
 0x631   : > { %v1502_v5 = vsel %vm1346_vm3, %v2923_v52, 0.0 }
 0x634   : > { %1503 = vadd.xlane.f32.xlu0 %v1502_v5 }
 0x64a   : > { %1516 = vrot.lane.b32.xlu0 %v3270_v63, %s3002_s7  ;;  %s3546_s7 = sld [smem:[#allocation9_spill]] }
 0x6bd   : > { %v1501_v49 = vpop.xlane.xlu0 %1500 }
 0x6be   : > { %2924 = vrcp.f32 %v1501_v49 }
 0x6c1   : > { %v1504_v53 = vpop.xlane.xlu0 %1503 }
 0x6c2   : > { %2926 = vrcp.f32 %v1504_v53 }
 0x6c5   : > { %v1517_v55 = vpop.permute.xlu0 %1516 }
 0x6c6   : > { %2730 = vmatpush3.bf16.msra.mxu0 %v1517_v55 }
 0x6c7   : > { %2731 = vmatprep.subr.bf16.mxu0 %v3000_v62 }
 0x6c8   : > { %v2925_v57 = vpop.eup %2924 }
 0x6c9   : > { %v1507_v58 = vmul.f32 %v2925_v57, %v2921_v21 }
 0x6ca   : > { %2732 = vmatpush3.bf16.msra.mxu0 %v1519_v56 }
 0x6cb   : > { %2733 = vmatprep.subr.bf16.mxu0 %v3000_v62 }
 0x6cc   : > { %v2927_v45 = vpop.eup %2926 }
 0x6cd   : > { %v1508_v59 = vmul.f32 %v2927_v45, %v2923_v52 }
 0x6ce   : > { %2734 = vmatpush3.bf16.msra.mxu0 %v1521_v33 }
 0x6cf   : > { %v1509_v60 = vpack.c.bf16 %v1508_v59, %v1507_v58  ;;  %2745 = vmatprep.subr.bf16.mxu0 %v3000_v62 }
 0x6d1   : > { %2736 = vmatmul.mubr.msk.bf16.vlgmr.msra.gmra.mrb[16].mxu0 %vm1346_vm3, %v1509_v60 }
 0x6d2   : > { %2747 = vmatprep.mubr.msk.bf16.mxu0 %vm3001_vm1, %v3000_v62 }
 0x7a4   : > { %v1563_v63 = vpop.f32.mrb[16].mxu0 }
 0x7a5   : > { %1572 = vrot.lane.b32.xlu1 %v1563_v63, %s3003_s10  ;;  %v2737_v29 = vpop.f32.mrb[17].mxu0 }
 0x7a6   : > { %v1566_v61 = vpop.f32.mrb[18].mxu0 }
 0x7a7   : > { %1574 = vrot.lane.b32.xlu0 %v1566_v61, %s3003_s10  ;;  %v2738_v38 = vpop.f32.mrb[19].mxu0  ;;  %s3547_s10 = sld [smem:[#allocation10_spill]] }
 0x817   : > { %v1573_v0 = vpop.permute.xlu1 %1572 }
 0x818   : > { %v3367_v1 = vsel %vm1287_vm2, %v3342_v27, %v1573_v0 }
 0x819   : > { %v1575_v2 = vpop.permute.xlu0 %1574  ;;  %v1582_v3 = vsel %vm1000_vm0, %v3367_v1, 0.0 }
 0x81a   : > { %v3373_v4 = vsel %vm1287_vm2, %v3344_v31, %v1575_v2  ;;  %1583 = vadd.xlane.f32.xlu1 %v1582_v3 }
 0x81b   : > { %v1585_v39 = vsel %vm1000_vm0, %v3373_v4, 0.0 }
 0x81c   : > { %1586 = vadd.xlane.f32.xlu0 %v1585_v39  ;;  %v2869_v39 = vld [vmem:[%s3073_s30] sm:$0xff]  }
 0x82b   : > { %1631 = vperm.xlu1 %2864, %v1627_v15  }
 0x82f   : > { %1764 = vperm.xlu1 %2864, %v1760_v18  }
 0x833   : > { %1769 = vperm.xlu1 %2864, %v1761_v19  }
 0x8a7   : > { %v1584_v6 = vpop.xlane.xlu1 %1583 }
 0x8a8   : > { %v1588_v48 = vmul.f32 0.03125, %v1584_v6 }
 0x8a9   : > { %v1587_v7 = vpop.xlane.xlu0 %1586 }
 0x8aa   : > { %v1590_v8 = vsub.f32 %v3367_v1, %v1588_v48  ;;  %v1589_v9 = vmul.f32 0.03125, %v1587_v7 }
 0x8ab   : > { %v1632_v44 = vpop.permute.xlu1 %1631 }
 0x8ac   : > { %v1591_v10 = vsub.f32 %v3373_v4, %v1589_v9  ;;  %v1592_v11 = vmul.f32 %v1590_v8, %v1590_v8 }
 0x8ae   : > { %v1594_v12 = vsel %vm1000_vm0, %v1592_v11, 0.0  ;;  %v1593_v13 = vmul.f32 %v1591_v10, %v1591_v10 }
 0x8af   : > { %1595 = vadd.xlane.f32.xlu0 %v1594_v12  ;;  %v1765_v6 = vpop.permute.xlu1 %1764 }
 0x8b0   : > { %v1597_v14 = vsel %vm1000_vm0, %v1593_v13, 0.0 }
 0x8b3   : > { %1598 = vadd.xlane.f32.xlu0 %v1597_v14  ;;  %v1770_v13 = vpop.permute.xlu1 %1769 }
 0x8c9   : > { %1636 = vperm.xlu0 %2865, %v1628_v17  }
 0x93c   : > { %v1596_v22 = vpop.xlane.xlu0 %1595 }
 0x93d   : > { %v1600_v23 = vmul.f32 0.03125, %v1596_v22 }
 0x93f   : > { %v1602_v24 = vadd.f32 1e-05, %v1600_v23 }
 0x940   : > { %v1599_v25 = vpop.xlane.xlu0 %1598 }
 0x941   : > { %2928 = vrsqrt.f32 %v1602_v24  ;;  %v1601_v26 = vmul.f32 0.03125, %v1599_v25 }
 0x943   : > { %v1603_v27 = vadd.f32 1e-05, %v1601_v26 }
 0x945   : > { %2930 = vrsqrt.f32 %v1603_v27  ;;  %v2870_v27 = vld [vmem:[%s3537_s11] sm:$0xff]  }
 0x948   : > { %v1637_v47 = vpop.permute.xlu0 %1636 }
 0x94b   : > { %v2929_v30 = vpop.eup %2928 }
 0x94c   : > { %v1606_v31 = vmul.f32 %v2929_v30, %v1590_v8  ;;  %v2871_v30 = vld [vmem:[%s3537_s11 + $0x8] sm:$0xff]  }
 0x94e   : > { %v1614_v36 = vmul.f32 %v2575_v32, %v1606_v31 }
 0x94f   : > { %v2931_v34 = vpop.eup %2930 }
 0x950   : > { %v1607_v35 = vmul.f32 %v2931_v34, %v1591_v10  ;;  %v1622_v41 = vadd.f32 %v2576_v37, %v1614_v36 }
 0x952   : > { %v1615_v40 = vmul.f32 %v2575_v32, %v1607_v35 }
 0x954   : > { %v1623_v20 = vadd.f32 %v2576_v37, %v1615_v40 }
 0x956   : > { %v1626_v42 = vpack.c.bf16 %v1623_v20, %v1622_v41  ;;  %v2581_v20 = vld [vmem:[%s3538_s15] ss:$0 sm:$0xff]  ;;  %s3548_s15 = sld [smem:[#allocation12_spill]] }
 0x958   : > { %2740 = vmatpush3.bf16.msra.mxu1 %v1626_v42 }
 0x959   : > { %2751 = vmatprep.subr.bf16.mxu1 %v3000_v62 }
 0x95b   : > { %2742 = vmatmul.mubr.msk.bf16.vlgmr.msra.gmra.mrb[4].mxu1 %vm1287_vm2, %v2868_v43 }
 0x95c   : > { %2755 = vmatprep.mubr.msk.bf16.mxu1 %vm3001_vm1, %v3000_v62  ;;  %2752 = vmatpush3.bf16.msra.mxu1 %v2870_v27 }
 0x95d   : > { %2753 = vmatprep.subr.bf16.mxu1 %v3000_v62 }
 0x960   : > { %2754 = vmatpush3.bf16.msra.mxu1 %v2871_v30 }
 0x961   : > { %2779 = vmatprep.subr.bf16.mxu1 %v3000_v62 }
 0xa2e   : > { %v1681_v46 = vpop.f32.mrb[4].mxu1 }
 0xa2f   : > { %v1682_v50 = vadd.f32 %v1681_v46, %v1632_v44  ;;  %v2743_v28 = vpop.f32.mrb[5].mxu1  ;;  %v2582_v46 = vld [vmem:[%s3539_s16] ss:$0 sm:$0xff]  ;;  %s3549_s16 = sld [smem:[#allocation16_spill]] }
 0xa30   : > { %v1684_v51 = vpop.f32.mrb[6].mxu1 }
 0xa31   : > { %v1690_v21 = vmul.f32 0.044715, %v1682_v50  ;;  %v1685_v54 = vadd.f32 %v1684_v51, %v1637_v47  ;;  %v2744_v52 = vpop.f32.mrb[7].mxu1  ;;  %v1688_v29 = vmul.f32 0.5, %v1682_v50 }
 0xa32   : > { %v2874_v52 = vld [vmem:[%s3540_s18 + $0x10] sm:$0xff]  }
 0xa33   : > { %v1692_v5 = vmul.f32 %v1690_v21, %v1682_v50  ;;  %v1691_v49 = vmul.f32 0.044715, %v1685_v54  ;;  %v1689_v61 = vmul.f32 0.5, %v1685_v54  ;;  %v2872_v21 = vld [vmem:[%s3540_s18] sm:$0xff]  }
 0xa35   : > { %v1694_v53 = vmul.f32 %v1692_v5, %v1682_v50  ;;  %v1693_v55 = vmul.f32 %v1691_v49, %v1685_v54  ;;  %v2875_v5 = vld [vmem:[%s3540_s18 + $0x18] sm:$0xff]   ;;  %v2876_v49 = vld [vmem:[%s3540_s18 + $0x20] sm:$0xff]  }
 0xa37   : > { %v1696_v56 = vadd.f32 %v1694_v53, %v1682_v50  ;;  %v1695_v57 = vmul.f32 %v1693_v55, %v1685_v54  ;;  %v2877_v53 = vld [vmem:[%s3540_s18 + $0x28] sm:$0xff]   ;;  %v2878_v55 = vld [vmem:[%s3540_s18 + $0x30] sm:$0xff]  }
 0xa39   : > { %v1698_v45 = vmul.f32 0.7978846, %v1696_v56  ;;  %v1697_v33 = vadd.f32 %v1695_v57, %v1685_v54  ;;  %v2873_v54 = vld [vmem:[%s3540_s18 + $0x8] sm:$0xff]   ;;  %v2879_v56 = vld [vmem:[%s3540_s18 + $0x38] sm:$0xff]   ;;  %v2583_v57 = vld [vmem:[%s3541_s22] ss:$0 sm:$0xff] }
 0xa3a   : > { %s3550_s22 = sld [smem:[#allocation14_spill]] }
 0xa3b   : > { %2932 = vtanh.f32 %v1698_v45  ;;  %v1699_v58 = vmul.f32 0.7978846, %v1697_v33 }
 0xa3d   : > { %2934 = vtanh.f32 %v1699_v58 }
 0xa45   : > { %v2933_v59 = vpop.eup %2932 }
 0xa46   : > { %v1702_v60 = vadd.f32 1.0, %v2933_v59 }
 0xa47   : > { %v2935_v63 = vpop.eup %2934 }
 0xa48   : > { %v1703_v38 = vadd.f32 1.0, %v2935_v63  ;;  %v1704_v0 = vmul.f32 %v1702_v60, %v1688_v29 }
 0xa4a   : > { %v1705_v2 = vmul.f32 %v1703_v38, %v1689_v61 }
 0xa4c   : > { %v1708_v3 = vpack.c.bf16 %v1705_v2, %v1704_v0 }
 0xa4e   : > { %2746 = vmatpush3.bf16.msra.mxu0 %v1708_v3 }
 0xa4f   : > { %2759 = vmatprep.subr.bf16.mxu0 %v3000_v62 }
 0xa51   : > { %2748 = vmatmul.mubr.msk.bf16.vlgmr.msra.gmra.mrb[20].mxu0 %vm1287_vm2, %v2869_v39 }
 0xa52   : > { %2775 = vmatprep.mubr.msk.bf16.mxu0 %vm3001_vm1, %v3000_v62  ;;  %2760 = vmatpush3.bf16.msra.mxu0 %v2872_v21 }
 0xa53   : > { %2761 = vmatprep.subr.bf16.mxu0 %v3000_v62 }
 0xa56   : > { %2762 = vmatpush3.bf16.msra.mxu0 %v2873_v54 }
 0xa57   : > { %2763 = vmatprep.subr.bf16.mxu0 %v3000_v62 }
 0xa5a   : > { %2764 = vmatpush3.bf16.msra.mxu0 %v2874_v52 }
 0xa5b   : > { %2765 = vmatprep.subr.bf16.mxu0 %v3000_v62 }
 0xa5e   : > { %2766 = vmatpush3.bf16.msra.mxu0 %v2875_v5 }
 0xa5f   : > { %2767 = vmatprep.subr.bf16.mxu0 %v3000_v62 }
 0xa62   : > { %2768 = vmatpush3.bf16.msra.mxu0 %v2876_v49  ;;  %v2596_v49 = vld [vmem:[%s3545_s2] ss:$0 sm:$0xff]  ;;  %s2620_s2 = sshll.u32 %s3553_s1, 4 }
 0xa63   : > { %2769 = vmatprep.subr.bf16.mxu0 %v3000_v62 }
 0xa66   : > { %2770 = vmatpush3.bf16.msra.mxu0 %v2877_v53 }
 0xa67   : > { %2771 = vmatprep.subr.bf16.mxu0 %v3000_v62 }
 0xa6a   : > { %2772 = vmatpush3.bf16.msra.mxu0 %v2878_v55 }
 0xa6b   : > { %2773 = vmatprep.subr.bf16.mxu0 %v3000_v62 }
 0xa6e   : > { %2774 = vmatpush3.bf16.msra.mxu0 %v2879_v56 }
 0xb24   : > { %v1751_v48 = vpop.f32.mrb[20].mxu0 }
 0xb25   : > { %v1758_v7 = vadd.f32 %v1751_v48, %v3367_v1  ;;  %v2749_v8 = vpop.f32.mrb[21].mxu0 }
 0xb26   : > { %v1754_v9 = vpop.f32.mrb[22].mxu0 }
 0xb27   : > { %v3398_v10 = vadd.f32 %v1765_v6, %v1758_v7  ;;  %v1759_v11 = vadd.f32 %v1754_v9, %v3373_v4  ;;  %v2750_v12 = vpop.f32.mrb[23].mxu0 }
 0xb29   : > { %v3401_v14 = vadd.f32 %v1770_v13, %v1759_v11  ;;  %v1776_v15 = vsel %vm1000_vm0, %v3398_v10, 0.0 }
 0xb2a   : > { %1777 = vadd.xlane.f32.xlu1 %v1776_v15 }
 0xb2b   : > { %v1779_v16 = vsel %vm1000_vm0, %v3401_v14, 0.0 }
 0xb2c   : > { %1780 = vadd.xlane.f32.xlu0 %v1779_v16 }
 0xbb7   : > { %v1778_v1 = vpop.xlane.xlu1 %1777 }
 0xbb8   : > { %v1782_v17 = vmul.f32 0.03125, %v1778_v1 }
 0xbb9   : > { %v1781_v18 = vpop.xlane.xlu0 %1780 }
 0xbba   : > { %v1784_v19 = vsub.f32 %v3398_v10, %v1782_v17  ;;  %v1783_v4 = vmul.f32 0.03125, %v1781_v18 }
 0xbbc   : > { %v1785_v22 = vsub.f32 %v3401_v14, %v1783_v4  ;;  %v1786_v23 = vmul.f32 %v1784_v19, %v1784_v19 }
 0xbbe   : > { %v1788_v24 = vsel %vm1000_vm0, %v1786_v23, 0.0  ;;  %v1787_v25 = vmul.f32 %v1785_v22, %v1785_v22 }
 0xbbf   : > { %1789 = vadd.xlane.f32.xlu1 %v1788_v24 }
 0xbc0   : > { %v1791_v26 = vsel %vm1000_vm0, %v1787_v25, 0.0 }
 0xbc3   : > { %1792 = vadd.xlane.f32.xlu1 %v1791_v26 }
 0xc4c   : > { %v1790_v31 = vpop.xlane.xlu1 %1789 }
 0xc4d   : > { %v1794_v32 = vmul.f32 0.03125, %v1790_v31 }
 0xc4f   : > { %v1796_v34 = vadd.f32 1e-05, %v1794_v32 }
 0xc50   : > { %v1793_v35 = vpop.xlane.xlu1 %1792 }
 0xc51   : > { %2936 = vrsqrt.f32 %v1796_v34  ;;  %v1795_v36 = vmul.f32 0.03125, %v1793_v35 }
 0xc53   : > { %v1797_v37 = vadd.f32 1e-05, %v1795_v36 }
 0xc55   : > { %2938 = vrsqrt.f32 %v1797_v37 }
 0xc5b   : > { %v2937_v40 = vpop.eup %2936 }
 0xc5c   : > { %v1800_v41 = vmul.f32 %v2937_v40, %v1784_v19  ;;  %v2595_v19 = vld [vmem:[%s3542_s23] ss:$0 sm:$0xff]  ;;  %s3551_s23 = sld [smem:[#allocation15_spill]] }
 0xc5e   : > { %v1808_v43 = vmul.f32 %v2581_v20, %v1800_v41 }
 0xc5f   : > { %v2939_v42 = vpop.eup %2938 }
 0xc60   : > { %v1801_v44 = vmul.f32 %v2939_v42, %v1785_v22  ;;  %v1816_v50 = vadd.f32 %v2582_v46, %v1808_v43  ;;  %v2068_v42 = vld [vmem:[%s3543_s26] sm:$0xff] }
 0xc61   : > { %v2201_v43 = vld [vmem:[%s3544_s0] sm:$0xff] }
 0xc62   : > { %v1809_v47 = vmul.f32 %v2581_v20, %v1801_v44  ;;  %v2202_v44 = vld [vmem:[%s3544_s0 + $0x8] sm:$0xff] }
 0xc64   : > { %v1817_v28 = vadd.f32 %v2582_v46, %v1809_v47  ;;  %v2069_v46 = vld [vmem:[%s3543_s26 + $0x8] sm:$0xff] }
 0xc66   : > { %v1822_v51 = vpack.c.bf16 %v1817_v28, %v1816_v50 }
 0xc68   : > { %2756 = vmatmul.mubr.msk.bf16.vlgmr.msra.gmra.mrb[8].mxu1 %vm1000_vm0, %v1822_v51 }
 0xc69   : > { %2781 = vmatprep.mubr.msk.bf16.mxu1 %vm3001_vm1, %v3000_v62 }
 0xd3b   : > { %v1879_v45 = vpop.f32.mrb[8].mxu1 }
 0xd3c   : > { %v1880_v33 = vadd.f32 %v2583_v57, %v1879_v45  ;;  %v2757_v58 = vpop.f32.mrb[9].mxu1 }
 0xd3d   : > { %v1882_v59 = vpop.f32.mrb[10].mxu1 }
 0xd3e   : > { %v1888_v60 = vmul.f32 0.044715, %v1880_v33  ;;  %v1883_v63 = vadd.f32 %v2583_v57, %v1882_v59  ;;  %v2758_v29 = vpop.f32.mrb[11].mxu1  ;;  %v1886_v12 = vmul.f32 0.5, %v1880_v33  ;;  %v2597_v57 = vld [vmem:[%s3546_s7] ss:$0 sm:$0xff]  ;;  %s986_s7 = scalar_lea.vmem %s3173_s27, %s2620_s2 }
 0xd40   : > { %v1890_v61 = vmul.f32 %v1888_v60, %v1880_v33  ;;  %v1889_v38 = vmul.f32 0.044715, %v1883_v63  ;;  %v1887_v13 = vmul.f32 0.5, %v1883_v63  ;;  %v2880_v60 = vld [vmem:[%s3547_s10] sm:$0xff]  }
 0xd42   : > { %v1892_v0 = vmul.f32 %v1890_v61, %v1880_v33  ;;  %v1891_v2 = vmul.f32 %v1889_v38, %v1883_v63 }
 0xd44   : > { %v1894_v3 = vadd.f32 %v1892_v0, %v1880_v33  ;;  %v1893_v39 = vmul.f32 %v1891_v2, %v1883_v63 }
 0xd46   : > { %v1896_v6 = vmul.f32 0.7978846, %v1894_v3  ;;  %v1895_v48 = vadd.f32 %v1893_v39, %v1883_v63 }
 0xd48   : > { %2940 = vtanh.f32 %v1896_v6  ;;  %v1897_v7 = vmul.f32 0.7978846, %v1895_v48 }
 0xd4a   : > { %2942 = vtanh.f32 %v1897_v7 }
 0xd52   : > { %v2941_v8 = vpop.eup %2940 }
 0xd53   : > { %v1900_v9 = vadd.f32 1.0, %v2941_v8 }
 0xd54   : > { %v2943_v11 = vpop.eup %2942 }
 0xd55   : > { %v1901_v15 = vadd.f32 1.0, %v2943_v11  ;;  %v1902_v16 = vmul.f32 %v1900_v9, %v1886_v12 }
 0xd57   : > { %v1903_v1 = vmul.f32 %v1901_v15, %v1887_v13 }
 0xd59   : > { %v1920_v17 = vpack.c.bf16 %v1903_v1, %v1902_v16 }
 0xd5b   : > { %2776 = vmatmul.mubr.bf16.vlgmr.msra.gmra.mrb[24].mxu0 %v1920_v17 }
 0xe2e   : > { %v2003_v18 = vpop.f32.mrb[24].mxu0 }
 0xe2f   : > { %v2010_v4 = vadd.f32 %v2003_v18, %v3398_v10  ;;  %v2777_v22 = vpop.f32.mrb[25].mxu0 }
 0xe30   : > { %v2006_v23 = vpop.f32.mrb[26].mxu0 }
 0xe31   : > { %v3438_v24 = vadd.f32 %v2595_v19, %v2010_v4  ;;  %v2011_v25 = vadd.f32 %v2006_v23, %v3401_v14  ;;  %v2778_v26 = vpop.f32.mrb[27].mxu0 }
 0xe33   : > { %v3441_v27 = vadd.f32 %v2595_v19, %v2011_v25  ;;  %v2023_v30 = vsel %vm1000_vm0, %v3438_v24, 0.0 }
 0xe34   : > { %2024 = vadd.xlane.f32.xlu1 %v2023_v30  ;;  %v2881_v30 = vld [vmem:[%s3548_s15] sm:$0xff]  }
 0xe35   : > { %v2026_v31 = vsel %vm1000_vm0, %v3441_v27, 0.0 }
 0xe38   : > { %2027 = vadd.xlane.f32.xlu1 %v2026_v31 }
 0xec1   : > { %v2025_v10 = vpop.xlane.xlu1 %2024 }
 0xec2   : > { %v2029_v32 = vmul.f32 0.03125, %v2025_v10 }
 0xec4   : > { %v2031_v34 = vsub.f32 %v3438_v24, %v2029_v32 }
 0xec5   : > { %v2028_v14 = vpop.xlane.xlu1 %2027 }
 0xec6   : > { %v2030_v35 = vmul.f32 0.03125, %v2028_v14  ;;  %v2033_v36 = vmul.f32 %v2031_v34, %v2031_v34 }
 0xec8   : > { %v2032_v37 = vsub.f32 %v3441_v27, %v2030_v35  ;;  %v2035_v40 = vsel %vm1000_vm0, %v2033_v36, 0.0 }
 0xec9   : > { %2036 = vadd.xlane.f32.xlu1 %v2035_v40 }
 0xeca   : > { %v2034_v41 = vmul.f32 %v2032_v37, %v2032_v37 }
 0xecc   : > { %v2038_v20 = vsel %vm1000_vm0, %v2034_v41, 0.0 }
 0xecd   : > { %2039 = vadd.xlane.f32.xlu0 %v2038_v20 }
 0xeda   : > { %2072 = vperm.xlu1 %2864, %v2068_v42  }
 0xede   : > { %2205 = vperm.xlu1 %2864, %v2201_v43  }
 0xee2   : > { %2210 = vperm.xlu1 %2864, %v2202_v44  }
 0xee3   : > { %2077 = vperm.xlu0 %2865, %v2069_v46  }
 0xf56   : > { %v2037_v47 = vpop.xlane.xlu1 %2036 }
 0xf57   : > { %v2041_v50 = vmul.f32 0.03125, %v2037_v47 }
 0xf59   : > { %v2043_v28 = vadd.f32 1e-05, %v2041_v50 }
 0xf5a   : > { %v2040_v51 = vpop.xlane.xlu0 %2039  ;;  %v2073_v63 = vpop.permute.xlu1 %2072 }
 0xf5b   : > { %2944 = vrsqrt.f32 %v2043_v28  ;;  %v2042_v21 = vmul.f32 0.03125, %v2040_v51 }
 0xf5d   : > { %v2044_v54 = vadd.f32 1e-05, %v2042_v21 }
 0xf5e   : > { %v2206_v31 = vpop.permute.xlu1 %2205 }
 0xf5f   : > { %2946 = vrsqrt.f32 %v2044_v54  ;;  %v2882_v54 = vld [vmem:[%s3549_s16] sm:$0xff]  }
 0xf62   : > { %v2078_v0 = vpop.permute.xlu0 %2077  ;;  %v2211_v40 = vpop.permute.xlu1 %2210 }
 0xf65   : > { %v2945_v52 = vpop.eup %2944 }
 0xf66   : > { %v2047_v5 = vmul.f32 %v2945_v52, %v2031_v34  ;;  %v2883_v52 = vld [vmem:[%s3549_s16 + $0x8] sm:$0xff]  }
 0xf68   : > { %v2055_v56 = vmul.f32 %v2596_v49, %v2047_v5 }
 0xf69   : > { %v2947_v53 = vpop.eup %2946 }
 0xf6a   : > { %v2048_v55 = vmul.f32 %v2947_v53, %v2032_v37  ;;  %v2063_v33 = vadd.f32 %v2597_v57, %v2055_v56 }
 0xf6c   : > { %v2056_v45 = vmul.f32 %v2596_v49, %v2048_v55 }
 0xf6e   : > { %v2064_v58 = vadd.f32 %v2597_v57, %v2056_v45 }
 0xf70   : > { %v2067_v59 = vpack.c.bf16 %v2064_v58, %v2063_v33  ;;  %v2602_v58 = vld [vmem:[%s3550_s22] ss:$0 sm:$0xff] }
 0xf72   : > { %2780 = vmatpush3.bf16.msra.mxu1 %v2067_v59 }
 0xf73   : > { %2785 = vmatprep.subr.bf16.mxu1 %v3000_v62 }
 0xf75   : > { %2782 = vmatmul.mubr.msk.bf16.vlgmr.msra.gmra.mrb[12].mxu1 %vm1287_vm2, %v2880_v60 }
 0xf76   : > { %2787 = vmatprep.mubr.msk.bf16.mxu1 %vm3001_vm1, %v3000_v62 }
0x1048   : > { %v2122_v29 = vpop.f32.mrb[12].mxu1 }
0x1049   : > { %v2123_v61 = vadd.f32 %v2122_v29, %v2073_v63  ;;  %v2783_v38 = vpop.f32.mrb[13].mxu1  ;;  %v2603_v29 = vld [vmem:[%s3551_s23] ss:$0 sm:$0xff] }
0x104a   : > { %v2125_v2 = vpop.f32.mrb[14].mxu1 }
0x104b   : > { %v2131_v3 = vmul.f32 0.044715, %v2123_v61  ;;  %v2126_v39 = vadd.f32 %v2125_v2, %v2078_v0  ;;  %v2784_v6 = vpop.f32.mrb[15].mxu1  ;;  %v2129_v19 = vmul.f32 0.5, %v2123_v61 }
0x104c   : > { %v2886_v6 = vld [vmem:[%s3163_s12 + $0x10] sm:$0xff]  }
0x104d   : > { %v2133_v48 = vmul.f32 %v2131_v3, %v2123_v61  ;;  %v2132_v7 = vmul.f32 0.044715, %v2126_v39  ;;  %v2130_v4 = vmul.f32 0.5, %v2126_v39  ;;  %v2884_v3 = vld [vmem:[%s3163_s12] sm:$0xff]  }
0x104f   : > { %v2135_v8 = vmul.f32 %v2133_v48, %v2123_v61  ;;  %v2134_v9 = vmul.f32 %v2132_v7, %v2126_v39  ;;  %v2887_v48 = vld [vmem:[%s3163_s12 + $0x18] sm:$0xff]   ;;  %v2888_v7 = vld [vmem:[%s3163_s12 + $0x20] sm:$0xff]  }
0x1051   : > { %v2137_v11 = vadd.f32 %v2135_v8, %v2123_v61  ;;  %v2136_v12 = vmul.f32 %v2134_v9, %v2126_v39  ;;  %v2889_v8 = vld [vmem:[%s3163_s12 + $0x28] sm:$0xff]   ;;  %v2890_v9 = vld [vmem:[%s3163_s12 + $0x30] sm:$0xff]  }
0x1053   : > { %v2139_v13 = vmul.f32 0.7978846, %v2137_v11  ;;  %v2138_v15 = vadd.f32 %v2136_v12, %v2126_v39  ;;  %v2885_v39 = vld [vmem:[%s3163_s12 + $0x8] sm:$0xff]   ;;  %v2891_v11 = vld [vmem:[%s3163_s12 + $0x38] sm:$0xff]   ;;  %v2604_v12 = vld [vmem:[%s3158_s4] ss:$0 sm:$0xff] }
0x1055   : > { %2948 = vtanh.f32 %v2139_v13  ;;  %v2140_v16 = vmul.f32 0.7978846, %v2138_v15 }
0x1057   : > { %2950 = vtanh.f32 %v2140_v16 }
0x105f   : > { %v2949_v1 = vpop.eup %2948 }
0x1060   : > { %v2143_v17 = vadd.f32 1.0, %v2949_v1 }
0x1061   : > { %v2951_v18 = vpop.eup %2950 }
0x1062   : > { %v2144_v22 = vadd.f32 1.0, %v2951_v18  ;;  %v2145_v23 = vmul.f32 %v2143_v17, %v2129_v19 }
0x1064   : > { %v2146_v25 = vmul.f32 %v2144_v22, %v2130_v4 }
0x1066   : > { %v2149_v26 = vpack.c.bf16 %v2146_v25, %v2145_v23 }
0x1068   : > { %2786 = vmatpush3.bf16.msra.mxu1 %v2149_v26 }
0x1069   : > { %2791 = vmatprep.subr.bf16.mxu1 %v3000_v62 }
0x106b   : > { %2788 = vmatmul.mubr.msk.bf16.vlgmr.msra.gmra.mrb[16].mxu1 %vm1287_vm2, %v2881_v30 }
0x106c   : > { %2795 = vmatprep.mubr.msk.bf16.mxu1 %vm3001_vm1, %v3000_v62  ;;  %2792 = vmatpush3.bf16.msra.mxu1 %v2882_v54 }
0x106d   : > { %2793 = vmatprep.subr.bf16.mxu1 %v3000_v62 }
0x1070   : > { %2794 = vmatpush3.bf16.msra.mxu1 %v2883_v52 }
0x1071   : > { %2799 = vmatprep.subr.bf16.mxu1 %v3000_v62 }
0x113e   : > { %v2192_v10 = vpop.f32.mrb[16].mxu1 }
0x113f   : > { %v2199_v32 = vadd.f32 %v2192_v10, %v3438_v24  ;;  %v2789_v34 = vpop.f32.mrb[17].mxu1 }
0x1140   : > { %v2195_v14 = vpop.f32.mrb[18].mxu1 }
0x1141   : > { %v3468_v35 = vadd.f32 %v2206_v31, %v2199_v32  ;;  %v2200_v36 = vadd.f32 %v2195_v14, %v3441_v27  ;;  %v2790_v37 = vpop.f32.mrb[19].mxu1 }
0x1143   : > { %v3471_v41 = vadd.f32 %v2211_v40, %v2200_v36  ;;  %v2217_v20 = vsel %vm1000_vm0, %v3468_v35, 0.0 }
0x1144   : > { %2218 = vadd.xlane.f32.xlu0 %v2217_v20 }
0x1145   : > { %v2220_v42 = vsel %vm1000_vm0, %v3471_v41, 0.0 }
0x1146   : > { %2221 = vadd.xlane.f32.xlu1 %v2220_v42 }
0x11d1   : > { %v2219_v24 = vpop.xlane.xlu0 %2218 }
0x11d2   : > { %v2223_v43 = vmul.f32 0.03125, %v2219_v24 }
0x11d3   : > { %v2222_v44 = vpop.xlane.xlu1 %2221 }
0x11d4   : > { %v2225_v46 = vsub.f32 %v3468_v35, %v2223_v43  ;;  %v2224_v27 = vmul.f32 0.03125, %v2222_v44  ;;  %v2616_v44 = vld [vmem:[%s3168_s20] ss:$0 sm:$0xff] }
0x11d6   : > { %v2226_v47 = vsub.f32 %v3471_v41, %v2224_v27  ;;  %v2227_v50 = vmul.f32 %v2225_v46, %v2225_v46 }
0x11d8   : > { %v2229_v28 = vsel %vm1000_vm0, %v2227_v50, 0.0  ;;  %v2228_v51 = vmul.f32 %v2226_v47, %v2226_v47 }
0x11d9   : > { %2230 = vadd.xlane.f32.xlu0 %v2229_v28 }
0x11da   : > { %v2232_v21 = vsel %vm1000_vm0, %v2228_v51, 0.0 }
0x11dd   : > { %2233 = vadd.xlane.f32.xlu0 %v2232_v21 }
0x1266   : > { %v2231_v5 = vpop.xlane.xlu0 %2230 }
0x1267   : > { %v2235_v49 = vmul.f32 0.03125, %v2231_v5 }
0x1269   : > { %v2237_v53 = vadd.f32 1e-05, %v2235_v49 }
0x126a   : > { %v2234_v55 = vpop.xlane.xlu0 %2233 }
0x126b   : > { %2952 = vrsqrt.f32 %v2237_v53  ;;  %v2236_v56 = vmul.f32 0.03125, %v2234_v55 }
0x126d   : > { %v2238_v57 = vadd.f32 1e-05, %v2236_v56 }
0x126f   : > { %2954 = vrsqrt.f32 %v2238_v57 }
0x1275   : > { %v2953_v45 = vpop.eup %2952 }
0x1276   : > { %v2241_v33 = vmul.f32 %v2953_v45, %v2225_v46 }
0x1278   : > { %v2249_v60 = vmul.f32 %v2602_v58, %v2241_v33 }
0x1279   : > { %v2955_v59 = vpop.eup %2954 }
0x127a   : > { %v2242_v63 = vmul.f32 %v2955_v59, %v2226_v47  ;;  %v2257_v38 = vadd.f32 %v2603_v29, %v2249_v60 }
0x127c   : > { %v2250_v61 = vmul.f32 %v2602_v58, %v2242_v63 }
0x127e   : > { %v2258_v0 = vadd.f32 %v2603_v29, %v2250_v61 }
0x1280   : > { %v2263_v2 = vpack.c.bf16 %v2258_v0, %v2257_v38 }
0x1282   : > { %2796 = vmatmul.mubr.msk.bf16.vlgmr.msra.gmra.mrb[20].mxu1 %vm1000_vm0, %v2263_v2 }
0x1283   : > { %2815 = vmatprep.mubr.msk.bf16.mxu1 %vm3001_vm1, %v3000_v62  ;;  %2800 = vmatpush3.bf16.msra.mxu1 %v2884_v3 }
0x1284   : > { %2801 = vmatprep.subr.bf16.mxu1 %v3000_v62 }
0x1287   : > { %2802 = vmatpush3.bf16.msra.mxu1 %v2885_v39 }
0x1288   : > { %2803 = vmatprep.subr.bf16.mxu1 %v3000_v62 }
0x128b   : > { %2804 = vmatpush3.bf16.msra.mxu1 %v2886_v6 }
0x128c   : > { %2805 = vmatprep.subr.bf16.mxu1 %v3000_v62 }
0x128f   : > { %2806 = vmatpush3.bf16.msra.mxu1 %v2887_v48 }
0x1290   : > { %2807 = vmatprep.subr.bf16.mxu1 %v3000_v62 }
0x1293   : > { %2808 = vmatpush3.bf16.msra.mxu1 %v2888_v7 }
0x1294   : > { %2809 = vmatprep.subr.bf16.mxu1 %v3000_v62 }
0x1297   : > { %2810 = vmatpush3.bf16.msra.mxu1 %v2889_v8 }
0x1298   : > { %2811 = vmatprep.subr.bf16.mxu1 %v3000_v62 }
0x129b   : > { %2812 = vmatpush3.bf16.msra.mxu1 %v2890_v9 }
0x129c   : > { %2813 = vmatprep.subr.bf16.mxu1 %v3000_v62 }
0x129f   : > { %2814 = vmatpush3.bf16.msra.mxu1 %v2891_v11 }
0x1355   : > { %v2320_v13 = vpop.f32.mrb[20].mxu1 }
0x1356   : > { %v2321_v15 = vadd.f32 %v2604_v12, %v2320_v13  ;;  %v2797_v16 = vpop.f32.mrb[21].mxu1 }
0x1357   : > { %v2323_v1 = vpop.f32.mrb[22].mxu1 }
0x1358   : > { %v2329_v17 = vmul.f32 0.044715, %v2321_v15  ;;  %v2324_v18 = vadd.f32 %v2604_v12, %v2323_v1  ;;  %v2798_v19 = vpop.f32.mrb[23].mxu1  ;;  %v2327_v36 = vmul.f32 0.5, %v2321_v15 }
0x135a   : > { %v2331_v4 = vmul.f32 %v2329_v17, %v2321_v15  ;;  %v2330_v22 = vmul.f32 0.044715, %v2324_v18  ;;  %v2328_v37 = vmul.f32 0.5, %v2324_v18 }
0x135c   : > { %v2333_v23 = vmul.f32 %v2331_v4, %v2321_v15  ;;  %v2332_v25 = vmul.f32 %v2330_v22, %v2324_v18 }
0x135e   : > { %v2335_v26 = vadd.f32 %v2333_v23, %v2321_v15  ;;  %v2334_v30 = vmul.f32 %v2332_v25, %v2324_v18 }
0x1360   : > { %v2337_v31 = vmul.f32 0.7978846, %v2335_v26  ;;  %v2336_v10 = vadd.f32 %v2334_v30, %v2324_v18 }
0x1362   : > { %2956 = vtanh.f32 %v2337_v31  ;;  %v2338_v62 = vmul.f32 0.7978846, %v2336_v10 }
0x1364   : > { %2958 = vtanh.f32 %v2338_v62 }
0x136c   : > { %v2957_v32 = vpop.eup %2956 }
0x136d   : > { %v2341_v34 = vadd.f32 1.0, %v2957_v32 }
0x136e   : > { %v2959_v14 = vpop.eup %2958 }
0x136f   : > { %v2342_v40 = vadd.f32 1.0, %v2959_v14  ;;  %v2343_v20 = vmul.f32 %v2341_v34, %v2327_v36 }
0x1371   : > { %v2344_v42 = vmul.f32 %v2342_v40, %v2328_v37 }
0x1373   : > { %v2361_v24 = vpack.c.bf16 %v2344_v42, %v2343_v20 }
0x1375   : > { %2816 = vmatmul.mubr.bf16.vlgmr.msra.gmra.mrb[24].mxu1 %v2361_v24 }
0x1448   : > { %v2444_v43 = vpop.f32.mrb[24].mxu1 }
0x1449   : > { %v2451_v46 = vadd.f32 %v2444_v43, %v3468_v35  ;;  %v2817_v27 = vpop.f32.mrb[25].mxu1 }
0x144a   : > { %v2447_v47 = vpop.f32.mrb[26].mxu1 }
0x144b   : > { %v2460_v50 = vadd.f32 %v2616_v44, %v2451_v46  ;;  %v2452_v28 = vadd.f32 %v2447_v47, %v3471_v41  ;;  %v2818_v51 = vpop.f32.mrb[27].mxu1 }
0x144d   : > { %2462 = vst.msk [vmem:[%s986_s7] sm:$0xff] %vm1000_vm0, %v2460_v50  ;;  %v2461_v21 = vadd.f32 %v2616_v44, %v2452_v28 }
0x144f   : > { %2463 = vst.msk [vmem:[%s986_s7 + $0x8] sm:$0xff] %vm1000_vm0, %v2461_v21 }
0x1450 PF: > { %s75_s28 = sadd.s32 1, %s2966_s28  }
0x1451   : > { %p72_p4 = scmp.ge.s32.totalorder %s75_s28, 4  }
0x1453   :  { %74 = sbr.rel (!%p72_p4) target bundleno = 57 (0x39), region = 210 }

// kernel: gpblock_forward.3
= control target key start
LH: loop header
LB: loop body
LE: loop exit
PB: predicated region body
PF: predicated region fallthrough
CT: control target
= control target key end

     0   :  { %s4664_s0 = inlined_call_operand.vmem [shape: f32[2,64,32], index: 0, kind: input, shape index: {}]   ;;  %s4665_s1 = inlined_call_operand.vmem [shape: f32[2,16,32], index: 1, kind: input, shape index: {}]   ;;  %s4666_s2 = inlined_call_operand.vmem [shape: f32[1,32], index: 2, kind: input, shape index: {}]   ;;  %s4667_s3 = inlined_call_operand.vmem [shape: f32[1,32], index: 3, kind: input, shape index: {}]   ;;  %s4668_s4 = inlined_call_operand.vmem [shape: f32[1,32], index: 4, kind: input, shape index: {}]   ;;  %s4669_s5 = inlined_call_operand.vmem [shape: f32[1,32], index: 5, kind: input, shape index: {}]   ;;  %s4670_s6 = inlined_call_operand.vmem [shape: bf16[32,32], index: 6, kind: input, shape index: {}]   ;;  %s4671_s7 = inlined_call_operand.vmem [shape: f32[1,32], index: 7, kind: input, shape index: {}]   ;;  %s4672_s8 = inlined_call_operand.vmem [shape: bf16[32,32], index: 8, kind: input, shape index: {}]   ;;  %s4673_s9 = inlined_call_operand.vmem [shape: f32[1,32], index: 9, kind: input, shape index: {}]   ;;  %s4674_s10 = inlined_call_operand.vmem [shape: bf16[32,32], index: 10, kind: input, shape index: {}]   ;;  %s4675_s11 = inlined_call_operand.vmem [shape: f32[1,32], index: 11, kind: input, shape index: {}]   ;;  %s4676_s12 = inlined_call_operand.vmem [shape: bf16[32,32], index: 12, kind: input, shape index: {}]   ;;  %s4677_s13 = inlined_call_operand.vmem [shape: bf16[32,32], index: 13, kind: input, shape index: {}]   ;;  %s4678_s14 = inlined_call_operand.vmem [shape: f32[1,32], index: 14, kind: input, shape index: {}]   ;;  %s4679_s15 = inlined_call_operand.vmem [shape: f32[1,32], index: 15, kind: input, shape index: {}]   ;;  %s4680_s16 = inlined_call_operand.vmem [shape: f32[1,32], index: 16, kind: input, shape index: {}]   ;;  %s4681_s17 = inlined_call_operand.vmem [shape: bf16[32,128], index: 17, kind: input, shape index: {}]   ;;  %s4682_s18 = inlined_call_operand.vmem [shape: f32[1,128], index: 18, kind: input, shape index: {}]   ;;  %s4683_s19 = inlined_call_operand.vmem [shape: bf16[128,32], index: 19, kind: input, shape index: {}]   ;;  %s4684_s20 = inlined_call_operand.vmem [shape: f32[1,32], index: 20, kind: input, shape index: {}]   ;;  %s4685_s21 = inlined_call_operand.vmem [shape: f32[3,3,32], index: 21, kind: input, shape index: {}]   ;;  %s4686_s22 = inlined_call_operand.vmem [shape: f32[1,1,32], index: 22, kind: input, shape index: {}]   ;;  %s4687_s23 = inlined_call_operand.vmem [shape: f32[2,8,8,32], index: 23, kind: output, shape index: {}]  }
   0x1   :  { %4689 = sst [smem:[#allocation2_spill]] %s4664_s0 }
   0x2   :  { %4690 = sst [smem:[#allocation3_spill]] %s4665_s1 }
   0x3   :  { %4691 = sst [smem:[#allocation4_spill]] %s4666_s2 }
   0x4   :  { %4692 = sst [smem:[#allocation5_spill]] %s4667_s3 }
   0x5   :  { %4693 = sst [smem:[#allocation6_spill]] %s4668_s4  ;;  %s3661_s4 = smov 0  }
   0x6   :  { %4694 = sst [smem:[#allocation7_spill]] %s4669_s5 }
   0x7   :  { %4695 = sst [smem:[#allocation8_spill]] %s4670_s6 }
   0x8   :  { %4696 = sst [smem:[#allocation9_spill]] %s4671_s7 }
   0x9 LB: > { %s3070_s30 = sadd.s32 4294967295, %s3535_s4   ;;  %p3074_p0 = scmp.ge.s32.totalorder %s3535_s4, 1  ;;  %s3535_s4 = sphi %s3661_s4, %s33_s4  }
   0xa   : > { %p647_p1 = scmp.lt.s32.totalorder %s3535_s4, 3 }
   0xc   : > { %p648_p2 = pnand %p3074_p0, %p647_p1 }
   0xd   : > { %p716_p3 = scmp.lt.s32.totalorder (!%p648_p2), %s3070_s30, 1  ;;  %vm744_vm0 = vcmask (!%p648_p2), 261120   ;;  %s4697_s1 = sld [smem:[#allocation2_spill]] (!%p648_p2)  ;;  %vm3538_vm1 = vmmov (!%p648_p2), 0   ;;  %vm1164_vm2 = vcmask (!%p648_p2), 130048   ;;  %vm2440_vm3 = vcmask (!%p648_p2), 1040384  }
   0xe   : > { %651 = sbr.rel (%p648_p2) target bundleno = 2700 (0xa8c), region = 112  ;;  %s4698_s7 = sld [smem:[#allocation3_spill]] (!%p648_p2)  ;;  %vm2510_vm4 = vcmask (!%p648_p2), 1046528   ;;  %vm2587_vm5 = vcmask (!%p648_p2), 1045504  }
   0xf   : > { %s4699_s0 = sld [smem:[#allocation8_spill]] (!%p648_p2)  ;;  %s4700_s29 = sld [smem:[#allocation4_spill]] (!%p648_p2) }
  0x10   : > { %s4701_s5 = sld [smem:[#allocation5_spill]] (!%p648_p2)  ;;  %s4704_s6 = sld [smem:[#allocation9_spill]] (!%p648_p2) }
  0x11   : > { %s3539_s27 = smov (!%p648_p2), 112  }
  0x15   : > { %s4708_s30 = smov (!%p716_p3, %s3070_s30), 1 }
  0x16   : > { %s3150_s24 = sshll.u32 %s4708_s30, 6  ;;  %s3151_s2 = sshll.u32 %s4708_s30, 4 }
  0x17   : > { %s3677_s26 = scalar_lea.vmem %s4697_s1, %s3150_s24  ;;  %s725_s28 = scalar_lea.vmem %s4698_s7, %s3151_s2 }
  0x18   : > { %v732_v0 = vld [vmem:[%s3677_s26] sm:$0xff]  ;;  %v734_v1 = vld [vmem:[%s3677_s26 + $0x10] sm:$0xff]  ;;  %v733_v2 = vld [vmem:[%s3677_s26 + $0x8] sm:$0xff]  ;;  %s4702_s7 = sld [smem:[#allocation6_spill]] }
  0x19   : > { %v745_v3 = vsel %vm744_vm0, %v732_v0, 0.0  ;;  %v751_v4 = vsel %vm744_vm0, %v734_v1, 0.0  ;;  %v735_v5 = vld [vmem:[%s3677_s26 + $0x18] sm:$0xff]  ;;  %v736_v6 = vld [vmem:[%s3677_s26 + $0x20] sm:$0xff]  ;;  %v737_v7 = vld [vmem:[%s3677_s26 + $0x28] sm:$0xff]  ;;  %v748_v10 = vsel %vm744_vm0, %v733_v2, 0.0 }
  0x1a   : > { %746 = vadd.xlane.f32.xlu0 %v745_v3  ;;  %752 = vadd.xlane.f32.xlu1 %v751_v4  ;;  %v738_v8 = vld [vmem:[%s3677_s26 + $0x30] sm:$0xff]  ;;  %v739_v9 = vld [vmem:[%s3677_s26 + $0x38] sm:$0xff]  ;;  %v754_v11 = vsel %vm744_vm0, %v735_v5, 0.0  ;;  %v757_v12 = vsel %vm744_vm0, %v736_v6, 0.0  ;;  %v760_v13 = vsel %vm744_vm0, %v737_v7, 0.0  ;;  %v740_v16 = vld [vmem:[%s725_s28] sm:$0xff] }
  0x1b   : > { %v763_v14 = vsel %vm744_vm0, %v738_v8, 0.0  ;;  %v766_v15 = vsel %vm744_vm0, %v739_v9, 0.0  ;;  %v741_v17 = vld [vmem:[%s725_s28 + $0x8] sm:$0xff]  ;;  %v880_v18 = vsel %vm744_vm0, %v740_v16, 0.0 }
  0x1c   : > { %v883_v19 = vsel %vm744_vm0, %v741_v17, 0.0 }
  0x1e   : > { %749 = vadd.xlane.f32.xlu0 %v748_v10  ;;  %755 = vadd.xlane.f32.xlu1 %v754_v11  ;;  %v3389_v10 = vld [vmem:[%s4674_s10 + $0x8] sm:$0xff]  }
  0x22   : > { %758 = vadd.xlane.f32.xlu0 %v757_v12  ;;  %761 = vadd.xlane.f32.xlu1 %v760_v13 }
  0x26   : > { %764 = vadd.xlane.f32.xlu0 %v763_v14  ;;  %767 = vadd.xlane.f32.xlu1 %v766_v15 }
  0x2a   : > { %881 = vadd.xlane.f32.xlu0 %v880_v18  ;;  %884 = vadd.xlane.f32.xlu1 %v883_v19 }
  0xa7   : > { %v747_v20 = vpop.xlane.xlu0 %746  ;;  %v753_v21 = vpop.xlane.xlu1 %752 }
  0xa8   : > { %v770_v22 = vmul.f32 0.03125, %v747_v20  ;;  %v772_v23 = vmul.f32 0.03125, %v753_v21 }
  0xaa   : > { %v3701_v24 = vsub.f32 %v732_v0, %v770_v22  ;;  %v3703_v25 = vsub.f32 %v734_v1, %v772_v23 }
  0xab   : > { %v750_v26 = vpop.xlane.xlu0 %749  ;;  %v756_v27 = vpop.xlane.xlu1 %755 }
  0xac   : > { %v771_v28 = vmul.f32 0.03125, %v750_v26  ;;  %v773_v29 = vmul.f32 0.03125, %v756_v27  ;;  %v786_v30 = vmul.f32 %v3701_v24, %v3701_v24  ;;  %v788_v31 = vmul.f32 %v3703_v25, %v3703_v25 }
  0xae   : > { %v3709_v32 = vsub.f32 %v733_v2, %v771_v28  ;;  %v3711_v33 = vsub.f32 %v735_v5, %v773_v29  ;;  %v794_v34 = vsel %vm744_vm0, %v786_v30, 0.0  ;;  %v800_v37 = vsel %vm744_vm0, %v788_v31, 0.0 }
  0xaf   : > { %795 = vadd.xlane.f32.xlu0 %v794_v34  ;;  %v759_v35 = vpop.xlane.xlu0 %758  ;;  %v762_v36 = vpop.xlane.xlu1 %761 }
  0xb0   : > { %v774_v38 = vmul.f32 0.03125, %v759_v35  ;;  %v775_v39 = vmul.f32 0.03125, %v762_v36  ;;  %v787_v40 = vmul.f32 %v3709_v32, %v3709_v32  ;;  %v789_v41 = vmul.f32 %v3711_v33, %v3711_v33 }
  0xb2   : > { %v3719_v42 = vsub.f32 %v736_v6, %v774_v38  ;;  %v3721_v43 = vsub.f32 %v737_v7, %v775_v39  ;;  %v797_v44 = vsel %vm744_vm0, %v787_v40, 0.0  ;;  %v803_v47 = vsel %vm744_vm0, %v789_v41, 0.0  ;;  %v3385_v6 = vld [vmem:[%s4699_s0] sm:$0xff]   ;;  %v3386_v7 = vld [vmem:[%s4699_s0 + $0x8] sm:$0xff]  }
  0xb3   : > { %801 = vadd.xlane.f32.xlu0 %v800_v37  ;;  %798 = vadd.xlane.f32.xlu1 %v797_v44  ;;  %v765_v45 = vpop.xlane.xlu0 %764  ;;  %v768_v46 = vpop.xlane.xlu1 %767  ;;  %v3081_v44 = vld [vmem:[%s4700_s29] ss:$0 sm:$0xff] }
  0xb4   : > { %v776_v48 = vmul.f32 0.03125, %v765_v45  ;;  %v777_v49 = vmul.f32 0.03125, %v768_v46  ;;  %v790_v50 = vmul.f32 %v3719_v42, %v3719_v42  ;;  %v791_v51 = vmul.f32 %v3721_v43, %v3721_v43  ;;  %3215 = vmatprep.subr.bf16.mxu0 %v3385_v6 }
  0xb5   : > { %3216 = vmatpush3.bf16.msra.mxu0 %v3385_v6 }
  0xb6   : > { %v3729_v52 = vsub.f32 %v738_v8, %v776_v48  ;;  %v3731_v53 = vsub.f32 %v739_v9, %v777_v49  ;;  %v806_v54 = vsel %vm744_vm0, %v790_v50, 0.0  ;;  %v809_v57 = vsel %vm744_vm0, %v791_v51, 0.0  ;;  %3217 = vmatprep.subr.bf16.mxu0 %v3386_v7  ;;  %v3387_v8 = vld [vmem:[%s4674_s10] sm:$0xff]  }
  0xb7   : > { %804 = vadd.xlane.f32.xlu1 %v803_v47  ;;  %807 = vadd.xlane.f32.xlu0 %v806_v54  ;;  %v882_v55 = vpop.xlane.xlu0 %881  ;;  %v885_v56 = vpop.xlane.xlu1 %884  ;;  %v3537_v9 = vmov 0.0  }
  0xb8   : > { %v886_v58 = vmul.f32 0.03125, %v882_v55  ;;  %v887_v59 = vmul.f32 0.03125, %v885_v56  ;;  %v792_v60 = vmul.f32 %v3729_v52, %v3729_v52  ;;  %v793_v61 = vmul.f32 %v3731_v53, %v3731_v53  ;;  %3235 = vmatprep.subr.bf16.mxu1 %v3537_v9  ;;  %3239 = vmatprep.mubr.msk.bf16.mxu1 %vm3538_vm1, %v3537_v9  ;;  %v3082_v55 = vld [vmem:[%s4701_s5] ss:$0 sm:$0xff]  ;;  %s4703_s5 = sld [smem:[#allocation7_spill]] }
  0xb9   : > { %3218 = vmatpush3.bf16.msra.mxu0 %v3386_v7  ;;  %3236 = vmatpush3.bf16.msra.mxu1 %v3387_v8 }
  0xba   : > { %v3739_v62 = vsub.f32 %v740_v16, %v886_v58  ;;  %v3741_v63 = vsub.f32 %v741_v17, %v887_v59  ;;  %v812_v0 = vsel %vm744_vm0, %v792_v60, 0.0  ;;  %v815_v1 = vsel %vm744_vm0, %v793_v61, 0.0  ;;  %3227 = vmatprep.subr.bf16.mxu0 %v3537_v9  ;;  %3237 = vmatprep.subr.bf16.mxu1 %v3537_v9 }
  0xbb   : > { %810 = vadd.xlane.f32.xlu1 %v809_v57  ;;  %813 = vadd.xlane.f32.xlu0 %v812_v0 }
  0xbc   : > { %v890_v2 = vmul.f32 %v3739_v62, %v3739_v62  ;;  %v891_v3 = vmul.f32 %v3741_v63, %v3741_v63 }
  0xbd   : > { %3238 = vmatpush3.bf16.msra.mxu1 %v3389_v10 }
  0xbe   : > { %v892_v4 = vsel %vm744_vm0, %v890_v2, 0.0  ;;  %v895_v5 = vsel %vm744_vm0, %v891_v3, 0.0 }
  0xbf   : > { %816 = vadd.xlane.f32.xlu1 %v815_v1  ;;  %893 = vadd.xlane.f32.xlu0 %v892_v4 }
  0xc3   : > { %896 = vadd.xlane.f32.xlu1 %v895_v5 }
 0x13c   : > { %v796_v11 = vpop.xlane.xlu0 %795 }
 0x13d   : > { %v818_v12 = vmul.f32 0.03125, %v796_v11 }
 0x13f   : > { %v826_v13 = vadd.f32 1e-05, %v818_v12 }
 0x140   : > { %v799_v14 = vpop.xlane.xlu1 %798  ;;  %v802_v15 = vpop.xlane.xlu0 %801 }
 0x141   : > { %3405 = vrsqrt.f32 %v826_v13  ;;  %v819_v16 = vmul.f32 0.03125, %v799_v14  ;;  %v820_v17 = vmul.f32 0.03125, %v802_v15 }
 0x143   : > { %v827_v18 = vadd.f32 1e-05, %v819_v16  ;;  %v828_v19 = vadd.f32 1e-05, %v820_v17 }
 0x144   : > { %v805_v20 = vpop.xlane.xlu1 %804  ;;  %v808_v21 = vpop.xlane.xlu0 %807 }
 0x145   : > { %3407 = vrsqrt.f32 %v827_v18  ;;  %v821_v22 = vmul.f32 0.03125, %v805_v20  ;;  %v822_v23 = vmul.f32 0.03125, %v808_v21  ;;  %v3390_v18 = vld [vmem:[%s4672_s8 + $0x8] sm:$0xff]  }
 0x146   : > { %3409 = vrsqrt.f32 %v828_v19 }
 0x147   : > { %v829_v26 = vadd.f32 1e-05, %v821_v22  ;;  %v830_v27 = vadd.f32 1e-05, %v822_v23 }
 0x148   : > { %v811_v28 = vpop.xlane.xlu1 %810  ;;  %v814_v29 = vpop.xlane.xlu0 %813 }
 0x149   : > { %3411 = vrsqrt.f32 %v829_v26  ;;  %v823_v30 = vmul.f32 0.03125, %v811_v28  ;;  %v824_v31 = vmul.f32 0.03125, %v814_v29  ;;  %v3084_v26 = vld [vmem:[%s4703_s5] ss:$0 sm:$0xff] }
 0x14a   : > { %3413 = vrsqrt.f32 %v830_v27 }
 0x14b   : > { %v3406_v34 = vpop.eup %3405  ;;  %v831_v35 = vadd.f32 1e-05, %v823_v30  ;;  %v832_v36 = vadd.f32 1e-05, %v824_v31 }
 0x14c   : > { %v817_v37 = vpop.xlane.xlu1 %816  ;;  %v894_v38 = vpop.xlane.xlu0 %893  ;;  %v842_v39 = vmul.f32 %v3406_v34, %v3701_v24  ;;  %v3085_v34 = vld [vmem:[%s4704_s6] ss:$0 sm:$0xff]  ;;  %s3540_s6 = smov 16  }
 0x14d   : > { %3415 = vrsqrt.f32 %v831_v35  ;;  %v825_v40 = vmul.f32 0.03125, %v817_v37  ;;  %v898_v41 = vmul.f32 0.03125, %v894_v38 }
 0x14e   : > { %3417 = vrsqrt.f32 %v832_v36  ;;  %v856_v51 = vmul.f32 %v3081_v44, %v842_v39 }
 0x14f   : > { %v3408_v45 = vpop.eup %3407  ;;  %v833_v46 = vadd.f32 1e-05, %v825_v40  ;;  %v900_v47 = vadd.f32 1e-05, %v898_v41 }
 0x150   : > { %v3410_v48 = vpop.eup %3409  ;;  %v897_v49 = vpop.xlane.xlu1 %896  ;;  %v843_v50 = vmul.f32 %v3408_v45, %v3709_v32  ;;  %v870_v61 = vadd.f32 %v3082_v55, %v856_v51 }
 0x151   : > { %v844_v54 = vmul.f32 %v3410_v48, %v3703_v25  ;;  %3419 = vrsqrt.f32 %v833_v46  ;;  %v899_v24 = vmul.f32 0.03125, %v897_v49 }
 0x152   : > { %3421 = vrsqrt.f32 %v900_v47  ;;  %v857_v56 = vmul.f32 %v3081_v44, %v843_v50 }
 0x153   : > { %v3412_v57 = vpop.eup %3411  ;;  %v901_v58 = vadd.f32 1e-05, %v899_v24  ;;  %v858_v1 = vmul.f32 %v3081_v44, %v844_v54 }
 0x154   : > { %v3414_v59 = vpop.eup %3413  ;;  %v845_v60 = vmul.f32 %v3412_v57, %v3711_v33  ;;  %v871_v0 = vadd.f32 %v3082_v55, %v857_v56  ;;  %v3388_v33 = vld [vmem:[%s4672_s8] sm:$0xff]  }
 0x155   : > { %v846_v32 = vmul.f32 %v3414_v59, %v3719_v42  ;;  %3423 = vrsqrt.f32 %v901_v58  ;;  %v872_v6 = vadd.f32 %v3082_v55, %v858_v1 }
 0x156   : > { %v927_v25 = vpack.c.bf16 %v871_v0, %v870_v61  ;;  %v859_v2 = vmul.f32 %v3081_v44, %v845_v60 }
 0x157   : > { %v3416_v3 = vpop.eup %3415  ;;  %v860_v8 = vmul.f32 %v3081_v44, %v846_v32  ;;  %v3092_v32 = vld [vmem:[%s4673_s9] ss:$0 sm:$0xff] }
 0x158   : > { %v3418_v4 = vpop.eup %3417  ;;  %v847_v5 = vmul.f32 %v3416_v3, %v3721_v43  ;;  %3219 = vmatprep.mubr.msk.bf16.mxu0 %vm744_vm0, %v927_v25  ;;  %v873_v7 = vadd.f32 %v3082_v55, %v859_v2 }
 0x159   : > { %v848_v10 = vmul.f32 %v3418_v4, %v3729_v52  ;;  %v874_v43 = vadd.f32 %v3082_v55, %v860_v8  ;;  %v3083_v52 = vld [vmem:[%s4702_s7] ss:$0 sm:$0xff] }
 0x15a   : > { %v928_v11 = vpack.c.bf16 %v873_v7, %v872_v6  ;;  %v861_v42 = vmul.f32 %v3081_v44, %v847_v5 }
 0x15b   : > { %v3420_v12 = vpop.eup %3419  ;;  %v862_v16 = vmul.f32 %v3081_v44, %v848_v10 }
 0x15c   : > { %v3422_v13 = vpop.eup %3421  ;;  %v849_v14 = vmul.f32 %v3420_v12, %v3731_v53  ;;  %3220 = vmatmul.mubr.msk.bf16.vlgmr.msra.gmra.mrb[0].mxu0 %vm744_vm0, %v928_v11  ;;  %v875_v15 = vadd.f32 %v3082_v55, %v861_v42 }
 0x15d   : > { %v904_v17 = vmul.f32 %v3422_v13, %v3739_v62  ;;  %3228 = vmatpush3.bf16.msra.mxu0 %v3388_v33  ;;  %v876_v22 = vadd.f32 %v3082_v55, %v862_v16 }
 0x15e   : > { %v929_v19 = vpack.c.bf16 %v875_v15, %v874_v43  ;;  %v863_v20 = vmul.f32 %v3081_v44, %v849_v14  ;;  %3229 = vmatprep.subr.bf16.mxu0 %v3537_v9 }
 0x15f   : > { %v3424_v53 = vpop.eup %3423  ;;  %v912_v23 = vmul.f32 %v3083_v52, %v904_v17 }
 0x160   : > { %v905_v21 = vmul.f32 %v3424_v53, %v3741_v63  ;;  %3223 = vmatprep.mubr.msk.bf16.mxu0 %vm744_vm0, %v929_v19  ;;  %v877_v62 = vadd.f32 %v3082_v55, %v863_v20  ;;  %v3096_v55 = vld [vmem:[%s4675_s11] ss:$0 sm:$0xff] }
 0x161   : > { %3230 = vmatpush3.bf16.msra.mxu0 %v3390_v18  ;;  %v920_v29 = vadd.f32 %v3084_v26, %v912_v23 }
 0x162   : > { %v930_v27 = vpack.c.bf16 %v877_v62, %v876_v22  ;;  %v913_v28 = vmul.f32 %v3083_v52, %v905_v21 }
 0x164   : > { %3224 = vmatmul.mubr.msk.bf16.gmra.mrb[4].mxu0 %vm744_vm0, %v930_v27  ;;  %v921_v30 = vadd.f32 %v3084_v26, %v913_v28 }
 0x165   : > { %3231 = vmatprep.mubr.msk.bf16.mxu0 %vm3538_vm1, %v3537_v9 }
 0x166   : > { %v922_v63 = vpack.c.bf16 %v921_v30, %v920_v29 }
 0x168   : > { %3240 = vmatmul.mubr.msk.bf16.vlgmr.msra.gmra.mrb[0].mxu1 %vm744_vm0, %v922_v63 }
 0x16c   : > { %3232 = vmatmul.mubr.msk.bf16.vlgmr.msra.gmra.mrb[8].mxu0 %vm744_vm0, %v922_v63 }
 0x22f   : > { %v3221_v31 = vpop.f32.mrb[0].mxu0 }
 0x230   : > { %v996_v35 = vpop.f32.mrb[1].mxu0  ;;  %v1005_v37 = vadd.f32 %v3221_v31, %v3085_v34 }
 0x231   : > { %v3222_v36 = vpop.f32.mrb[2].mxu0  ;;  %v997_v40 = vadd.f32 %v3085_v34, %v996_v35 }
 0x232   : > { %v1008_v38 = vadd.f32 %v3222_v36, %v3085_v34  ;;  %v999_v39 = vpop.f32.mrb[3].mxu0 }
 0x233   : > { %v1000_v41 = vadd.f32 %v3085_v34, %v999_v39 }
 0x234   : > { %v1028_v44 = vpack.c.bf16 %v1008_v38, %v1005_v37 }
 0x235   : > { %v1027_v45 = vpack.c.bf16 %v1000_v41, %v997_v40 }
 0x237   : > { %1426 = vrot.lane.b32.xlu1 %v1027_v45, %s3539_s27  ;;  %v3225_v46 = vpop.f32.mrb[4].mxu0  ;;  %3245 = vmatprep.mubr.msk.bf16.mxu0 %vm1164_vm2, %v1027_v45 }
 0x238   : > { %v1012_v47 = vpop.f32.mrb[5].mxu0  ;;  %v1021_v49 = vadd.f32 %v3225_v46, %v3085_v34 }
 0x239   : > { %v3226_v48 = vpop.f32.mrb[6].mxu0  ;;  %v1013_v54 = vadd.f32 %v3085_v34, %v1012_v47 }
 0x23a   : > { %v1024_v50 = vadd.f32 %v3226_v48, %v3085_v34  ;;  %v1015_v51 = vpop.f32.mrb[7].mxu0 }
 0x23b   : > { %v1016_v24 = vadd.f32 %v3085_v34, %v1015_v51  ;;  %1428 = vrot.lane.b32.xlu1 %v1028_v44, %s3539_s27  ;;  %v1156_v56 = vpop.f32.mrb[0].mxu1 }
 0x23c   : > { %v1030_v57 = vpack.c.bf16 %v1024_v50, %v1021_v49  ;;  %v3241_v58 = vpop.f32.mrb[1].mxu1  ;;  %v1157_v61 = vadd.f32 %v3096_v55, %v1156_v56 }
 0x23d   : > { %v1029_v59 = vpack.c.bf16 %v1016_v24, %v1013_v54  ;;  %v1159_v60 = vpop.f32.mrb[2].mxu1 }
 0x23e   : > { %v1160_v0 = vadd.f32 %v3096_v55, %v1159_v60  ;;  %v3242_v1 = vpop.f32.mrb[3].mxu1 }
 0x23f   : > { %1430 = vrot.lane.b32.xlu1 %v1029_v59, %s3539_s27  ;;  %v1091_v25 = vpop.f32.mrb[8].mxu0 }
 0x240   : > { %v3818_v2 = vpack.c.bf16 %v1160_v0, %v1157_v61  ;;  %v3233_v3 = vpop.f32.mrb[9].mxu0  ;;  %v1092_v5 = vadd.f32 %v3092_v32, %v1091_v25 }
 0x241   : > { %v1094_v4 = vpop.f32.mrb[10].mxu0 }
 0x242   : > { %v1095_v6 = vadd.f32 %v3092_v32, %v1094_v4  ;;  %v3234_v7 = vpop.f32.mrb[11].mxu0  ;;  %3253 = vmatprep.subr.bf16.mxu1 %v3818_v2 }
 0x243   : > { %3254 = vmatpush3.bf16.msra.mxu1 %v3818_v2 }
 0x244   : > { %v1098_v8 = vpack.c.bf16 %v1095_v6, %v1092_v5 }
 0x246   : > { %1435 = vrot.lane.b32.xlu0 %v1098_v8, %s3539_s27  ;;  %3351 = vmatprep.subr.msk.bf16.mxu0 %vm1164_vm2, %v1098_v8  ;;  %v1178_v10 = vsel %vm1164_vm2, %v1098_v8, 0 }
 0x247   : > { %3244 = vmatpush3.bf16.xpose.msra.mxu0 %v1178_v10 }
 0x24a   : > { %1432 = vrot.lane.b32.xlu0 %v1030_v57, %s3539_s27 }
 0x24e   : > { %3246 = vmatmul.mubr.msk.bf16.vlgmr.msra.gmra.mrb[12].mxu0 %vm1164_vm2, %v1028_v44 }
 0x24f   : > { %3249 = vmatprep.mubr.msk.bf16.mxu0 %vm1164_vm2, %v1029_v59 }
 0x256   : > { %3250 = vmatmul.mubr.msk.bf16.gmra.mrb[16].mxu0 %vm1164_vm2, %v1030_v57 }
 0x2a9   : > { %v1427_v33 = vpop.permute.xlu1 %1426 }
 0x2aa   : > { %3265 = vmatprep.mubr.msk.bf16.mxu0 %vm1164_vm2, %v1427_v33 }
 0x2ad   : > { %v1429_v12 = vpop.permute.xlu1 %1428 }
 0x2b1   : > { %v1431_v13 = vpop.permute.xlu1 %1430 }
 0x2b8   : > { %v1436_v11 = vpop.permute.xlu0 %1435 }
 0x2b9   : > { %v1450_v42 = vsel %vm1164_vm2, %v1436_v11, 0  ;;  %3352 = vmatprep.subr.msk.bf16.mxu0 %vm1164_vm2, %v1436_v11 }
 0x2ba   : > { %3264 = vmatpush3.bf16.xpose.msra.mxu0 %v1450_v42 }
 0x2bc   : > { %v1433_v14 = vpop.permute.xlu0 %1432 }
 0x2c1   : > { %3266 = vmatmul.mubr.msk.bf16.vlgmr.msra.gmra.mrb[20].mxu0 %vm1164_vm2, %v1429_v12 }
 0x2c2   : > { %3269 = vmatprep.mubr.msk.bf16.mxu0 %vm1164_vm2, %v1431_v13 }
 0x2c9   : > { %3270 = vmatmul.mubr.msk.bf16.gmra.mrb[24].mxu0 %vm1164_vm2, %v1433_v14 }
 0x321   : > { %v3247_v43 = vpop.f32.mrb[12].mxu0 }
 0x322   : > { %v3835_v15 = vmul.f32 0.25, %v3247_v43  ;;  %v1214_v16 = vpop.f32.mrb[13].mxu0 }
 0x323   : > { %v3837_v17 = vmul.f32 0.25, %v1214_v16  ;;  %v3248_v52 = vpop.f32.mrb[14].mxu0 }
 0x324   : > { %v1217_v18 = vpop.f32.mrb[15].mxu0  ;;  %v1259_v19 = vsel %vm1164_vm2, %v3835_v15, -inf  ;;  %v3847_v22 = vmul.f32 0.25, %v3248_v52 }
 0x325   : > { %v3841_v20 = vmul.f32 0.25, %v1217_v18  ;;  %1260 = vmax.xlane.f32.xlu0 %v1259_v19  ;;  %v1253_v53 = vsel %vm1164_vm2, %v3837_v17, -inf }
 0x326   : > { %1254 = vmax.xlane.f32.xlu1 %v1253_v53  ;;  %v1262_v29 = vsel %vm1164_vm2, %v3847_v22, -inf }
 0x327   : > { %v1256_v21 = vsel %vm1164_vm2, %v3841_v20, -inf }
 0x329   : > { %1257 = vmax.xlane.f32.xlu0 %v1256_v21  ;;  %v3251_v62 = vpop.f32.mrb[16].mxu0 }
 0x32a   : > { %v1230_v23 = vpop.f32.mrb[17].mxu0  ;;  %v3853_v30 = vmul.f32 0.25, %v3251_v62 }
 0x32b   : > { %v3849_v26 = vmul.f32 0.25, %v1230_v23  ;;  %v3252_v27 = vpop.f32.mrb[18].mxu0 }
 0x32c   : > { %v1233_v28 = vpop.f32.mrb[19].mxu0  ;;  %v3861_v35 = vmul.f32 0.25, %v3252_v27  ;;  %v1271_v36 = vsel %vm1164_vm2, %v3853_v30, -inf }
 0x32d   : > { %v3855_v63 = vmul.f32 0.25, %v1233_v28  ;;  %1263 = vmax.xlane.f32.xlu0 %v1262_v29  ;;  %v1265_v31 = vsel %vm1164_vm2, %v3849_v26, -inf }
 0x32e   : > { %1266 = vmax.xlane.f32.xlu1 %v1265_v31  ;;  %v1274_v37 = vsel %vm1164_vm2, %v3861_v35, -inf }
 0x32f   : > { %v1268_v34 = vsel %vm1164_vm2, %v3855_v63, -inf }
 0x331   : > { %1269 = vmax.xlane.f32.xlu0 %v1268_v34 }
 0x332   : > { %1272 = vmax.xlane.f32.xlu1 %v1271_v36 }
 0x335   : > { %1275 = vmax.xlane.f32.xlu0 %v1274_v37 }
 0x394   : > { %v3267_v38 = vpop.f32.mrb[20].mxu0 }
 0x395   : > { %v1486_v39 = vpop.f32.mrb[21].mxu0  ;;  %v3869_v45 = vmul.f32 0.25, %v3267_v38 }
 0x396   : > { %v3867_v40 = vmul.f32 0.25, %v1486_v39  ;;  %v3268_v41 = vpop.f32.mrb[22].mxu0 }
 0x397   : > { %v1489_v44 = vpop.f32.mrb[23].mxu0  ;;  %v3875_v48 = vmul.f32 0.25, %v3268_v41  ;;  %v1531_v51 = vsel %vm1164_vm2, %v3869_v45, -inf }
 0x398   : > { %v3871_v46 = vmul.f32 0.25, %v1489_v44  ;;  %v1525_v47 = vsel %vm1164_vm2, %v3867_v40, -inf }
 0x399   : > { %1526 = vmax.xlane.f32.xlu1 %v1525_v47  ;;  %v1534_v56 = vsel %vm1164_vm2, %v3875_v48, -inf }
 0x39a   : > { %v1528_v49 = vsel %vm1164_vm2, %v3871_v46, -inf }
 0x39b   : > { %1529 = vmax.xlane.f32.xlu0 %v1528_v49 }
 0x39c   : > { %v3271_v50 = vpop.f32.mrb[24].mxu0 }
 0x39d   : > { %1532 = vmax.xlane.f32.xlu1 %v1531_v51  ;;  %v1502_v54 = vpop.f32.mrb[25].mxu0  ;;  %v3885_v58 = vmul.f32 0.25, %v3271_v50 }
 0x39e   : > { %v3881_v24 = vmul.f32 0.25, %v1502_v54  ;;  %v3272_v55 = vpop.f32.mrb[26].mxu0 }
 0x39f   : > { %v1505_v57 = vpop.f32.mrb[27].mxu0  ;;  %1535 = vmax.xlane.f32.xlu0 %v1534_v56  ;;  %v3891_v61 = vmul.f32 0.25, %v3272_v55  ;;  %v1543_v1 = vsel %vm1164_vm2, %v3885_v58, -inf }
 0x3a0   : > { %v3887_v59 = vmul.f32 0.25, %v1505_v57  ;;  %v1537_v60 = vsel %vm1164_vm2, %v3881_v24, -inf }
 0x3a1   : > { %1538 = vmax.xlane.f32.xlu1 %v1537_v60  ;;  %v1546_v32 = vsel %vm1164_vm2, %v3891_v61, -inf }
 0x3a2   : > { %v1540_v0 = vsel %vm1164_vm2, %v3887_v59, -inf }
 0x3a3   : > { %1541 = vmax.xlane.f32.xlu0 %v1540_v0 }
 0x3a5   : > { %1544 = vmax.xlane.f32.xlu1 %v1543_v1 }
 0x3a7   : > { %1547 = vmax.xlane.f32.xlu0 %v1546_v32 }
 0x3b2   : > { %v1261_v25 = vpop.xlane.xlu0 %1260 }
 0x3b3   : > { %v1279_v3 = vsub.f32 %v3835_v15, %v1261_v25  ;;  %v1255_v4 = vpop.xlane.xlu1 %1254 }
 0x3b4   : > { %v1277_v5 = vsub.f32 %v3837_v17, %v1255_v4 }
 0x3b5   : > { %v1289_v6 = vmul.f32 1.442695, %v1279_v3 }
 0x3b6   : > { %v1285_v7 = vmul.f32 1.442695, %v1277_v5  ;;  %v1258_v8 = vpop.xlane.xlu0 %1257 }
 0x3b7   : > { %3425 = vpow2.f32 %v1289_v6  ;;  %v1278_v10 = vsub.f32 %v3841_v20, %v1258_v8 }
 0x3b8   : > { %3427 = vpow2.f32 %v1285_v7 }
 0x3b9   : > { %v1287_v33 = vmul.f32 1.442695, %v1278_v10 }
 0x3ba   : > { %v1264_v11 = vpop.xlane.xlu0 %1263 }
 0x3bb   : > { %3429 = vpow2.f32 %v1287_v33  ;;  %v1280_v42 = vsub.f32 %v3847_v22, %v1264_v11  ;;  %v1267_v12 = vpop.xlane.xlu1 %1266 }
 0x3bc   : > { %v1281_v14 = vsub.f32 %v3849_v26, %v1267_v12 }
 0x3bd   : > { %v1291_v13 = vmul.f32 1.442695, %v1280_v42 }
 0x3be   : > { %v1270_v43 = vpop.xlane.xlu0 %1269  ;;  %v1293_v19 = vmul.f32 1.442695, %v1281_v14 }
 0x3bf   : > { %3431 = vpow2.f32 %v1291_v13  ;;  %v1282_v15 = vsub.f32 %v3855_v63, %v1270_v43  ;;  %v1273_v16 = vpop.xlane.xlu1 %1272 }
 0x3c0   : > { %v1283_v17 = vsub.f32 %v3853_v30, %v1273_v16 }
 0x3c1   : > { %v3906_v52 = vpop.eup %3425  ;;  %v1295_v18 = vmul.f32 1.442695, %v1282_v15 }
 0x3c2   : > { %v1297_v20 = vmul.f32 1.442695, %v1283_v17  ;;  %v1276_v53 = vpop.xlane.xlu0 %1275  ;;  %v1307_v21 = vsel %vm1164_vm2, %v3906_v52, 0.0  ;;  %v3910_v22 = vpop.eup %3427 }
 0x3c3   : > { %3433 = vpow2.f32 %v1295_v18  ;;  %v1284_v62 = vsub.f32 %v3861_v35, %v1276_v53  ;;  %1308 = vadd.xlane.f32.xlu1 %v1307_v21  ;;  %v1301_v27 = vsel %vm1164_vm2, %v3910_v22, 0.0 }
 0x3c4   : > { %3435 = vpow2.f32 %v1297_v20 }
 0x3c5   : > { %v3913_v23 = vpop.eup %3429  ;;  %v1299_v26 = vmul.f32 1.442695, %v1284_v62  ;;  %3437 = vpow2.f32 %v1293_v19 }
 0x3c6   : > { %v1304_v28 = vsel %vm1164_vm2, %v3913_v23, 0.0 }
 0x3c7   : > { %3439 = vpow2.f32 %v1299_v26  ;;  %1302 = vadd.xlane.f32.xlu1 %v1301_v27  ;;  %1305 = vadd.xlane.f32.xlu0 %v1304_v28 }
 0x3c9   : > { %v3919_v29 = vpop.eup %3431 }
 0x3ca   : > { %v1310_v30 = vsel %vm1164_vm2, %v3919_v29, 0.0 }
 0x3cb   : > { %1311 = vadd.xlane.f32.xlu0 %v1310_v30 }
 0x3cd   : > { %v3923_v63 = vpop.eup %3433 }
 0x3ce   : > { %v3925_v31 = vpop.eup %3435  ;;  %v1316_v34 = vsel %vm1164_vm2, %v3923_v63, 0.0 }
 0x3cf   : > { %1317 = vadd.xlane.f32.xlu0 %v1316_v34  ;;  %v1319_v35 = vsel %vm1164_vm2, %v3925_v31, 0.0  ;;  %v3931_v36 = vpop.eup %3437 }
 0x3d0   : > { %1320 = vadd.xlane.f32.xlu1 %v1319_v35  ;;  %v1313_v39 = vsel %vm1164_vm2, %v3931_v36, 0.0 }
 0x3d1   : > { %v3933_v37 = vpop.eup %3439 }
 0x3d2   : > { %v1322_v38 = vsel %vm1164_vm2, %v3933_v37, 0.0 }
 0x3d3   : > { %1323 = vadd.xlane.f32.xlu0 %v1322_v38 }
 0x3d4   : > { %1314 = vadd.xlane.f32.xlu1 %v1313_v39 }
 0x426   : > { %v1527_v41 = vpop.xlane.xlu1 %1526 }
 0x427   : > { %v1549_v44 = vsub.f32 %v3867_v40, %v1527_v41 }
 0x428   : > { %v1530_v47 = vpop.xlane.xlu0 %1529 }
 0x429   : > { %v1550_v49 = vsub.f32 %v3871_v46, %v1530_v47  ;;  %v1557_v55 = vmul.f32 1.442695, %v1549_v44 }
 0x42a   : > { %v1533_v50 = vpop.xlane.xlu1 %1532 }
 0x42b   : > { %v1559_v51 = vmul.f32 1.442695, %v1550_v49  ;;  %v1551_v54 = vsub.f32 %v3869_v45, %v1533_v50 }
 0x42c   : > { %v1536_v56 = vpop.xlane.xlu0 %1535 }
 0x42d   : > { %3441 = vpow2.f32 %v1559_v51  ;;  %v1561_v57 = vmul.f32 1.442695, %v1551_v54  ;;  %v1552_v60 = vsub.f32 %v3875_v48, %v1536_v56 }
 0x42e   : > { %v1539_v0 = vpop.xlane.xlu1 %1538 }
 0x42f   : > { %3443 = vpow2.f32 %v1561_v57  ;;  %v1563_v1 = vmul.f32 1.442695, %v1552_v60  ;;  %v1553_v32 = vsub.f32 %v3881_v24, %v1539_v0 }
 0x430   : > { %3445 = vpow2.f32 %v1557_v55  ;;  %v1542_v40 = vpop.xlane.xlu0 %1541 }
 0x431   : > { %3447 = vpow2.f32 %v1563_v1  ;;  %v1554_v46 = vsub.f32 %v3887_v59, %v1542_v40  ;;  %v1565_v4 = vmul.f32 1.442695, %v1553_v32 }
 0x432   : > { %v1545_v25 = vpop.xlane.xlu1 %1544 }
 0x433   : > { %v1567_v3 = vmul.f32 1.442695, %v1554_v46  ;;  %v1555_v45 = vsub.f32 %v3885_v58, %v1545_v25 }
 0x434   : > { %v1548_v5 = vpop.xlane.xlu0 %1547 }
 0x435   : > { %3449 = vpow2.f32 %v1567_v3  ;;  %v1569_v6 = vmul.f32 1.442695, %v1555_v45  ;;  %v1556_v48 = vsub.f32 %v3891_v61, %v1548_v5 }
 0x437   : > { %v3947_v7 = vpop.eup %3441  ;;  %3451 = vpow2.f32 %v1569_v6  ;;  %v1571_v8 = vmul.f32 1.442695, %v1556_v48 }
 0x438   : > { %3453 = vpow2.f32 %v1565_v4  ;;  %v1576_v24 = vsel %vm1164_vm2, %v3947_v7, 0.0 }
 0x439   : > { %v3951_v10 = vpop.eup %3443  ;;  %3455 = vpow2.f32 %v1571_v8  ;;  %1577 = vadd.xlane.f32.xlu0 %v1576_v24 }
 0x43a   : > { %v3953_v59 = vpop.eup %3445  ;;  %v1579_v58 = vsel %vm1164_vm2, %v3951_v10, 0.0 }
 0x43b   : > { %v3957_v33 = vpop.eup %3447  ;;  %1580 = vadd.xlane.f32.xlu1 %v1579_v58  ;;  %v1573_v11 = vsel %vm1164_vm2, %v3953_v59, 0.0 }
 0x43c   : > { %v1582_v61 = vsel %vm1164_vm2, %v3957_v33, 0.0 }
 0x43d   : > { %1583 = vadd.xlane.f32.xlu0 %v1582_v61 }
 0x43f   : > { %v3963_v42 = vpop.eup %3449  ;;  %1574 = vadd.xlane.f32.xlu1 %v1573_v11 }
 0x440   : > { %v1588_v12 = vsel %vm1164_vm2, %v3963_v42, 0.0 }
 0x441   : > { %v3967_v13 = vpop.eup %3451  ;;  %1589 = vadd.xlane.f32.xlu0 %v1588_v12 }
 0x442   : > { %v3969_v14 = vpop.eup %3453  ;;  %v1591_v43 = vsel %vm1164_vm2, %v3967_v13, 0.0 }
 0x443   : > { %v3973_v15 = vpop.eup %3455  ;;  %1592 = vadd.xlane.f32.xlu1 %v1591_v43  ;;  %v1585_v17 = vsel %vm1164_vm2, %v3969_v14, 0.0 }
 0x444   : > { %v1594_v16 = vsel %vm1164_vm2, %v3973_v15, 0.0 }
 0x445   : > { %1595 = vadd.xlane.f32.xlu0 %v1594_v16 }
 0x447   : > { %1586 = vadd.xlane.f32.xlu1 %v1585_v17 }
 0x450   : > { %v1309_v18 = vpop.xlane.xlu1 %1308 }
 0x454   : > { %v1303_v19 = vpop.xlane.xlu1 %1302  ;;  %v1306_v20 = vpop.xlane.xlu0 %1305 }
 0x455   : > { %3457 = vrcp.f32 %v1303_v19 }
 0x456   : > { %3459 = vrcp.f32 %v1306_v20 }
 0x457   : > { %3461 = vrcp.f32 %v1309_v18 }
 0x458   : > { %1618 = vrot.lane.b32.xlu1 %v3818_v2, %s3539_s27  ;;  %v1312_v53 = vpop.xlane.xlu0 %1311  ;;  %s4454_s27 = scalar_lea.vmem %s4687_s23, %s3150_s24 }
 0x459   : > { %3463 = vrcp.f32 %v1312_v53  ;;  %v3392_v53 = vld [vmem:[%s4677_s13 + $0x8] sm:$0xff]  }
 0x45c   : > { %v1318_v21 = vpop.xlane.xlu0 %1317 }
 0x45d   : > { %v1321_v62 = vpop.xlane.xlu1 %1320  ;;  %3465 = vrcp.f32 %v1318_v21 }
 0x45e   : > { %3467 = vrcp.f32 %v1321_v62 }
 0x45f   : > { %v3458_v26 = vpop.eup %3457 }
 0x460   : > { %v3460_v27 = vpop.eup %3459  ;;  %v1324_v28 = vpop.xlane.xlu0 %1323  ;;  %v1333_v30 = vmul.f32 %v3458_v26, %v3910_v22 }
 0x461   : > { %v3462_v34 = vpop.eup %3461  ;;  %3469 = vrcp.f32 %v1324_v28  ;;  %v1315_v35 = vpop.xlane.xlu1 %1314  ;;  %v1334_v38 = vmul.f32 %v3460_v27, %v3913_v23 }
 0x462   : > { %3471 = vrcp.f32 %v1315_v35  ;;  %v1335_v2 = vmul.f32 %v3462_v34, %v3906_v52 }
 0x463   : > { %v3464_v39 = vpop.eup %3463  ;;  %v1341_v41 = vpack.c.bf16 %v1334_v38, %v1333_v30  ;;  %v3393_v38 = vld [vmem:[%s4676_s12] sm:$0xff]  }
 0x464   : > { %v1336_v44 = vmul.f32 %v3464_v39, %v3919_v29 }
 0x465   : > { %3255 = vmatprep.mubr.msk.bf16.mxu1 %vm1164_vm2, %v1341_v41 }
 0x466   : > { %v1342_v47 = vpack.c.bf16 %v1336_v44, %v1335_v2 }
 0x467   : > { %v3466_v49 = vpop.eup %3465 }
 0x468   : > { %3256 = vmatmul.mubr.msk.bf16.vlgmr.msra.gmra.mrb[4].mxu1 %vm1164_vm2, %v1342_v47  ;;  %v3468_v50 = vpop.eup %3467  ;;  %v1338_v55 = vmul.f32 %v3466_v49, %v3923_v63 }
 0x469   : > { %v1339_v56 = vmul.f32 %v3468_v50, %v3925_v31 }
 0x46b   : > { %v3470_v22 = vpop.eup %3469 }
 0x46c   : > { %v3472_v51 = vpop.eup %3471  ;;  %v1340_v54 = vmul.f32 %v3470_v22, %v3933_v37 }
 0x46d   : > { %v1337_v23 = vmul.f32 %v3472_v51, %v3931_v36 }
 0x46e   : > { %v1344_v57 = vpack.c.bf16 %v1340_v54, %v1339_v56 }
 0x46f   : > { %v1343_v52 = vpack.c.bf16 %v1338_v55, %v1337_v23 }
 0x471   : > { %3259 = vmatprep.mubr.msk.bf16.mxu1 %vm1164_vm2, %v1343_v52 }
 0x472   : > { %3260 = vmatmul.mubr.msk.bf16.gmra.mrb[8].mxu1 %vm1164_vm2, %v1344_v57 }
 0x4c6   : > { %v1578_v29 = vpop.xlane.xlu0 %1577 }
 0x4c7   : > { %3473 = vrcp.f32 %v1578_v29 }
 0x4c8   : > { %v1581_v60 = vpop.xlane.xlu1 %1580 }
 0x4ca   : > { %v1584_v0 = vpop.xlane.xlu0 %1583 }
 0x4cb   : > { %3475 = vrcp.f32 %v1584_v0 }
 0x4cc   : > { %3477 = vrcp.f32 %v1581_v60  ;;  %v1575_v1 = vpop.xlane.xlu1 %1574  ;;  %v3394_v60 = vld [vmem:[%s4676_s12 + $0x8] sm:$0xff]  }
 0x4cd   : > { %3479 = vrcp.f32 %v1575_v1 }
 0x4ce   : > { %v1590_v37 = vpop.xlane.xlu0 %1589 }
 0x4cf   : > { %3481 = vrcp.f32 %v1590_v37 }
 0x4d0   : > { %v1593_v36 = vpop.xlane.xlu1 %1592 }
 0x4d1   : > { %v3474_v31 = vpop.eup %3473 }
 0x4d2   : > { %v1596_v63 = vpop.xlane.xlu0 %1595  ;;  %v1606_v5 = vmul.f32 %v3474_v31, %v3947_v7 }
 0x4d3   : > { %3483 = vrcp.f32 %v1596_v63 }
 0x4d4   : > { %3485 = vrcp.f32 %v1593_v36  ;;  %v1587_v32 = vpop.xlane.xlu1 %1586 }
 0x4d5   : > { %v3476_v40 = vpop.eup %3475  ;;  %3487 = vrcp.f32 %v1587_v32 }
 0x4d6   : > { %v3478_v46 = vpop.eup %3477  ;;  %v1608_v3 = vmul.f32 %v3476_v40, %v3957_v33 }
 0x4d7   : > { %v3480_v25 = vpop.eup %3479  ;;  %v1607_v6 = vmul.f32 %v3478_v46, %v3951_v10 }
 0x4d8   : > { %v1619_v45 = vpop.permute.xlu1 %1618  ;;  %v1605_v4 = vmul.f32 %v3480_v25, %v3953_v59  ;;  %v3521_v25 = vld [vmem:[%s3677_s26] sm:$0xff] }
 0x4d9   : > { %3273 = vmatprep.subr.bf16.mxu1 %v1619_v45  ;;  %v1614_v8 = vpack.c.bf16 %v1608_v3, %v1607_v6  ;;  %v3482_v24 = vpop.eup %3481  ;;  %v3522_v3 = vld [vmem:[%s3677_s26 + $0x8] sm:$0xff] }
 0x4da   : > { %3274 = vmatpush3.bf16.msra.mxu1 %v1619_v45  ;;  %v1613_v48 = vpack.c.bf16 %v1606_v5, %v1605_v4  ;;  %v1610_v7 = vmul.f32 %v3482_v24, %v3963_v42  ;;  %v1742_v45 = vpack.c.bf16 %v3522_v3, %v3521_v25 }
 0x4dc   : > { %3275 = vmatprep.mubr.msk.bf16.mxu1 %vm1164_vm2, %v1613_v48  ;;  %v3523_v48 = vld [vmem:[%s3677_s26 + $0x10] sm:$0xff] }
 0x4dd   : > { %v3484_v58 = vpop.eup %3483  ;;  %3276 = vmatmul.mubr.msk.bf16.vlgmr.msra.gmra.mrb[12].mxu1 %vm1164_vm2, %v1614_v8  ;;  %v3524_v8 = vld [vmem:[%s3677_s26 + $0x18] sm:$0xff] }
 0x4de   : > { %v3486_v61 = vpop.eup %3485  ;;  %v1612_v33 = vmul.f32 %v3484_v58, %v3973_v15  ;;  %v3391_v15 = vld [vmem:[%s4677_s13] sm:$0xff]   ;;  %v1743_v24 = vpack.c.bf16 %v3524_v8, %v3523_v48 }
 0x4df   : > { %v3488_v11 = vpop.eup %3487  ;;  %v1611_v10 = vmul.f32 %v3486_v61, %v3967_v13  ;;  %3283 = vmatprep.subr.bf16.mxu0 %v3391_v15  ;;  %v3525_v58 = vld [vmem:[%s3677_s26 + $0x20] sm:$0xff]  ;;  %v3526_v61 = vld [vmem:[%s3677_s26 + $0x28] sm:$0xff] }
 0x4e0   : > { %v1609_v59 = vmul.f32 %v3488_v11, %v3969_v14  ;;  %3284 = vmatpush3.bf16.msra.mxu0 %v3391_v15  ;;  %v1744_v11 = vpack.c.bf16 %v3526_v61, %v3525_v58 }
 0x4e1   : > { %v1616_v43 = vpack.c.bf16 %v1612_v33, %v1611_v10  ;;  %3285 = vmatprep.subr.bf16.mxu0 %v3392_v53  ;;  %v3527_v33 = vld [vmem:[%s3677_s26 + $0x30] sm:$0xff]  ;;  %v3128_v10 = vld [vmem:[%s4678_s14] ss:$0 sm:$0xff] }
 0x4e2   : > { %v1615_v12 = vpack.c.bf16 %v1610_v7, %v1609_v59  ;;  %v3528_v59 = vld [vmem:[%s3677_s26 + $0x38] sm:$0xff] }
 0x4e3   : > { %v1745_v7 = vpack.c.bf16 %v3528_v59, %v3527_v33 }
 0x4e4   : > { %3279 = vmatprep.mubr.msk.bf16.mxu1 %vm1164_vm2, %v1615_v12  ;;  %3286 = vmatpush3.bf16.msra.mxu0 %v3392_v53 }
 0x4e5   : > { %3280 = vmatmul.mubr.msk.bf16.gmra.mrb[16].mxu1 %vm1164_vm2, %v1616_v43  ;;  %3295 = vmatprep.subr.bf16.mxu0 %v3393_v38 }
 0x53b   : > { %v3257_v16 = vpop.f32.mrb[4].mxu1 }
 0x53c   : > { %v1391_v17 = vpop.f32.mrb[5].mxu1 }
 0x53d   : > { %v3258_v18 = vpop.f32.mrb[6].mxu1 }
 0x53e   : > { %v1394_v19 = vpop.f32.mrb[7].mxu1 }
 0x545   : > { %v3261_v14 = vpop.f32.mrb[8].mxu1 }
 0x546   : > { %v1407_v42 = vpop.f32.mrb[9].mxu1 }
 0x547   : > { %v3262_v20 = vpop.f32.mrb[10].mxu1 }
 0x548   : > { %v1410_v13 = vpop.f32.mrb[11].mxu1 }
 0x5b0   : > { %v3277_v21 = vpop.f32.mrb[12].mxu1 }
 0x5b1   : > { %v1667_v62 = vpop.f32.mrb[13].mxu1 }
 0x5b2   : > { %v3278_v26 = vpop.f32.mrb[14].mxu1 }
 0x5b3   : > { %v3370_v27 = vpack.i.bf16 %v3278_v26, %v3277_v21  ;;  %v1670_v28 = vpop.f32.mrb[15].mxu1 }
 0x5b4   : > { %v3365_v30 = vpack.i.bf16 %v1670_v28, %v1667_v62 }
 0x5b5   : > { %3371 = vrot.lane.b32.xlu1 %v3370_v27, %s3540_s6 }
 0x5b6   : > { %3366 = vrot.lane.b32.xlu0 %v3365_v30, %s3540_s6 }
 0x5b8   : > { %v3281_v34 = vpop.f32.mrb[16].mxu1 }
 0x5b9   : > { %v1683_v35 = vpop.f32.mrb[17].mxu1 }
 0x5ba   : > { %v3282_v39 = vpop.f32.mrb[18].mxu1 }
 0x5bb   : > { %v3380_v41 = vpack.i.bf16 %v3282_v39, %v3281_v34  ;;  %v1686_v2 = vpop.f32.mrb[19].mxu1 }
 0x5bc   : > { %v3375_v44 = vpack.i.bf16 %v1686_v2, %v1683_v35 }
 0x5be   : > { %3376 = vrot.lane.b32.xlu1 %v3375_v44, %s3540_s6 }
 0x5c2   : > { %3381 = vrot.lane.b32.xlu1 %v3380_v41, %s3540_s6 }
 0x627   : > { %v3372_v47 = vpop.permute.xlu1 %3371 }
 0x628   : > { %v3374_v49 = vunpack.i.h.bf16 %v3372_v47  ;;  %v3373_v50 = vunpack.i.l.bf16 %v3372_v47  ;;  %v3367_v22 = vpop.permute.xlu0 %3366 }
 0x629   : > { %v3369_v51 = vunpack.i.h.bf16 %v3367_v22  ;;  %v3368_v54 = vunpack.i.l.bf16 %v3367_v22 }
 0x62a   : > { %v1733_v23 = vsel %vm1164_vm2, %v3258_v18, %v3374_v49  ;;  %v1732_v55 = vsel %vm1164_vm2, %v3257_v16, %v3373_v50 }
 0x62b   : > { %v1751_v56 = vpack.c.bf16 %v1733_v23, %v1732_v55  ;;  %v1731_v52 = vsel %vm1164_vm2, %v1394_v19, %v3369_v51  ;;  %v1730_v57 = vsel %vm1164_vm2, %v1391_v17, %v3368_v54 }
 0x62c   : > { %v1750_v29 = vpack.c.bf16 %v1731_v52, %v1730_v57 }
 0x62e   : > { %3287 = vmatprep.mubr.msk.bf16.mxu0 %vm744_vm0, %v1750_v29 }
 0x62f   : > { %3288 = vmatmul.mubr.msk.bf16.vlgmr.msra.gmra.mrb[28].mxu0 %vm744_vm0, %v1751_v56 }
 0x630   : > { %v3377_v0 = vpop.permute.xlu1 %3376  ;;  %3296 = vmatpush3.bf16.msra.mxu0 %v3393_v38 }
 0x631   : > { %v3379_v1 = vunpack.i.h.bf16 %v3377_v0  ;;  %v3378_v37 = vunpack.i.l.bf16 %v3377_v0  ;;  %3297 = vmatprep.subr.bf16.mxu0 %v3394_v60 }
 0x633   : > { %v1735_v36 = vsel %vm1164_vm2, %v1410_v13, %v3379_v1  ;;  %v1734_v63 = vsel %vm1164_vm2, %v1407_v42, %v3378_v37 }
 0x634   : > { %v1752_v31 = vpack.c.bf16 %v1735_v36, %v1734_v63  ;;  %v3382_v32 = vpop.permute.xlu1 %3381  ;;  %3298 = vmatpush3.bf16.msra.mxu0 %v3394_v60 }
 0x635   : > { %v3384_v40 = vunpack.i.h.bf16 %v3382_v32  ;;  %v3383_v46 = vunpack.i.l.bf16 %v3382_v32 }
 0x636   : > { %3291 = vmatprep.mubr.msk.bf16.mxu0 %vm744_vm0, %v1752_v31 }
 0x637   : > { %v1737_v4 = vsel %vm1164_vm2, %v3262_v20, %v3384_v40  ;;  %v1736_v5 = vsel %vm1164_vm2, %v3261_v14, %v3383_v46 }
 0x638   : > { %v1753_v6 = vpack.c.bf16 %v1737_v4, %v1736_v5 }
 0x63a   : > { %3292 = vmatmul.mubr.msk.bf16.gmra.mrb[32].mxu0 %vm744_vm0, %v1753_v6 }
 0x63b   : > { %3299 = vmatprep.mubr.msk.bf16.mxu0 %vm744_vm0, %v1742_v45 }
 0x642   : > { %3300 = vmatmul.mubr.msk.bf16.vlgmr.msra.gmra.mrb[28].mxu0 %vm744_vm0, %v1743_v24 }
 0x643   : > { %3303 = vmatprep.mubr.msk.bf16.mxu0 %vm744_vm0, %v1744_v11 }
 0x64a   : > { %3304 = vmatmul.mubr.msk.bf16.gmra.mrb[32].mxu0 %vm744_vm0, %v1745_v7 }
 0x715   : > { %v3301_v12 = vpop.f32.mrb[28].mxu0 }
 0x716   : > { %v1901_v43 = vpop.f32.mrb[29].mxu0  ;;  %v4046_v19 = vadd.f32 %v3301_v12, %v3128_v10 }
 0x717   : > { %v4044_v16 = vadd.f32 %v3128_v10, %v1901_v43  ;;  %v3302_v17 = vpop.f32.mrb[30].mxu0  ;;  %v3395_v43 = vld [vmem:[%s4681_s17] sm:$0xff]  }
 0x718   : > { %v1904_v18 = vpop.f32.mrb[31].mxu0  ;;  %v4054_v20 = vadd.f32 %v3302_v17, %v3128_v10  ;;  %v1955_v53 = vsel %vm744_vm0, %v4046_v19, 0.0  ;;  %3307 = vmatprep.subr.bf16.mxu1 %v3395_v43  ;;  %v3396_v17 = vld [vmem:[%s4681_s17 + $0x8] sm:$0xff]  }
 0x719   : > { %v4048_v15 = vadd.f32 %v3128_v10, %v1904_v18  ;;  %v1949_v14 = vsel %vm744_vm0, %v4044_v16, 0.0  ;;  %3308 = vmatpush3.bf16.msra.mxu1 %v3395_v43 }
 0x71a   : > { %1950 = vadd.xlane.f32.xlu0 %v1949_v14  ;;  %v1958_v30 = vsel %vm744_vm0, %v4054_v20, 0.0  ;;  %3309 = vmatprep.subr.bf16.mxu1 %v3396_v17 }
 0x71b   : > { %v1952_v42 = vsel %vm744_vm0, %v4048_v15, 0.0 }
 0x71c   : > { %1953 = vadd.xlane.f32.xlu1 %v1952_v42 }
 0x71d   : > { %v3305_v13 = vpop.f32.mrb[32].mxu0  ;;  %3310 = vmatpush3.bf16.msra.mxu1 %v3396_v17 }
 0x71e   : > { %1956 = vadd.xlane.f32.xlu0 %v1955_v53  ;;  %v1917_v21 = vpop.f32.mrb[33].mxu0  ;;  %v4068_v38 = vadd.f32 %v3305_v13, %v3128_v10 }
 0x71f   : > { %v3306_v62 = vpop.f32.mrb[34].mxu0  ;;  %v4058_v27 = vadd.f32 %v3128_v10, %v1917_v21 }
 0x720   : > { %v1920_v26 = vpop.f32.mrb[35].mxu0  ;;  %v4064_v34 = vadd.f32 %v3306_v62, %v3128_v10  ;;  %v1967_v2 = vsel %vm744_vm0, %v4068_v38, 0.0 }
 0x721   : > { %v4060_v28 = vadd.f32 %v3128_v10, %v1920_v26  ;;  %v1961_v39 = vsel %vm744_vm0, %v4058_v27, 0.0 }
 0x722   : > { %1959 = vadd.xlane.f32.xlu0 %v1958_v30  ;;  %v1970_v41 = vsel %vm744_vm0, %v4064_v34, 0.0 }
 0x723   : > { %v1964_v35 = vsel %vm744_vm0, %v4060_v28, 0.0 }
 0x724   : > { %1965 = vadd.xlane.f32.xlu1 %v1964_v35 }
 0x726   : > { %1962 = vadd.xlane.f32.xlu0 %v1961_v39 }
 0x728   : > { %1971 = vadd.xlane.f32.xlu1 %v1970_v41 }
 0x72a   : > { %1968 = vadd.xlane.f32.xlu0 %v1967_v2 }
 0x7a7   : > { %v1951_v44 = vpop.xlane.xlu0 %1950 }
 0x7a8   : > { %v1973_v47 = vmul.f32 0.03125, %v1951_v44 }
 0x7a9   : > { %v1954_v49 = vpop.xlane.xlu1 %1953 }
 0x7aa   : > { %v4077_v50 = vsub.f32 %v4044_v16, %v1973_v47  ;;  %v1974_v22 = vmul.f32 0.03125, %v1954_v49 }
 0x7ab   : > { %v1957_v51 = vpop.xlane.xlu0 %1956 }
 0x7ac   : > { %v4080_v54 = vsub.f32 %v4048_v15, %v1974_v22  ;;  %v1975_v23 = vmul.f32 0.03125, %v1957_v51  ;;  %v1989_v55 = vmul.f32 %v4077_v50, %v4077_v50  ;;  %v3129_v51 = vld [vmem:[%s4679_s15] ss:$0 sm:$0xff] }
 0x7ae   : > { %v4085_v56 = vsub.f32 %v4046_v19, %v1975_v23  ;;  %v1997_v52 = vsel %vm744_vm0, %v1989_v55, 0.0  ;;  %v1990_v57 = vmul.f32 %v4080_v54, %v4080_v54 }
 0x7af   : > { %v1960_v29 = vpop.xlane.xlu0 %1959  ;;  %1998 = vadd.xlane.f32.xlu0 %v1997_v52 }
 0x7b0   : > { %v1976_v60 = vmul.f32 0.03125, %v1960_v29  ;;  %v2000_v0 = vsel %vm744_vm0, %v1990_v57, 0.0  ;;  %v1991_v1 = vmul.f32 %v4085_v56, %v4085_v56 }
 0x7b1   : > { %2001 = vadd.xlane.f32.xlu1 %v2000_v0  ;;  %v1966_v37 = vpop.xlane.xlu1 %1965 }
 0x7b2   : > { %v4094_v36 = vsub.f32 %v4054_v20, %v1976_v60  ;;  %v1978_v63 = vmul.f32 0.03125, %v1966_v37  ;;  %v2003_v31 = vsel %vm744_vm0, %v1991_v1, 0.0 }
 0x7b3   : > { %2004 = vadd.xlane.f32.xlu0 %v2003_v31  ;;  %v1963_v32 = vpop.xlane.xlu0 %1962 }
 0x7b4   : > { %v4098_v40 = vsub.f32 %v4060_v28, %v1978_v63  ;;  %v1977_v46 = vmul.f32 0.03125, %v1963_v32  ;;  %v1992_v25 = vmul.f32 %v4094_v36, %v4094_v36  ;;  %v3130_v32 = vld [vmem:[%s4680_s16] ss:$0 sm:$0xff] }
 0x7b5   : > { %v1972_v3 = vpop.xlane.xlu1 %1971 }
 0x7b6   : > { %v4103_v45 = vsub.f32 %v4058_v27, %v1977_v46  ;;  %v1980_v4 = vmul.f32 0.03125, %v1972_v3  ;;  %v2006_v5 = vsel %vm744_vm0, %v1992_v25, 0.0  ;;  %v1994_v6 = vmul.f32 %v4098_v40, %v4098_v40 }
 0x7b7   : > { %v1969_v48 = vpop.xlane.xlu0 %1968  ;;  %2007 = vadd.xlane.f32.xlu1 %v2006_v5 }
 0x7b8   : > { %v4109_v8 = vsub.f32 %v4064_v34, %v1980_v4  ;;  %v1979_v24 = vmul.f32 0.03125, %v1969_v48  ;;  %v1993_v58 = vmul.f32 %v4103_v45, %v4103_v45  ;;  %v2012_v33 = vsel %vm744_vm0, %v1994_v6, 0.0 }
 0x7ba   : > { %v4114_v61 = vsub.f32 %v4068_v38, %v1979_v24  ;;  %v2009_v11 = vsel %vm744_vm0, %v1993_v58, 0.0  ;;  %v1996_v59 = vmul.f32 %v4109_v8, %v4109_v8 }
 0x7bb   : > { %2010 = vadd.xlane.f32.xlu0 %v2009_v11  ;;  %2013 = vadd.xlane.f32.xlu1 %v2012_v33 }
 0x7bc   : > { %v1995_v7 = vmul.f32 %v4114_v61, %v4114_v61  ;;  %v2018_v12 = vsel %vm744_vm0, %v1996_v59, 0.0 }
 0x7be   : > { %v2015_v10 = vsel %vm744_vm0, %v1995_v7, 0.0 }
 0x7bf   : > { %2016 = vadd.xlane.f32.xlu0 %v2015_v10  ;;  %2019 = vadd.xlane.f32.xlu1 %v2018_v12 }
 0x83c   : > { %v1999_v18 = vpop.xlane.xlu0 %1998 }
 0x83d   : > { %v2021_v14 = vmul.f32 0.03125, %v1999_v18 }
 0x83e   : > { %v2002_v42 = vpop.xlane.xlu1 %2001 }
 0x83f   : > { %v2029_v13 = vadd.f32 1e-05, %v2021_v14  ;;  %v2022_v53 = vmul.f32 0.03125, %v2002_v42 }
 0x840   : > { %v2005_v21 = vpop.xlane.xlu0 %2004 }
 0x841   : > { %3489 = vrsqrt.f32 %v2029_v13  ;;  %v2030_v62 = vadd.f32 1e-05, %v2022_v53  ;;  %v2023_v26 = vmul.f32 0.03125, %v2005_v21 }
 0x843   : > { %3491 = vrsqrt.f32 %v2030_v62  ;;  %v2031_v30 = vadd.f32 1e-05, %v2023_v26 }
 0x844   : > { %v2008_v35 = vpop.xlane.xlu1 %2007 }
 0x845   : > { %3493 = vrsqrt.f32 %v2031_v30  ;;  %v2024_v39 = vmul.f32 0.03125, %v2008_v35  ;;  %v3399_v35 = vld [vmem:[%s4683_s19 + $0x10] sm:$0xff]  }
 0x847   : > { %v2032_v41 = vadd.f32 1e-05, %v2024_v39  ;;  %v3400_v39 = vld [vmem:[%s4683_s19 + $0x18] sm:$0xff]  }
 0x848   : > { %v2011_v2 = vpop.xlane.xlu0 %2010  ;;  %v2014_v44 = vpop.xlane.xlu1 %2013 }
 0x849   : > { %3495 = vrsqrt.f32 %v2032_v41  ;;  %v2025_v47 = vmul.f32 0.03125, %v2011_v2  ;;  %v2026_v49 = vmul.f32 0.03125, %v2014_v44  ;;  %v3401_v41 = vld [vmem:[%s4683_s19 + $0x20] sm:$0xff]   ;;  %v3402_v2 = vld [vmem:[%s4683_s19 + $0x28] sm:$0xff]   ;;  %v3403_v44 = vld [vmem:[%s4683_s19 + $0x30] sm:$0xff]  }
 0x84b   : > { %v3490_v22 = vpop.eup %3489  ;;  %v2033_v23 = vadd.f32 1e-05, %v2025_v47  ;;  %v2034_v55 = vadd.f32 1e-05, %v2026_v49  ;;  %v3404_v47 = vld [vmem:[%s4683_s19 + $0x38] sm:$0xff]  }
 0x84c   : > { %v2045_v52 = vmul.f32 %v3490_v22, %v4077_v50  ;;  %v2017_v57 = vpop.xlane.xlu0 %2016  ;;  %v2020_v29 = vpop.xlane.xlu1 %2019  ;;  %v3131_v49 = vld [vmem:[%s4682_s18] ss:$0 sm:$0xff] }
 0x84d   : > { %v3492_v60 = vpop.eup %3491  ;;  %3497 = vrsqrt.f32 %v2033_v23  ;;  %v2027_v0 = vmul.f32 0.03125, %v2017_v57  ;;  %v2028_v1 = vmul.f32 0.03125, %v2020_v29 }
 0x84e   : > { %v2046_v37 = vmul.f32 %v3492_v60, %v4080_v54  ;;  %3499 = vrsqrt.f32 %v2034_v55  ;;  %v2059_v63 = vmul.f32 %v3129_v51, %v2045_v52 }
 0x84f   : > { %v3494_v31 = vpop.eup %3493  ;;  %v2035_v46 = vadd.f32 1e-05, %v2027_v0  ;;  %v2036_v25 = vadd.f32 1e-05, %v2028_v1 }
 0x850   : > { %v2047_v3 = vmul.f32 %v3494_v31, %v4085_v56  ;;  %v2060_v50 = vmul.f32 %v3129_v51, %v2046_v37  ;;  %v2073_v4 = vadd.f32 %v3130_v32, %v2059_v63 }
 0x851   : > { %3501 = vrsqrt.f32 %v2035_v46 }
 0x852   : > { %3503 = vrsqrt.f32 %v2036_v25  ;;  %v2074_v5 = vadd.f32 %v3130_v32, %v2060_v50  ;;  %v2061_v48 = vmul.f32 %v3129_v51, %v2047_v3 }
 0x853   : > { %v3496_v6 = vpop.eup %3495 }
 0x854   : > { %v2048_v54 = vmul.f32 %v3496_v6, %v4094_v36  ;;  %v2085_v24 = vpack.c.bf16 %v2074_v5, %v2073_v4  ;;  %v2075_v59 = vadd.f32 %v3130_v32, %v2061_v48 }
 0x856   : > { %v2062_v58 = vmul.f32 %v3129_v51, %v2048_v54  ;;  %3311 = vmatprep.mubr.msk.bf16.mxu1 %vm744_vm0, %v2085_v24 }
 0x857   : > { %v3498_v11 = vpop.eup %3497 }
 0x858   : > { %v3500_v33 = vpop.eup %3499  ;;  %v2076_v7 = vadd.f32 %v3130_v32, %v2062_v58  ;;  %v2049_v10 = vmul.f32 %v3498_v11, %v4103_v45 }
 0x859   : > { %v2050_v56 = vmul.f32 %v3500_v33, %v4098_v40 }
 0x85a   : > { %v2086_v12 = vpack.c.bf16 %v2076_v7, %v2075_v59  ;;  %v2063_v43 = vmul.f32 %v3129_v51, %v2049_v10 }
 0x85b   : > { %v3502_v17 = vpop.eup %3501  ;;  %v2064_v18 = vmul.f32 %v3129_v51, %v2050_v56 }
 0x85c   : > { %v3504_v14 = vpop.eup %3503  ;;  %v2051_v42 = vmul.f32 %v3502_v17, %v4114_v61  ;;  %3312 = vmatmul.mubr.msk.bf16.vlgmr.msra.gmra.mrb[20].mxu1 %vm744_vm0, %v2086_v12  ;;  %v2077_v36 = vadd.f32 %v3130_v32, %v2063_v43  ;;  %v3397_v61 = vld [vmem:[%s4683_s19] sm:$0xff]  }
 0x85d   : > { %v2052_v13 = vmul.f32 %v3504_v14, %v4109_v8  ;;  %v2078_v53 = vadd.f32 %v3130_v32, %v2064_v18  ;;  %3319 = vmatprep.subr.bf16.mxu1 %v3397_v61  ;;  %v3398_v8 = vld [vmem:[%s4683_s19 + $0x8] sm:$0xff]  }
 0x85e   : > { %v2065_v21 = vmul.f32 %v3129_v51, %v2051_v42  ;;  %3320 = vmatpush3.bf16.msra.mxu1 %v3397_v61 }
 0x85f   : > { %v2087_v62 = vpack.c.bf16 %v2078_v53, %v2077_v36  ;;  %v2066_v26 = vmul.f32 %v3129_v51, %v2052_v13  ;;  %3321 = vmatprep.subr.bf16.mxu1 %v3398_v8 }
 0x860   : > { %v2079_v30 = vadd.f32 %v3130_v32, %v2065_v21 }
 0x861   : > { %3315 = vmatprep.mubr.msk.bf16.mxu1 %vm744_vm0, %v2087_v62  ;;  %v2080_v40 = vadd.f32 %v3130_v32, %v2066_v26 }
 0x862   : > { %3322 = vmatpush3.bf16.msra.mxu1 %v3398_v8 }
 0x863   : > { %v2088_v45 = vpack.c.bf16 %v2080_v40, %v2079_v30  ;;  %3323 = vmatprep.subr.bf16.mxu1 %v3399_v35 }
 0x865   : > { %3316 = vmatmul.mubr.msk.bf16.gmra.mrb[24].mxu1 %vm744_vm0, %v2088_v45 }
 0x866   : > { %3324 = vmatpush3.bf16.msra.mxu1 %v3399_v35 }
 0x867   : > { %3325 = vmatprep.subr.bf16.mxu1 %v3400_v39 }
 0x86a   : > { %3326 = vmatpush3.bf16.msra.mxu1 %v3400_v39 }
 0x86b   : > { %3327 = vmatprep.subr.bf16.mxu1 %v3401_v41 }
 0x86e   : > { %3328 = vmatpush3.bf16.msra.mxu1 %v3401_v41 }
 0x86f   : > { %3329 = vmatprep.subr.bf16.mxu1 %v3402_v2 }
 0x872   : > { %3330 = vmatpush3.bf16.msra.mxu1 %v3402_v2 }
 0x873   : > { %3331 = vmatprep.subr.bf16.mxu1 %v3403_v44 }
 0x876   : > { %3332 = vmatpush3.bf16.msra.mxu1 %v3403_v44 }
 0x877   : > { %3333 = vmatprep.subr.bf16.mxu1 %v3404_v47 }
 0x87a   : > { %3334 = vmatpush3.bf16.msra.mxu1 %v3404_v47 }
 0x92f   : > { %v3313_v22 = vpop.f32.mrb[20].mxu1 }
 0x930   : > { %v4175_v51 = vadd.f32 %v3313_v22, %v3131_v49  ;;  %v2154_v23 = vpop.f32.mrb[21].mxu1 }
 0x931   : > { %v4177_v55 = vadd.f32 %v3131_v49, %v2154_v23  ;;  %v3314_v52 = vpop.f32.mrb[22].mxu1 }
 0x932   : > { %v2195_v57 = vmul.f32 0.044715, %v4175_v51  ;;  %v4180_v29 = vadd.f32 %v3314_v52, %v3131_v49  ;;  %v2157_v60 = vpop.f32.mrb[23].mxu1 }
 0x933   : > { %v2193_v0 = vmul.f32 0.044715, %v4177_v55  ;;  %v4183_v1 = vadd.f32 %v3131_v49, %v2157_v60 }
 0x934   : > { %v2203_v37 = vmul.f32 %v2195_v57, %v4175_v51  ;;  %v2196_v63 = vmul.f32 0.044715, %v4180_v29 }
 0x935   : > { %v2201_v31 = vmul.f32 %v2193_v0, %v4177_v55  ;;  %v2194_v32 = vmul.f32 0.044715, %v4183_v1 }
 0x936   : > { %v2211_v46 = vmul.f32 %v2203_v37, %v4175_v51  ;;  %v2204_v25 = vmul.f32 %v2196_v63, %v4180_v29  ;;  %v2187_v63 = vmul.f32 0.5, %v4175_v51 }
 0x937   : > { %v2209_v3 = vmul.f32 %v2201_v31, %v4177_v55  ;;  %v2202_v50 = vmul.f32 %v2194_v32, %v4183_v1  ;;  %v2188_v31 = vmul.f32 0.5, %v4180_v29 }
 0x938   : > { %v2219_v4 = vadd.f32 %v2211_v46, %v4175_v51  ;;  %v2212_v5 = vmul.f32 %v2204_v25, %v4180_v29  ;;  %v3317_v6 = vpop.f32.mrb[24].mxu1  ;;  %v2185_v46 = vmul.f32 0.5, %v4177_v55  ;;  %v2186_v25 = vmul.f32 0.5, %v4183_v1 }
 0x939   : > { %v2210_v48 = vmul.f32 %v2202_v50, %v4183_v1  ;;  %v4196_v54 = vadd.f32 %v3317_v6, %v3131_v49  ;;  %v2170_v24 = vpop.f32.mrb[25].mxu1  ;;  %v2217_v58 = vadd.f32 %v2209_v3, %v4177_v55 }
 0x93a   : > { %v2227_v11 = vmul.f32 0.7978846, %v2219_v4  ;;  %v2220_v33 = vadd.f32 %v2212_v5, %v4180_v29  ;;  %v4200_v59 = vadd.f32 %v3131_v49, %v2170_v24  ;;  %v3318_v7 = vpop.f32.mrb[26].mxu1 }
 0x93b   : > { %v2199_v10 = vmul.f32 0.044715, %v4196_v54  ;;  %v2182_v56 = vadd.f32 %v3318_v7, %v3131_v49  ;;  %v2173_v12 = vpop.f32.mrb[27].mxu1  ;;  %v2218_v43 = vadd.f32 %v2210_v48, %v4183_v1  ;;  %v2225_v17 = vmul.f32 0.7978846, %v2217_v58 }
 0x93c   : > { %3505 = vtanh.f32 %v2227_v11  ;;  %v2228_v18 = vmul.f32 0.7978846, %v2220_v33  ;;  %v2197_v14 = vmul.f32 0.044715, %v4200_v59  ;;  %v2174_v42 = vadd.f32 %v3131_v49, %v2173_v12 }
 0x93d   : > { %v2207_v36 = vmul.f32 %v2199_v10, %v4196_v54  ;;  %v2200_v13 = vmul.f32 0.044715, %v2182_v56  ;;  %v2226_v53 = vmul.f32 0.7978846, %v2218_v43  ;;  %3507 = vtanh.f32 %v2225_v17 }
 0x93e   : > { %3509 = vtanh.f32 %v2228_v18  ;;  %v2205_v21 = vmul.f32 %v2197_v14, %v4200_v59  ;;  %v2198_v62 = vmul.f32 0.044715, %v2174_v42  ;;  %v2191_v10 = vmul.f32 0.5, %v4196_v54 }
 0x93f   : > { %v2215_v26 = vmul.f32 %v2207_v36, %v4196_v54  ;;  %v2208_v30 = vmul.f32 %v2200_v13, %v2182_v56  ;;  %3511 = vtanh.f32 %v2226_v53  ;;  %v2192_v55 = vmul.f32 0.5, %v2182_v56 }
 0x940   : > { %v2213_v40 = vmul.f32 %v2205_v21, %v4200_v59  ;;  %v2206_v45 = vmul.f32 %v2198_v62, %v2174_v42  ;;  %v2189_v1 = vmul.f32 0.5, %v4200_v59  ;;  %v2190_v43 = vmul.f32 0.5, %v2174_v42 }
 0x941   : > { %v2216_v61 = vmul.f32 %v2208_v30, %v2182_v56  ;;  %v2223_v8 = vadd.f32 %v2215_v26, %v4196_v54  ;;  %v2462_v62 = vlaneseq  ;;  %v2459_v54 = vld [vmem:[%s4685_s21] sm:$0x7] }
 0x942   : > { %v2214_v35 = vmul.f32 %v2206_v45, %v2174_v42  ;;  %v2221_v39 = vadd.f32 %v2213_v40, %v4200_v59  ;;  %v2422_v40 = vrot.slane %v3537_v9, 7 }
 0x943   : > { %v2224_v41 = vadd.f32 %v2216_v61, %v2182_v56  ;;  %v2231_v2 = vmul.f32 0.7978846, %v2223_v8  ;;  %v2463_v26 = vshrl.u32 %v2462_v62, 7 }
 0x944   : > { %v2222_v44 = vadd.f32 %v2214_v35, %v2174_v42  ;;  %v2229_v47 = vmul.f32 0.7978846, %v2221_v39  ;;  %v2441_v42 = vsel %vm2440_vm3, 0.0, %v2422_v40  ;;  %v2450_v45 = vsel %vm2440_vm3, %v2422_v40, 0.0 }
 0x945   : > { %v2232_v49 = vmul.f32 0.7978846, %v2224_v41  ;;  %3513 = vtanh.f32 %v2231_v2  ;;  %v2476_v30 = vsub.s32 1, %v2463_v26  ;;  %v2553_v56 = vsub.s32 2, %v2463_v26 }
 0x946   : > { %v3506_v22 = vpop.eup %3505  ;;  %v2230_v23 = vmul.f32 0.7978846, %v2222_v44  ;;  %3515 = vtanh.f32 %v2229_v47  ;;  %v2464_v61 = vsub.s32 0, %v2463_v26 }
 0x947   : > { %v3508_v52 = vpop.eup %3507  ;;  %v2243_v57 = vadd.f32 1.0, %v3506_v22  ;;  %3517 = vtanh.f32 %v2232_v49  ;;  %v4221_v59 = vrot.slane %v2459_v54, %v2476_v30  ;;  %v4225_v8 = vrot.slane %v2459_v54, %v2553_v56  ;;  %v2461_v49 = vld [vmem:[%s4685_s21 + $0x8] sm:$0x7] }
 0x948   : > { %v3510_v60 = vpop.eup %3509  ;;  %v2241_v0 = vadd.f32 1.0, %v3508_v52  ;;  %3519 = vtanh.f32 %v2230_v23  ;;  %v4229_v9 = vrot.slane %v2459_v54, %v2464_v61 }
 0x949   : > { %v3512_v37 = vpop.eup %3511  ;;  %v2244_v32 = vadd.f32 1.0, %v3510_v60  ;;  %v2251_v50 = vmul.f32 %v2243_v57, %v2187_v63  ;;  %v2478_v35 = vmul.f32 %v4221_v59, %v2441_v42  ;;  %v2479_v39 = vmul.f32 %v4221_v59, %v2450_v45 }
 0x94a   : > { %v2242_v3 = vadd.f32 1.0, %v3512_v37  ;;  %v2249_v5 = vmul.f32 %v2241_v0, %v2185_v46  ;;  %v2555_v44 = vmul.f32 %v4225_v8, %v2441_v42  ;;  %v2556_v47 = vmul.f32 %v4225_v8, %v2450_v45  ;;  %v4241_v0 = vld [vmem:[%s4684_s20] ss:$0 sm:$0xff] }
 0x94b   : > { %v2252_v4 = vmul.f32 %v2244_v32, %v2188_v31  ;;  %v2511_v41 = vrot.slane %v2478_v35, 1  ;;  %v2512_v2 = vrot.slane %v2479_v39, 1  ;;  %v2466_v22 = vmul.f32 %v4229_v9, %v2441_v42  ;;  %v2460_v31 = vld [vmem:[%s4685_s21 + $0x4] sm:$0x7] }
 0x94c   : > { %v2250_v6 = vmul.f32 %v2242_v3, %v2186_v25  ;;  %v2588_v52 = vrot.slane %v2555_v44, 2  ;;  %v2589_v57 = vrot.slane %v2556_v47, 2  ;;  %v4243_v37 = vrot.slane %v2461_v49, %v2476_v30 }
 0x94d   : > { %v2274_v48 = vpack.c.bf16 %v2252_v4, %v2251_v50  ;;  %v2513_v23 = vsel %vm2510_vm4, %v2511_v41, %v2512_v2 }
 0x94e   : > { %v2273_v24 = vpack.c.bf16 %v2250_v6, %v2249_v5  ;;  %v2543_v46 = vadd.f32 %v2513_v23, %v2466_v22  ;;  %v2590_v25 = vsel %vm2587_vm5, %v2588_v52, %v2589_v57  ;;  %v4251_v50 = vmul.f32 %v4243_v37, %v2441_v42 }
 0x94f   : > { %v3514_v58 = vpop.eup %3513  ;;  %v4255_v6 = vrot.slane %v2461_v49, %v2464_v61 }
 0x950   : > { %v3516_v11 = vpop.eup %3515  ;;  %3335 = vmatprep.mubr.bf16.mxu1 %v2273_v24  ;;  %v2247_v33 = vadd.f32 1.0, %v3514_v58  ;;  %v4259_v24 = vrot.slane %v2460_v31, %v2553_v56  ;;  %v4261_v58 = vrot.slane %v2461_v49, %v2553_v56 }
 0x951   : > { %v3518_v7 = vpop.eup %3517  ;;  %3336 = vmatmul.mubr.bf16.vlgmr.msra.gmra.mrb[28].mxu1 %v2274_v48  ;;  %v2245_v51 = vadd.f32 1.0, %v3516_v11 }
 0x952   : > { %v3520_v29 = vpop.eup %3519  ;;  %v2248_v12 = vadd.f32 1.0, %v3518_v7  ;;  %v2255_v18 = vmul.f32 %v2247_v33, %v2191_v10  ;;  %v4263_v33 = vadd.f32 %v2590_v25, %v2543_v46  ;;  %v4265_v7 = vrot.slane %v2460_v31, %v2464_v61 }
 0x953   : > { %v2246_v17 = vadd.f32 1.0, %v3520_v29  ;;  %v2253_v36 = vmul.f32 %v2245_v51, %v2189_v1  ;;  %v4268_v51 = vmul.f32 %v4255_v6, %v2441_v42  ;;  %v2877_v10 = vrot.slane %v4251_v50, 1 }
 0x954   : > { %v2256_v14 = vmul.f32 %v2248_v12, %v2192_v55  ;;  %v4276_v55 = vmul.f32 %v4261_v58, %v2441_v42 }
 0x955   : > { %v2254_v13 = vmul.f32 %v2246_v17, %v2190_v43  ;;  %v4284_v17 = vmul.f32 %v4261_v58, %v2450_v45 }
 0x956   : > { %v2276_v53 = vpack.c.bf16 %v2256_v14, %v2255_v18 }
 0x957   : > { %v2275_v21 = vpack.c.bf16 %v2254_v13, %v2253_v36 }
 0x959   : > { %3339 = vmatprep.mubr.bf16.mxu1 %v2275_v21 }
 0x95a   : > { %3340 = vmatmul.mubr.bf16.gmra.mrb[32].mxu1 %v2276_v53 }
 0xa24   : > { %v3337_v60 = vpop.f32.mrb[28].mxu1 }
 0xa25   : > { %v2392_v63 = vadd.f32 %v3337_v60, %v4046_v19  ;;  %v2359_v32 = vpop.f32.mrb[29].mxu1  ;;  %v4257_v19 = vrot.slane %v2460_v31, %v2476_v30 }
 0xa26   : > { %v3338_v3 = vpop.f32.mrb[30].mxu1  ;;  %v2390_v5 = vadd.f32 %v2359_v32, %v4044_v16  ;;  %v4272_v16 = vmul.f32 %v4243_v37, %v2450_v45 }
 0xa27   : > { %v2407_v4 = vadd.f32 %v4241_v0, %v2392_v63  ;;  %v2362_v48 = vpop.f32.mrb[31].mxu1  ;;  %v2393_v29 = vadd.f32 %v3338_v3, %v4054_v20 }
 0xa28   : > { %v2405_v43 = vadd.f32 %v4241_v0, %v2390_v5  ;;  %v2391_v36 = vadd.f32 %v2362_v48, %v4048_v15  ;;  %v2878_v52 = vrot.slane %v4272_v16, 1 }
 0xa29   : > { %v2425_v11 = vrot.slane %v2407_v4, 7  ;;  %v2408_v56 = vadd.f32 %v4241_v0, %v2393_v29 }
 0xa2a   : > { %v2423_v35 = vrot.slane %v2405_v43, 7  ;;  %v4317_v31 = vadd.f32 %v4241_v0, %v2391_v36 }
 0xa2b   : > { %v4279_v12 = vsel %vm2440_vm3, 0.0, %v2425_v11  ;;  %v2453_v1 = vsel %vm2440_vm3, %v2425_v11, 0.0  ;;  %v2426_v63 = vrot.slane %v2408_v56, 7 }
 0xa2c   : > { %v2484_v20 = vmul.f32 %v4221_v59, %v4279_v12  ;;  %v2485_v18 = vmul.f32 %v4221_v59, %v2453_v1  ;;  %v2561_v14 = vmul.f32 %v4225_v8, %v4279_v12  ;;  %v2562_v13 = vmul.f32 %v4225_v8, %v2453_v1 }
 0xa2d   : > { %v2656_v53 = vmul.f32 %v4257_v19, %v4279_v12  ;;  %v2657_v21 = vmul.f32 %v4257_v19, %v2453_v1  ;;  %v2732_v62 = vmul.f32 %v4259_v24, %v4279_v12  ;;  %v4298_v26 = vpop.f32.mrb[32].mxu1  ;;  %v2733_v54 = vmul.f32 %v4259_v24, %v2453_v1 }
 0xa2e   : > { %v2520_v30 = vrot.slane %v2484_v20, 1  ;;  %v2521_v40 = vrot.slane %v2485_v18, 1  ;;  %v4302_v42 = vpop.f32.mrb[33].mxu1  ;;  %v2597_v15 = vrot.slane %v2561_v14, 2  ;;  %v2598_v45 = vrot.slane %v2562_v13, 2 }
 0xa2f   : > { %v2690_v61 = vrot.slane %v2656_v53, 1  ;;  %v4304_v39 = vpop.f32.mrb[34].mxu1  ;;  %v2691_v2 = vrot.slane %v2657_v21, 1  ;;  %v2766_v44 = vrot.slane %v2732_v62, 2  ;;  %v2767_v47 = vrot.slane %v2733_v54, 2 }
 0xa30   : > { %v2522_v41 = vsel %vm2510_vm4, %v2520_v30, %v2521_v40  ;;  %v4307_v49 = vpop.f32.mrb[35].mxu1  ;;  %v2469_v22 = vmul.f32 %v4229_v9, %v4279_v12  ;;  %v2826_v23 = vmul.f32 %v4243_v37, %v4279_v12  ;;  %v2827_v60 = vmul.f32 %v4243_v37, %v2453_v1 }
 0xa31   : > { %v2599_v25 = vsel %vm2587_vm5, %v2597_v15, %v2598_v45  ;;  %v2442_v3 = vsel %vm2440_vm3, 0.0, %v2423_v35  ;;  %v2451_v4 = vsel %vm2440_vm3, %v2423_v35, 0.0  ;;  %v4324_v5 = vsel %vm2510_vm4, %v2690_v61, %v2691_v2 }
 0xa32   : > { %v2546_v46 = vadd.f32 %v2522_v41, %v2469_v22  ;;  %v4327_v48 = vsel %vm2587_vm5, %v2766_v44, %v2767_v47  ;;  %v2902_v11 = vmul.f32 %v4261_v58, %v4279_v12  ;;  %v2480_v29 = vmul.f32 %v4221_v59, %v2442_v3 }
 0xa33   : > { %v2859_v43 = vrot.slane %v2826_v23, 1  ;;  %v2903_v20 = vmul.f32 %v4261_v58, %v2453_v1  ;;  %v2481_v18 = vmul.f32 %v4221_v59, %v2451_v4  ;;  %v2557_v14 = vmul.f32 %v4225_v8, %v2442_v3 }
 0xa34   : > { %v2514_v36 = vrot.slane %v2480_v29, 1  ;;  %v2632_v13 = vmul.f32 %v4265_v7, %v2442_v3  ;;  %v2652_v53 = vmul.f32 %v4257_v19, %v2442_v3  ;;  %v2653_v21 = vmul.f32 %v4257_v19, %v2451_v4 }
 0xa35   : > { %v2623_v62 = vadd.f32 %v2599_v25, %v2546_v46  ;;  %v2860_v30 = vrot.slane %v2827_v60, 1  ;;  %v2515_v40 = vrot.slane %v2481_v18, 1  ;;  %v2558_v54 = vmul.f32 %v4225_v8, %v2451_v4 }
 0xa36   : > { %v2935_v56 = vrot.slane %v2902_v11, 2  ;;  %v2684_v15 = vrot.slane %v2652_v53, 1  ;;  %v2685_v45 = vrot.slane %v2653_v21, 1  ;;  %v2728_v1 = vmul.f32 %v4259_v24, %v2442_v3 }
 0xa37   : > { %v2516_v61 = vsel %vm2510_vm4, %v2514_v36, %v2515_v40  ;;  %v2729_v35 = vmul.f32 %v4259_v24, %v2451_v4  ;;  %v2445_v41 = vsel %vm2440_vm3, 0.0, %v2426_v63  ;;  %v2454_v2 = vsel %vm2440_vm3, %v2426_v63, 0.0 }
 0xa38   : > { %v2936_v44 = vrot.slane %v2903_v20, 2  ;;  %v2467_v47 = vmul.f32 %v4229_v9, %v2442_v3  ;;  %v2591_v22 = vrot.slane %v2557_v14, 2  ;;  %v2640_v23 = vadd.f32 %v2632_v13, %v4263_v33 }
 0xa39   : > { %v2592_v60 = vrot.slane %v2558_v54, 2  ;;  %v2686_v46 = vsel %vm2510_vm4, %v2684_v15, %v2685_v45  ;;  %v2486_v25 = vmul.f32 %v4221_v59, %v2445_v41  ;;  %v2487_v11 = vmul.f32 %v4221_v59, %v2454_v2 }
 0xa3a   : > { %v2544_v29 = vadd.f32 %v2516_v61, %v2467_v47  ;;  %v2760_v18 = vrot.slane %v2728_v1, 2  ;;  %v2563_v4 = vmul.f32 %v4225_v8, %v2445_v41  ;;  %v2564_v36 = vmul.f32 %v4225_v8, %v2454_v2 }
 0xa3b   : > { %v2761_v63 = vrot.slane %v2729_v35, 2  ;;  %v2523_v20 = vrot.slane %v2486_v25, 1  ;;  %v2524_v53 = vrot.slane %v2487_v11, 1  ;;  %v2635_v3 = vmul.f32 %v4265_v7, %v2445_v41 }
 0xa3c   : > { %v2716_v14 = vadd.f32 %v2686_v46, %v2640_v23  ;;  %v2600_v33 = vrot.slane %v2563_v4, 2  ;;  %v2658_v13 = vmul.f32 %v4257_v19, %v2445_v41  ;;  %v2659_v21 = vmul.f32 %v4257_v19, %v2454_v2 }
 0xa3d   : > { %v2601_v40 = vrot.slane %v2564_v36, 2  ;;  %v2643_v54 = vadd.f32 %v2635_v3, %v2623_v62  ;;  %v2734_v15 = vmul.f32 %v4259_v24, %v2445_v41  ;;  %v2735_v45 = vmul.f32 %v4259_v24, %v2454_v2 }
 0xa3e   : > { %v4357_v1 = vsel %vm2510_vm4, %v2859_v43, %v2860_v30  ;;  %v2525_v61 = vsel %vm2510_vm4, %v2523_v20, %v2524_v53  ;;  %v2693_v35 = vrot.slane %v2658_v13, 1  ;;  %v2694_v47 = vrot.slane %v2659_v21, 1 }
 0xa3f   : > { %v2593_v23 = vsel %vm2587_vm5, %v2591_v22, %v2592_v60  ;;  %v2470_v46 = vmul.f32 %v4229_v9, %v2445_v41  ;;  %v2769_v25 = vrot.slane %v2734_v15, 2  ;;  %v2770_v11 = vrot.slane %v2735_v45, 2 }
 0xa40   : > { %v4363_v4 = vsel %vm2587_vm5, %v2935_v56, %v2936_v44  ;;  %v2621_v62 = vadd.f32 %v2593_v23, %v2544_v29  ;;  %v2762_v36 = vsel %vm2587_vm5, %v2760_v18, %v2761_v63  ;;  %v2695_v3 = vsel %vm2510_vm4, %v2693_v35, %v2694_v47 }
 0xa41   : > { %v2792_v43 = vadd.f32 %v2762_v36, %v2716_v14  ;;  %v4367_v30 = vadd.f32 %v2525_v61, %v2470_v46  ;;  %v4370_v20 = vsel %vm2587_vm5, %v2600_v33, %v2601_v40  ;;  %v2719_v53 = vadd.f32 %v2695_v3, %v2643_v54 }
 0xa42   : > { %v2771_v22 = vsel %vm2587_vm5, %v2769_v25, %v2770_v11  ;;  %v4374_v60 = vmul.f32 %v4255_v6, %v2445_v41  ;;  %v4377_v56 = vmul.f32 %v4243_v37, %v2445_v41  ;;  %v2424_v44 = vrot.slane %v4317_v31, 7 }
 0xa43   : > { %v4380_v29 = vadd.f32 %v2771_v22, %v2719_v53  ;;  %v4383_v18 = vmul.f32 %v4243_v37, %v2454_v2  ;;  %v4386_v63 = vmul.f32 %v4261_v58, %v2445_v41  ;;  %v4389_v14 = vmul.f32 %v4261_v58, %v2454_v2 }
 0xa44   : > { %v2443_v33 = vsel %vm2440_vm3, 0.0, %v2424_v44  ;;  %v2452_v13 = vsel %vm2440_vm3, %v2424_v44, 0.0  ;;  %v2634_v21 = vmul.f32 %v4265_v7, %v4279_v12  ;;  %v2396_v31 = vadd.f32 %v4298_v26, %v4068_v38 }
 0xa45   : > { %v2468_v40 = vmul.f32 %v4229_v9, %v2443_v33  ;;  %v2482_v54 = vmul.f32 %v4221_v59, %v2443_v33  ;;  %v2483_v41 = vmul.f32 %v4221_v59, %v2452_v13  ;;  %v2394_v2 = vadd.f32 %v4302_v42, %v4058_v27 }
 0xa46   : > { %v2559_v15 = vmul.f32 %v4225_v8, %v2443_v33  ;;  %v2560_v45 = vmul.f32 %v4225_v8, %v2452_v13  ;;  %v2633_v61 = vmul.f32 %v4265_v7, %v2443_v33  ;;  %v2654_v35 = vmul.f32 %v4257_v19, %v2443_v33 }
 0xa47   : > { %v2517_v47 = vrot.slane %v2482_v54, 1  ;;  %v2518_v23 = vrot.slane %v2483_v41, 1  ;;  %v2655_v38 = vmul.f32 %v4257_v19, %v2452_v13  ;;  %v2730_v26 = vmul.f32 %v4259_v24, %v2443_v33 }
 0xa48   : > { %v2594_v46 = vrot.slane %v2559_v15, 2  ;;  %v2595_v25 = vrot.slane %v2560_v45, 2  ;;  %v2641_v11 = vadd.f32 %v2633_v61, %v2621_v62  ;;  %v2687_v36 = vrot.slane %v2654_v35, 1 }
 0xa49   : > { %v2519_v27 = vsel %vm2510_vm4, %v2517_v47, %v2518_v23  ;;  %v2688_v42 = vrot.slane %v2655_v38, 1  ;;  %v2731_v3 = vmul.f32 %v4259_v24, %v2452_v13  ;;  %v2763_v53 = vrot.slane %v2730_v26, 2 }
 0xa4a   : > { %v2545_v22 = vadd.f32 %v2519_v27, %v2468_v40  ;;  %v2596_v44 = vsel %vm2587_vm5, %v2594_v46, %v2595_v25  ;;  %v2804_v54 = vmul.f32 %v4255_v6, %v2443_v33  ;;  %v2824_v41 = vmul.f32 %v4243_v37, %v2443_v33 }
 0xa4b   : > { %v2689_v57 = vsel %vm2510_vm4, %v2687_v36, %v2688_v42  ;;  %v2764_v32 = vrot.slane %v2731_v3, 2  ;;  %v2825_v15 = vmul.f32 %v4243_v37, %v2452_v13  ;;  %v2900_v62 = vmul.f32 %v4261_v58, %v2443_v33 }
 0xa4c   : > { %v2622_v45 = vadd.f32 %v2596_v44, %v2545_v22  ;;  %v2717_v61 = vadd.f32 %v2689_v57, %v2641_v11  ;;  %v2812_v35 = vadd.f32 %v2804_v54, %v2792_v43  ;;  %v2856_v47 = vrot.slane %v2824_v41, 1 }
 0xa4d   : > { %v2765_v23 = vsel %vm2587_vm5, %v2763_v53, %v2764_v32  ;;  %v2857_v40 = vrot.slane %v2825_v15, 1  ;;  %v2901_v38 = vmul.f32 %v4261_v58, %v2452_v13  ;;  %v2932_v26 = vrot.slane %v2900_v62, 2 }
 0xa4e   : > { %v2642_v46 = vadd.f32 %v2634_v21, %v2622_v45  ;;  %v2793_v25 = vadd.f32 %v2765_v23, %v2717_v61  ;;  %v2805_v36 = vmul.f32 %v4255_v6, %v4279_v12  ;;  %v2411_v27 = vadd.f32 %v4241_v0, %v2396_v31 }
 0xa4f   : > { %v2862_v42 = vrot.slane %v4377_v56, 1  ;;  %v2863_v33 = vrot.slane %v4383_v18, 1  ;;  %v2858_v57 = vsel %vm2510_vm4, %v2856_v47, %v2857_v40  ;;  %v2933_v43 = vrot.slane %v2901_v38, 2  ;;  %v4431_v56 = vld [vmem:[%s4686_s22] ss:$0 sm:$0xff] }
 0xa50   : > { %v2718_v32 = vadd.f32 %v4324_v5, %v2642_v46  ;;  %v2813_v11 = vadd.f32 %v2805_v36, %v2793_v25  ;;  %v2888_v3 = vadd.f32 %v2858_v57, %v2812_v35  ;;  %v2429_v13 = vrot.slane %v2411_v27, 7 }
 0xa51   : > { %v2938_v21 = vrot.slane %v4386_v63, 2  ;;  %v2939_v53 = vrot.slane %v4389_v14, 2  ;;  %v2934_v12 = vsel %vm2587_vm5, %v2932_v26, %v2933_v43  ;;  %v2409_v18 = vadd.f32 %v4241_v0, %v2394_v2 }
 0xa52   : > { %v2794_v31 = vadd.f32 %v4327_v48, %v2718_v32  ;;  %v2889_v5 = vadd.f32 %v4357_v1, %v2813_v11  ;;  %v2964_v22 = vadd.f32 %v2934_v12, %v2888_v3  ;;  %v4437_v44 = vsel %vm2440_vm3, 0.0, %v2429_v13 }
 0xa53   : > { %v2864_v63 = vsel %vm2510_vm4, %v2862_v42, %v2863_v33  ;;  %v2457_v14 = vsel %vm2440_vm3, %v2429_v13, 0.0  ;;  %v2492_v54 = vmul.f32 %v4221_v59, %v4437_v44  ;;  %v2664_v41 = vmul.f32 %v4257_v19, %v4437_v44 }
 0xa54   : > { %v2814_v2 = vadd.f32 %v4374_v60, %v2794_v31  ;;  %v2965_v48 = vadd.f32 %v4363_v4, %v2889_v5  ;;  %v2979_v1 = vadd.f32 %v4431_v56, %v2964_v22  ;;  %v2493_v15 = vmul.f32 %v4221_v59, %v2457_v14 }
 0xa55   : > { %v2940_v62 = vsel %vm2587_vm5, %v2938_v21, %v2939_v53  ;;  %v2665_v45 = vmul.f32 %v4257_v19, %v2457_v14  ;;  %v2397_v60 = vadd.f32 %v4304_v39, %v4064_v34  ;;  %v2395_v4 = vadd.f32 %v4307_v49, %v4060_v28 }
 0xa56   : > { %v2890_v61 = vadd.f32 %v2864_v63, %v2814_v2  ;;  %v2980_v35 = vadd.f32 %v4431_v56, %v2965_v48  ;;  %v2987_v47 = vmax.f32 %v2979_v1, 0.0  ;;  %v2427_v23 = vrot.slane %v2409_v18, 7 }
 0xa57   : > { %v2532_v40 = vrot.slane %v2492_v54, 1  ;;  %v4464_v38 = vmul.f32 %v4225_v8, %v2457_v14  ;;  %v2702_v26 = vrot.slane %v2664_v41, 1  ;;  %v4468_v46 = vmul.f32 %v4259_v24, %v4437_v44 }
 0xa58   : > { %v2966_v25 = vadd.f32 %v2940_v62, %v2890_v61  ;;  %v2988_v34 = vmax.f32 %v2980_v35, 0.0  ;;  %2995 = vst.msk [vmem:[%s4454_s27] sm:$0xff] %vm744_vm0, %v2987_v47  ;;  %v2533_v28 = vrot.slane %v2493_v15, 1  ;;  %v2703_v39 = vrot.slane %v2665_v45, 1 }
 0xa59   : > { %v2624_v49 = vadd.f32 %v4370_v20, %v4367_v30  ;;  %v4475_v36 = vmul.f32 %v4259_v24, %v2457_v14  ;;  %v4482_v27 = vsel %vm2510_vm4, %v2877_v10, %v2878_v52  ;;  %v4705_v42 = vrot.slane %v4284_v17, 2 }
 0xa5a   : > { %v4706_v33 = vrot.slane %v4276_v55, 2  ;;  %v2981_v43 = vadd.f32 %v4431_v56, %v2966_v25  ;;  %2996 = vst.msk [vmem:[%s4454_s27 + $0x8] sm:$0xff] %vm744_vm0, %v2988_v34  ;;  %v4496_v16 = vmul.f32 %v4243_v37, %v4437_v44  ;;  %v2446_v50 = vsel %vm2440_vm3, 0.0, %v2427_v23 }
 0xa5b   : > { %v2412_v10 = vadd.f32 %v4241_v0, %v2397_v60  ;;  %v2610_v17 = vrot.slane %v4464_v38, 2  ;;  %v2778_v55 = vrot.slane %v4468_v46, 2  ;;  %v2455_v52 = vsel %vm2440_vm3, %v2427_v23, 0.0 }
 0xa5c   : > { %v4489_v57 = vsel %vm2587_vm5, %v4706_v33, %v4705_v42  ;;  %v4504_v30 = vadd.f32 %v4241_v0, %v2395_v4  ;;  %v2989_v20 = vmax.f32 %v2981_v43, 0.0  ;;  %v2534_v32 = vsel %vm2510_vm4, %v2532_v40, %v2533_v28 }
 0xa5d   : > { %v4508_v11 = vsel %vm2510_vm4, %v2702_v26, %v2703_v39  ;;  %v2488_v3 = vmul.f32 %v4221_v59, %v2446_v50  ;;  %v2779_v13 = vrot.slane %v4475_v36, 2  ;;  %v4513_v21 = vmul.f32 %v4243_v37, %v2457_v14 }
 0xa5e   : > { %v4517_v53 = vmul.f32 %v4261_v58, %v4437_v44  ;;  %v2489_v0 = vmul.f32 %v4221_v59, %v2455_v52  ;;  %2997 = vst.msk [vmem:[%s4454_s27 + $0x10] sm:$0xff] %vm744_vm0, %v2989_v20  ;;  %v2871_v12 = vrot.slane %v4496_v16, 1  ;;  %v4524_v18 = vmul.f32 %v4225_v8, %v2446_v50 }
 0xa5f   : > { %v2636_v31 = vmul.f32 %v4265_v7, %v2446_v50  ;;  %v2660_v5 = vmul.f32 %v4257_v19, %v2446_v50  ;;  %v4529_v22 = vmul.f32 %v4261_v58, %v2457_v14  ;;  %v2526_v63 = vrot.slane %v2488_v3, 1 }
 0xa60   : > { %v2527_v54 = vrot.slane %v2489_v0, 1  ;;  %v2661_v41 = vmul.f32 %v4257_v19, %v2455_v52  ;;  %v2736_v1 = vmul.f32 %v4259_v24, %v2446_v50  ;;  %v2737_v15 = vmul.f32 %v4259_v24, %v2455_v52 }
 0xa61   : > { %v2644_v2 = vadd.f32 %v2636_v31, %v2624_v49  ;;  %v2696_v48 = vrot.slane %v2660_v5, 1  ;;  %v2471_v62 = vmul.f32 %v4229_v9, %v2446_v50  ;;  %v2566_v45 = vmul.f32 %v4225_v8, %v2455_v52 }
 0xa62   : > { %v2697_v60 = vrot.slane %v2661_v41, 1  ;;  %v2807_v4 = vmul.f32 %v4255_v6, %v2446_v50  ;;  %v2603_v14 = vrot.slane %v4524_v18, 2  ;;  %v2772_v61 = vrot.slane %v2736_v1, 2 }
 0xa63   : > { %v2773_v35 = vrot.slane %v2737_v15, 2  ;;  %v2830_v47 = vmul.f32 %v4243_v37, %v2446_v50  ;;  %v2831_v26 = vmul.f32 %v4243_v37, %v2455_v52  ;;  %v2906_v25 = vmul.f32 %v4261_v58, %v2446_v50 }
 0xa64   : > { %v2698_v23 = vsel %vm2510_vm4, %v2696_v48, %v2697_v60  ;;  %v2815_v40 = vadd.f32 %v2807_v4, %v4380_v29  ;;  %v2528_v34 = vsel %vm2510_vm4, %v2526_v63, %v2527_v54  ;;  %v2907_v42 = vmul.f32 %v4261_v58, %v2455_v52 }
 0xa65   : > { %v2720_v28 = vadd.f32 %v2698_v23, %v2644_v2  ;;  %v2774_v39 = vsel %vm2587_vm5, %v2772_v61, %v2773_v35  ;;  %v2865_v49 = vrot.slane %v2830_v47, 1  ;;  %v2866_v36 = vrot.slane %v2831_v26, 1 }
 0xa66   : > { %v2941_v33 = vrot.slane %v2906_v25, 2  ;;  %v2430_v43 = vrot.slane %v2412_v10, 7  ;;  %v2604_v20 = vrot.slane %v2566_v45, 2  ;;  %v2473_v29 = vmul.f32 %v4229_v9, %v4437_v44 }
 0xa67   : > { %v4546_v3 = vadd.f32 %v2774_v39, %v2720_v28  ;;  %v2569_v50 = vmul.f32 %v4225_v8, %v4437_v44  ;;  %v2867_v0 = vsel %vm2510_vm4, %v2865_v49, %v2866_v36  ;;  %v2942_v18 = vrot.slane %v2907_v42, 2 }
 0xa68   : > { %v4554_v31 = vsel %vm2440_vm3, 0.0, %v2430_v43  ;;  %v2458_v5 = vsel %vm2440_vm3, %v2430_v43, 0.0  ;;  %v2548_v52 = vadd.f32 %v2528_v34, %v2471_v62  ;;  %v2891_v63 = vadd.f32 %v2867_v0, %v2815_v40 }
 0xa69   : > { %v2550_v10 = vadd.f32 %v2534_v32, %v2473_v29  ;;  %v2609_v54 = vrot.slane %v2569_v50, 2  ;;  %v2943_v41 = vsel %vm2587_vm5, %v2941_v33, %v2942_v18  ;;  %v2666_v2 = vmul.f32 %v4257_v19, %v4554_v31 }
 0xa6a   : > { %v2667_v48 = vmul.f32 %v4257_v19, %v2458_v5  ;;  %v2742_v1 = vmul.f32 %v4259_v24, %v4554_v31  ;;  %v2967_v15 = vadd.f32 %v2943_v41, %v2891_v63  ;;  %v2743_v62 = vmul.f32 %v4259_v24, %v2458_v5 }
 0xa6b   : > { %v2611_v45 = vsel %vm2587_vm5, %v2609_v54, %v2610_v17  ;;  %v2428_v32 = vrot.slane %v4504_v30, 7  ;;  %v2639_v4 = vmul.f32 %v4265_v7, %v4554_v31  ;;  %v2705_v61 = vrot.slane %v2666_v2, 1 }
 0xa6c   : > { %v2627_v60 = vadd.f32 %v2611_v45, %v2550_v10  ;;  %v2706_v35 = vrot.slane %v2667_v48, 1  ;;  %v4573_v47 = vsel %vm2587_vm5, %v2778_v55, %v2779_v13  ;;  %v2982_v38 = vadd.f32 %v4431_v56, %v2967_v15 }
 0xa6d   : > { %v2781_v23 = vrot.slane %v2742_v1, 2  ;;  %v2782_v17 = vrot.slane %v2743_v62, 2  ;;  %v2872_v40 = vrot.slane %v4513_v21, 1  ;;  %v2947_v30 = vrot.slane %v4517_v53, 2 }
 0xa6e   : > { %v2605_v26 = vsel %vm2587_vm5, %v2603_v14, %v2604_v20  ;;  %v2647_v25 = vadd.f32 %v2639_v4, %v2627_v60  ;;  %v2948_v34 = vrot.slane %v4529_v22, 2  ;;  %v2990_v39 = vmax.f32 %v2982_v38, 0.0 }
 0xa6f   : > { %v2625_v28 = vadd.f32 %v2605_v26, %v2548_v52  ;;  %v2707_v46 = vsel %vm2510_vm4, %v2705_v61, %v2706_v35  ;;  %v4583_v13 = vmul.f32 %v4243_v37, %v4554_v31  ;;  %v4586_v49 = vmul.f32 %v4243_v37, %v2458_v5 }
 0xa70   : > { %v2723_v55 = vadd.f32 %v2707_v46, %v2647_v25  ;;  %v2447_v36 = vsel %vm2440_vm3, 0.0, %v2428_v32  ;;  %2998 = vst.msk [vmem:[%s4454_s27 + $0x18] sm:$0xff] %vm744_vm0, %v2990_v39  ;;  %v2783_v14 = vsel %vm2587_vm5, %v2781_v23, %v2782_v17  ;;  %v4594_v42 = vmul.f32 %v4261_v58, %v4554_v31 }
 0xa71   : > { %v2456_v33 = vsel %vm2440_vm3, %v2428_v32, 0.0  ;;  %v2490_v43 = vmul.f32 %v4221_v59, %v2447_v36  ;;  %v4599_v29 = vmul.f32 %v4261_v58, %v2458_v5  ;;  %v2567_v0 = vmul.f32 %v4225_v8, %v2447_v36 }
 0xa72   : > { %v2799_v20 = vadd.f32 %v2783_v14, %v2723_v55  ;;  %v2491_v50 = vmul.f32 %v4221_v59, %v2456_v33  ;;  %v2472_v18 = vmul.f32 %v4229_v9, %v2447_v36  ;;  %v2568_v63 = vmul.f32 %v4225_v8, %v2456_v33 }
 0xa73   : > { %v2529_v52 = vrot.slane %v2490_v43, 1  ;;  %v2637_v10 = vmul.f32 %v4265_v7, %v2447_v36  ;;  %v2606_v2 = vrot.slane %v2567_v0, 2  ;;  %v2662_v48 = vmul.f32 %v4257_v19, %v2447_v36 }
 0xa74   : > { %v2819_v54 = vadd.f32 %v4268_v51, %v2799_v20  ;;  %v2530_v41 = vrot.slane %v2491_v50, 1  ;;  %v2607_v1 = vrot.slane %v2568_v63, 2  ;;  %v2663_v15 = vmul.f32 %v4257_v19, %v2456_v33 }
 0xa75   : > { %v2645_v5 = vadd.f32 %v2637_v10, %v2625_v28  ;;  %v2738_v59 = vmul.f32 %v4259_v24, %v2447_v36  ;;  %v2699_v62 = vrot.slane %v2662_v48, 1  ;;  %v2739_v8 = vmul.f32 %v4259_v24, %v2456_v33 }
 0xa76   : > { %v2895_v45 = vadd.f32 %v4482_v27, %v2819_v54  ;;  %v2531_v9 = vsel %vm2510_vm4, %v2529_v52, %v2530_v41  ;;  %v2638_v51 = vmul.f32 %v4265_v7, %v4437_v44  ;;  %v2700_v60 = vrot.slane %v2663_v15, 1 }
 0xa77   : > { %v2549_v32 = vadd.f32 %v2531_v9, %v2472_v18  ;;  %v2775_v4 = vrot.slane %v2738_v59, 2  ;;  %v2608_v35 = vsel %vm2587_vm5, %v2606_v2, %v2607_v1  ;;  %v2776_v19 = vrot.slane %v2739_v8, 2 }
 0xa78   : > { %v2971_v61 = vadd.f32 %v4489_v57, %v2895_v45  ;;  %v2808_v38 = vmul.f32 %v4255_v6, %v2447_v36  ;;  %v2701_v27 = vsel %vm2510_vm4, %v2699_v62, %v2700_v60  ;;  %v2832_v17 = vmul.f32 %v4243_v37, %v2447_v36 }
 0xa79   : > { %v2626_v23 = vadd.f32 %v2608_v35, %v2549_v32  ;;  %v2833_v24 = vmul.f32 %v4243_v37, %v2456_v33  ;;  %v2721_v25 = vadd.f32 %v2701_v27, %v2645_v5  ;;  %v2777_v7 = vsel %vm2587_vm5, %v2775_v4, %v2776_v19 }
 0xa7a   : > { %v2986_v26 = vadd.f32 %v4431_v56, %v2971_v61  ;;  %v2816_v57 = vadd.f32 %v2808_v38, %v4546_v3  ;;  %v2868_v39 = vrot.slane %v2832_v17, 1  ;;  %v2908_v55 = vmul.f32 %v4261_v58, %v2447_v36 }
 0xa7b   : > { %v2646_v28 = vadd.f32 %v2638_v51, %v2626_v23  ;;  %v2869_v46 = vrot.slane %v2833_v24, 1  ;;  %v2797_v43 = vadd.f32 %v2777_v7, %v2721_v25  ;;  %v2809_v20 = vmul.f32 %v4255_v6, %v4437_v44 }
 0xa7c   : > { %v2994_v14 = vmax.f32 %v2986_v26, 0.0  ;;  %v2909_v37 = vmul.f32 %v4261_v58, %v2456_v33  ;;  %v2874_v50 = vrot.slane %v4583_v13, 1  ;;  %v2944_v52 = vrot.slane %v2908_v55, 2 }
 0xa7d   : > { %v2722_v0 = vadd.f32 %v4508_v11, %v2646_v28  ;;  %v2870_v18 = vsel %vm2510_vm4, %v2868_v39, %v2869_v46  ;;  %v2875_v3 = vrot.slane %v4586_v49, 1  ;;  %v2817_v63 = vadd.f32 %v2809_v20, %v2797_v43 }
 0xa7e   : > { %3002 = vst.msk [vmem:[%s4454_s27 + $0x38] sm:$0xff] %vm744_vm0, %v2994_v14  ;;  %v2892_v36 = vadd.f32 %v2870_v18, %v2816_v57  ;;  %v2945_v10 = vrot.slane %v2909_v37, 2  ;;  %v2873_v58 = vsel %vm2510_vm4, %v2871_v12, %v2872_v40  ;;  %v2810_v44 = vmul.f32 %v4255_v6, %v4554_v31 }
 0xa7f   : > { %v2798_v11 = vadd.f32 %v4573_v47, %v2722_v0  ;;  %v2950_v13 = vrot.slane %v4594_v42, 2  ;;  %v2951_v49 = vrot.slane %v4599_v29, 2  ;;  %v2893_v33 = vadd.f32 %v2873_v58, %v2817_v63 }
 0xa80   : > { %v2946_v54 = vsel %vm2587_vm5, %v2944_v52, %v2945_v10  ;;  %v2949_v16 = vsel %vm2587_vm5, %v2947_v30, %v2948_v34  ;;  %v2876_v12 = vsel %vm2510_vm4, %v2874_v50, %v2875_v3 }
 0xa81   : > { %v2818_v21 = vadd.f32 %v2810_v44, %v2798_v11  ;;  %v2968_v6 = vadd.f32 %v2946_v54, %v2892_v36  ;;  %v2969_v31 = vadd.f32 %v2949_v16, %v2893_v33  ;;  %v2952_v42 = vsel %vm2587_vm5, %v2950_v13, %v2951_v49 }
 0xa83   : > { %v2894_v47 = vadd.f32 %v2876_v12, %v2818_v21  ;;  %v2983_v40 = vadd.f32 %v4431_v56, %v2968_v6  ;;  %v2984_v29 = vadd.f32 %v4431_v56, %v2969_v31 }
 0xa85   : > { %v2970_v41 = vadd.f32 %v2952_v42, %v2894_v47  ;;  %v2991_v2 = vmax.f32 %v2983_v40, 0.0  ;;  %v2992_v22 = vmax.f32 %v2984_v29, 0.0 }
 0xa87   : > { %v2985_v53 = vadd.f32 %v4431_v56, %v2970_v41  ;;  %2999 = vst.msk [vmem:[%s4454_s27 + $0x20] sm:$0xff] %vm744_vm0, %v2991_v2  ;;  %3000 = vst.msk [vmem:[%s4454_s27 + $0x28] sm:$0xff] %vm744_vm0, %v2992_v22 }
 0xa89   : > { %v2993_v30 = vmax.f32 %v2985_v53, 0.0 }
 0xa8b   : > { %3001 = vst.msk [vmem:[%s4454_s27 + $0x30] sm:$0xff] %vm744_vm0, %v2993_v30 }
 0xa8c PF: > { %s33_s4 = sadd.s32 1, %s3535_s4  }
 0xa8d   : > { %p30_p4 = scmp.ge.s32.totalorder %s33_s4, 4  }
 0xa8f   :  { %32 = sbr.rel (!%p30_p4) target bundleno = 9 (0x9), region = 145 }

</bundles_post_ra>
